<compile_context>
chip_gen: v7x
topology: tpu7x:2x2x1
jax: 0.10.0
libtpu: 0.0.40
codegen_flags: <defaults>
</compile_context>

<pallas_src>
import numpy as np

import jax
import jax.numpy as jnp
from jax.experimental import pallas as pl
from jax.experimental.pallas import tpu as pltpu


# ----------------------------------------------------------------------------
# Static layer-configuration helpers (never passed through jit)
# ----------------------------------------------------------------------------
def _encoder_layer_cfgs(isize, nz, nc, ndf, n_extra_layers=0, add_final_conv=True):
    assert isize % 16 == 0, "isize has to be a multiple of 16"
    cfgs = [dict(cin=nc, cout=ndf, K=4, S=2, P=1, bn=False, act="leaky")]
    csize, cndf = isize // 2, ndf
    for _ in range(n_extra_layers):
        cfgs.append(dict(cin=cndf, cout=cndf, K=3, S=1, P=1, bn=True, act="leaky"))
    while csize > 4:
        cfgs.append(dict(cin=cndf, cout=cndf * 2, K=4, S=2, P=1, bn=True, act="leaky"))
        cndf *= 2
        csize //= 2
    if add_final_conv:
        cfgs.append(dict(cin=cndf, cout=nz, K=4, S=1, P=0, bn=False, act="none"))
    L = isize
    for c in cfgs:
        c["Lin"] = L
        c["Lout"] = (L + 2 * c["P"] - c["K"]) // c["S"] + 1
        L = c["Lout"]
    return cfgs


def _selection_matrices(L, Lout, K, S, P):
    """G[k, t, p] = 1  iff  input position p == t*S + k - P (zero-padding -> all-zero row)."""
    G = np.zeros((K, Lout, L), np.float32)
    for k in range(K):
        for t in range(Lout):
            p = t * S + k - P
            if 0 <= p < L:
                G[k, t, p] = 1.0
    return G


# ----------------------------------------------------------------------------
# Fused kernel builder: whole BiVi_NetD forward inside one kernel body
# ----------------------------------------------------------------------------
def _make_fused_kernel(plan_z, plan_x, plan_c, N):
    NEG = 0.2
    EPS = 1e-5

    def _leaky(v):
        return jnp.where(v >= 0, v, NEG * v)

    def _cl_layer(acts, prefs, d):
        """Channels-last conv layer: acts = list of N arrays (Lin, Cin) f32."""
        g_ref = prefs[d["g"]]      # (K, Lout, Lin)  bf16 0/1
        w_ref = prefs[d["w"]]      # (K, Cin, Cout)  bf16
        outs = []
        for a in acts:
            ab = a.astype(jnp.bfloat16)
            acc = None
            for k in range(d["K"]):
                sel = jnp.dot(g_ref[k], ab, preferred_element_type=jnp.float32)
                term = jnp.dot(sel.astype(jnp.bfloat16), w_ref[k],
                               preferred_element_type=jnp.float32)
                acc = term if acc is None else acc + term
            outs.append(acc)                                   # (Lout, Cout) f32
        if d["bn"]:
            cnt = float(N * d["Lout"])
            mean = sum(jnp.sum(o, axis=0, keepdims=True) for o in outs) / cnt
            var = sum(jnp.sum(jnp.square(o - mean), axis=0, keepdims=True)
                      for o in outs) / cnt
            inv = jax.lax.rsqrt(var + EPS)
            gam = prefs[d["gamma"]][...]                       # (1, Cout) f32
            bet = prefs[d["beta"]][...]
            outs = [(o - mean) * inv * gam + bet for o in outs]
        if d["act"] == "leaky":
            outs = [_leaky(o) for o in outs]
        return outs

    def _cf_layer(acts, prefs, d, split=None):
        """Channels-first conv layer: acts = list of N arrays (Cin, Lin) f32.
        If split is not None, each act is a (z_feat, x_feat) pair of (1, split)
        rows and the concat along L is folded into split selection matrices."""
        g_ref = prefs[d["g"]]      # (K, Lin, Cout->Lout)  i.e. (K, Lin, Lout) bf16
        w_ref = prefs[d["w"]]      # (K, Cout, Cin) bf16
        outs = []
        for a in acts:
            acc = None
            for k in range(d["K"]):
                gk = g_ref[k]                                   # (Lin, Lout)
                if split is None:
                    sel = jnp.dot(a.astype(jnp.bfloat16), gk,
                                  preferred_element_type=jnp.float32)   # (Cin, Lout)
                else:
                    za, xa = a                                  # each (1, split) f32
                    sel = (jnp.dot(za.astype(jnp.bfloat16), gk[:split, :],
                                   preferred_element_type=jnp.float32) +
                           jnp.dot(xa.astype(jnp.bfloat16), gk[split:, :],
                                   preferred_element_type=jnp.float32))
                term = jnp.dot(w_ref[k], sel.astype(jnp.bfloat16),
                               preferred_element_type=jnp.float32)      # (Cout, Lout)
                acc = term if acc is None else acc + term
            outs.append(acc)
        if d["bn"]:
            cnt = float(N * d["Lout"])
            mean = sum(jnp.sum(o, axis=1, keepdims=True) for o in outs) / cnt
            var = sum(jnp.sum(jnp.square(o - mean), axis=1, keepdims=True)
                      for o in outs) / cnt
            inv = jax.lax.rsqrt(var + EPS)
            gam = prefs[d["gamma"]][...]                        # (Cout, 1) f32
            bet = prefs[d["beta"]][...]
            outs = [(o - mean) * inv * gam + bet for o in outs]
        if d["act"] == "leaky":
            outs = [_leaky(o) for o in outs]
        elif d["act"] == "sigmoid":
            outs = [1.0 / (1.0 + jnp.exp(-o)) for o in outs]
        return outs

    def kernel(*args):
        z_ref, x_ref = args[0], args[1]
        prefs = args[2:-1]
        out_ref = args[-1]

        # Per-sample channels-last activations (everything below stays in VMEM/vregs).
        z_acts = [z_ref[n].astype(jnp.float32) for n in range(N)]   # (Lz, Cz)
        x_acts = [x_ref[n].astype(jnp.float32) for n in range(N)]

        for d in plan_z:
            z_acts = _cl_layer(z_acts, prefs, d)
        for d in plan_x:
            x_acts = _cl_layer(x_acts, prefs, d)

        # torch.cat(dim=1) + permute(0,2,1): classifier input per sample is the
        # (1, feature_ch) row [z_feature channels | x_feature channels].
        split = plan_z[-1]["cout"]                  # feature_ch // 2
        cls_acts = list(zip(z_acts, x_acts))        # each element: ((1, split), (1, split))
        for i, d in enumerate(plan_c):
            cls_acts = _cf_layer(cls_acts, prefs, d, split=split if i == 0 else None)

        for n in range(N):                          # cls_acts[n] is (1, 1) f32
            out_ref[pl.ds(n, 1), :] = cls_acts[n]

    return kernel


# ----------------------------------------------------------------------------
# Model construction: array params (pytree) + static plan closed over by forward
# ----------------------------------------------------------------------------
def make_bivi_netd(opt, key):
    F = opt["feature_ch"]
    cfg_z = _encoder_layer_cfgs(opt["z_size"], F // 2, opt["z_ch"], opt["ndf"],
                                opt["extralayers"])
    cfg_x = _encoder_layer_cfgs(opt["signal_size"], F // 2, opt["signal_ch"],
                                opt["ndf"], opt["extralayers"])
    cfg_c = _encoder_layer_cfgs(F, 1, 1, opt["ndf"], opt["extralayers"])
    cfg_c[-1]["act"] = "sigmoid"                    # classifier appends nn.Sigmoid()

    params = []                                     # flat list of arrays (jit pytree)
    keys = iter(jax.random.split(key, 256))

    def add(arr):
        params.append(arr)
        return len(params) - 1

    def build_plan(cfgs, layout):
        plan, raw = [], []
        for c in cfgs:
            K, S, P = c["K"], c["S"], c["P"]
            Lin, Lout = c["Lin"], c["Lout"]
            cin, cout = c["cin"], c["cout"]
            w = jax.random.normal(next(keys), (cout, cin, K), jnp.float32) * 0.02
            G = _selection_matrices(Lin, Lout, K, S, P)                 # (K, Lout, Lin)
            if layout == "cl":
                w_arr = jnp.transpose(w, (2, 1, 0)).astype(jnp.bfloat16)   # (K, cin, cout)
                g_arr = jnp.asarray(G, jnp.bfloat16)                       # (K, Lout, Lin)
            else:
                w_arr = jnp.transpose(w, (2, 0, 1)).astype(jnp.bfloat16)   # (K, cout, cin)
                g_arr = jnp.asarray(np.transpose(G, (0, 2, 1)), jnp.bfloat16)  # (K, Lin, Lout)
            d = dict(K=K, Lin=Lin, Lout=Lout, cin=cin, cout=cout,
                     bn=c["bn"], act=c["act"], layout=layout,
                     w=add(w_arr), g=add(g_arr), gamma=None, beta=None)
            gamma_raw = jnp.ones((cout,), jnp.float32)   # PyTorch BN defaults
            beta_raw = jnp.zeros((cout,), jnp.float32)
            if c["bn"]:
                shape = (1, cout) if layout == "cl" else (cout, 1)
                d["gamma"] = add(gamma_raw.reshape(shape))
                d["beta"] = add(beta_raw.reshape(shape))
            plan.append(d)
            raw.append(dict(w=w, K=K, S=S, P=P, bn=c["bn"], act=c["act"],
                            gamma=gamma_raw, beta=beta_raw))
        return plan, raw

    plan_z, raw_z = build_plan(cfg_z, "cl")
    plan_x, raw_x = build_plan(cfg_x, "cl")
    plan_c, raw_c = build_plan(cfg_c, "cf")
    n_params = len(params)

    def forward(param_list, z, x):
        N = z.shape[0]
        z_cl = jnp.transpose(z, (0, 2, 1)).astype(jnp.float32)   # (N, Lz, Cz)
        x_cl = jnp.transpose(x, (0, 2, 1)).astype(jnp.float32)
        kernel = _make_fused_kernel(plan_z, plan_x, plan_c, N)
        out = pl.pallas_call(
            kernel,
            out_shape=jax.ShapeDtypeStruct((N, 1), jnp.float32),
            in_specs=[pl.BlockSpec(memory_space=pltpu.MemorySpace.VMEM)] * (2 + n_params),
            out_specs=pl.BlockSpec(memory_space=pltpu.MemorySpace.VMEM),
        )(z_cl, x_cl, *param_list)
        return out.reshape(-1)

    # -------- pure-JAX reference (no Pallas) for correctness checking --------
    def _ref_encoder(inp, raw):
        y = inp
        for lyr in raw:
            y = jax.lax.conv_general_dilated(
                y, lyr["w"], window_strides=(lyr["S"],),
                padding=[(lyr["P"], lyr["P"])],
                dimension_numbers=("NCH", "OIH", "NCH"))
            if lyr["bn"]:
                m = jnp.mean(y, axis=(0, 2), keepdims=True)
                v = jnp.mean(jnp.square(y - m), axis=(0, 2), keepdims=True)
                y = (y - m) * jax.lax.rsqrt(v + 1e-5)
                y = y * lyr["gamma"].reshape(1, -1, 1) + lyr["beta"].reshape(1, -1, 1)
            if lyr["act"] == "leaky":
                y = jnp.where(y >= 0, y, 0.2 * y)
            elif lyr["act"] == "sigmoid":
                y = jax.nn.sigmoid(y)
        return y

    def reference_forward(z, x):
        zf = _ref_encoder(z, raw_z)
        xf = _ref_encoder(x, raw_x)
        feat = jnp.concatenate([zf, xf], axis=1)
        feat = jnp.transpose(feat, (0, 2, 1))
        res = _ref_encoder(feat, raw_c)
        return res.reshape(-1)

    return params, forward, reference_forward


# ----------------------------------------------------------------------------
if __name__ == "__main__":
    opt = dict(
        z_size=16,       # multiple of 16
        signal_size=16,  # multiple of 16
        feature_ch=16,   # classifier isize (multiple of 16)
        z_ch=4,
        signal_ch=4,
        ndf=16,
        extralayers=0,
    )
    batch = 2

    key = jax.random.PRNGKey(0)
    kp, kz, kx = jax.random.split(key, 3)
    params, forward, reference_forward = make_bivi_netd(opt, kp)

    z = jax.random.normal(kz, (batch, opt["z_ch"], opt["z_size"]), jnp.float32)
    x = jax.random.normal(kx, (batch, opt["signal_ch"], opt["signal_size"]),
                          jnp.float32)

    out = jax.jit(forward)(params, z, x)
    out = jax.block_until_ready(out)
    assert out.shape == (batch,)
    assert bool(jnp.all(jnp.isfinite(out)))

    # Cross-check against a pure-JAX (f32) reference; loose tol for bf16 MXU inputs.
    ref = jax.block_until_ready(reference_forward(z, x))
    assert bool(jnp.all(jnp.abs(out - ref) < 5e-2)), (out, ref)

    print("KERNEL_OK")
</pallas_src>

<mosaic_0001>
module attributes {stable_mosaic.version = 11 : i64} {
  func.func @kernel(%arg0: memref<2x16x4xf32, #tpu.memory_space<vmem>>, %arg1: memref<2x16x4xf32, #tpu.memory_space<vmem>>, %arg2: memref<4x4x16xbf16, #tpu.memory_space<vmem>>, %arg3: memref<4x8x16xbf16, #tpu.memory_space<vmem>>, %arg4: memref<4x16x32xbf16, #tpu.memory_space<vmem>>, %arg5: memref<4x4x8xbf16, #tpu.memory_space<vmem>>, %arg6: memref<1x32xf32, #tpu.memory_space<vmem>>, %arg7: memref<1x32xf32, #tpu.memory_space<vmem>>, %arg8: memref<4x32x8xbf16, #tpu.memory_space<vmem>>, %arg9: memref<4x1x4xbf16, #tpu.memory_space<vmem>>, %arg10: memref<4x4x16xbf16, #tpu.memory_space<vmem>>, %arg11: memref<4x8x16xbf16, #tpu.memory_space<vmem>>, %arg12: memref<4x16x32xbf16, #tpu.memory_space<vmem>>, %arg13: memref<4x4x8xbf16, #tpu.memory_space<vmem>>, %arg14: memref<1x32xf32, #tpu.memory_space<vmem>>, %arg15: memref<1x32xf32, #tpu.memory_space<vmem>>, %arg16: memref<4x32x8xbf16, #tpu.memory_space<vmem>>, %arg17: memref<4x1x4xbf16, #tpu.memory_space<vmem>>, %arg18: memref<4x16x1xbf16, #tpu.memory_space<vmem>>, %arg19: memref<4x16x8xbf16, #tpu.memory_space<vmem>>, %arg20: memref<4x32x16xbf16, #tpu.memory_space<vmem>>, %arg21: memref<4x8x4xbf16, #tpu.memory_space<vmem>>, %arg22: memref<32x1xf32, #tpu.memory_space<vmem>>, %arg23: memref<32x1xf32, #tpu.memory_space<vmem>>, %arg24: memref<4x1x32xbf16, #tpu.memory_space<vmem>>, %arg25: memref<4x4x1xbf16, #tpu.memory_space<vmem>>, %arg26: memref<2x1xf32, #tpu.memory_space<vmem>>) attributes {dimension_semantics = [], scalar_prefetch = 0 : i64, scratch_operands = 0 : i64, tpu.core_type = #tpu.core_type<tc>} {
    %c0 = arith.constant 0 : index
    %c0_0 = arith.constant 0 : index
    %c0_1 = arith.constant 0 : index
    %0 = vector.load %arg0[%c0, %c0_0, %c0_1] : memref<2x16x4xf32, #tpu.memory_space<vmem>>, vector<1x16x4xf32>
    %1 = vector.shape_cast %0 : vector<1x16x4xf32> to vector<16x4xf32>
    %c1 = arith.constant 1 : index
    %c0_2 = arith.constant 0 : index
    %c0_3 = arith.constant 0 : index
    %2 = vector.load %arg0[%c1, %c0_2, %c0_3] : memref<2x16x4xf32, #tpu.memory_space<vmem>>, vector<1x16x4xf32>
    %3 = vector.shape_cast %2 : vector<1x16x4xf32> to vector<16x4xf32>
    %c0_4 = arith.constant 0 : index
    %c0_5 = arith.constant 0 : index
    %c0_6 = arith.constant 0 : index
    %4 = vector.load %arg1[%c0_4, %c0_5, %c0_6] : memref<2x16x4xf32, #tpu.memory_space<vmem>>, vector<1x16x4xf32>
    %5 = vector.shape_cast %4 : vector<1x16x4xf32> to vector<16x4xf32>
    %c1_7 = arith.constant 1 : index
    %c0_8 = arith.constant 0 : index
    %c0_9 = arith.constant 0 : index
    %6 = vector.load %arg1[%c1_7, %c0_8, %c0_9] : memref<2x16x4xf32, #tpu.memory_space<vmem>>, vector<1x16x4xf32>
    %7 = vector.shape_cast %6 : vector<1x16x4xf32> to vector<16x4xf32>
    %8 = arith.truncf %1 : vector<16x4xf32> to vector<16x4xbf16>
    %c0_10 = arith.constant 0 : index
    %c0_11 = arith.constant 0 : index
    %c0_12 = arith.constant 0 : index
    %9 = vector.load %arg3[%c0_10, %c0_11, %c0_12] : memref<4x8x16xbf16, #tpu.memory_space<vmem>>, vector<1x8x16xbf16>
    %10 = vector.shape_cast %9 : vector<1x8x16xbf16> to vector<8x16xbf16>
    %cst = arith.constant dense<0.000000e+00> : vector<8x4xf32>
    %11 = tpu.matmul %10, %8, %cst {dimension_numbers = #tpu.dot_dimension_numbers<[1], [0], [0], [1], [0, 0, 1, 1], [], []>} : vector<8x16xbf16>, vector<16x4xbf16>, vector<8x4xf32> -> vector<8x4xf32>
    %12 = arith.truncf %11 : vector<8x4xf32> to vector<8x4xbf16>
    %c0_13 = arith.constant 0 : index
    %c0_14 = arith.constant 0 : index
    %c0_15 = arith.constant 0 : index
    %13 = vector.load %arg2[%c0_13, %c0_14, %c0_15] : memref<4x4x16xbf16, #tpu.memory_space<vmem>>, vector<1x4x16xbf16>
    %14 = vector.shape_cast %13 : vector<1x4x16xbf16> to vector<4x16xbf16>
    %cst_16 = arith.constant dense<0.000000e+00> : vector<8x16xf32>
    %15 = tpu.matmul %12, %14, %cst_16 {dimension_numbers = #tpu.dot_dimension_numbers<[1], [0], [0], [1], [0, 0, 1, 1], [], []>} : vector<8x4xbf16>, vector<4x16xbf16>, vector<8x16xf32> -> vector<8x16xf32>
    %c1_17 = arith.constant 1 : index
    %c0_18 = arith.constant 0 : index
    %c0_19 = arith.constant 0 : index
    %16 = vector.load %arg3[%c1_17, %c0_18, %c0_19] : memref<4x8x16xbf16, #tpu.memory_space<vmem>>, vector<1x8x16xbf16>
    %17 = vector.shape_cast %16 : vector<1x8x16xbf16> to vector<8x16xbf16>
    %cst_20 = arith.constant dense<0.000000e+00> : vector<8x4xf32>
    %18 = tpu.matmul %17, %8, %cst_20 {dimension_numbers = #tpu.dot_dimension_numbers<[1], [0], [0], [1], [0, 0, 1, 1], [], []>} : vector<8x16xbf16>, vector<16x4xbf16>, vector<8x4xf32> -> vector<8x4xf32>
    %19 = arith.truncf %18 : vector<8x4xf32> to vector<8x4xbf16>
    %c1_21 = arith.constant 1 : index
    %c0_22 = arith.constant 0 : index
    %c0_23 = arith.constant 0 : index
    %20 = vector.load %arg2[%c1_21, %c0_22, %c0_23] : memref<4x4x16xbf16, #tpu.memory_space<vmem>>, vector<1x4x16xbf16>
    %21 = vector.shape_cast %20 : vector<1x4x16xbf16> to vector<4x16xbf16>
    %cst_24 = arith.constant dense<0.000000e+00> : vector<8x16xf32>
    %22 = tpu.matmul %19, %21, %cst_24 {dimension_numbers = #tpu.dot_dimension_numbers<[1], [0], [0], [1], [0, 0, 1, 1], [], []>} : vector<8x4xbf16>, vector<4x16xbf16>, vector<8x16xf32> -> vector<8x16xf32>
    %23 = arith.addf %15, %22 : vector<8x16xf32>
    %c2 = arith.constant 2 : index
    %c0_25 = arith.constant 0 : index
    %c0_26 = arith.constant 0 : index
    %24 = vector.load %arg3[%c2, %c0_25, %c0_26] : memref<4x8x16xbf16, #tpu.memory_space<vmem>>, vector<1x8x16xbf16>
    %25 = vector.shape_cast %24 : vector<1x8x16xbf16> to vector<8x16xbf16>
    %cst_27 = arith.constant dense<0.000000e+00> : vector<8x4xf32>
    %26 = tpu.matmul %25, %8, %cst_27 {dimension_numbers = #tpu.dot_dimension_numbers<[1], [0], [0], [1], [0, 0, 1, 1], [], []>} : vector<8x16xbf16>, vector<16x4xbf16>, vector<8x4xf32> -> vector<8x4xf32>
    %27 = arith.truncf %26 : vector<8x4xf32> to vector<8x4xbf16>
    %c2_28 = arith.constant 2 : index
    %c0_29 = arith.constant 0 : index
    %c0_30 = arith.constant 0 : index
    %28 = vector.load %arg2[%c2_28, %c0_29, %c0_30] : memref<4x4x16xbf16, #tpu.memory_space<vmem>>, vector<1x4x16xbf16>
    %29 = vector.shape_cast %28 : vector<1x4x16xbf16> to vector<4x16xbf16>
    %cst_31 = arith.constant dense<0.000000e+00> : vector<8x16xf32>
    %30 = tpu.matmul %27, %29, %cst_31 {dimension_numbers = #tpu.dot_dimension_numbers<[1], [0], [0], [1], [0, 0, 1, 1], [], []>} : vector<8x4xbf16>, vector<4x16xbf16>, vector<8x16xf32> -> vector<8x16xf32>
    %31 = arith.addf %23, %30 : vector<8x16xf32>
    %c3 = arith.constant 3 : index
    %c0_32 = arith.constant 0 : index
    %c0_33 = arith.constant 0 : index
    %32 = vector.load %arg3[%c3, %c0_32, %c0_33] : memref<4x8x16xbf16, #tpu.memory_space<vmem>>, vector<1x8x16xbf16>
    %33 = vector.shape_cast %32 : vector<1x8x16xbf16> to vector<8x16xbf16>
    %cst_34 = arith.constant dense<0.000000e+00> : vector<8x4xf32>
    %34 = tpu.matmul %33, %8, %cst_34 {dimension_numbers = #tpu.dot_dimension_numbers<[1], [0], [0], [1], [0, 0, 1, 1], [], []>} : vector<8x16xbf16>, vector<16x4xbf16>, vector<8x4xf32> -> vector<8x4xf32>
    %35 = arith.truncf %34 : vector<8x4xf32> to vector<8x4xbf16>
    %c3_35 = arith.constant 3 : index
    %c0_36 = arith.constant 0 : index
    %c0_37 = arith.constant 0 : index
    %36 = vector.load %arg2[%c3_35, %c0_36, %c0_37] : memref<4x4x16xbf16, #tpu.memory_space<vmem>>, vector<1x4x16xbf16>
    %37 = vector.shape_cast %36 : vector<1x4x16xbf16> to vector<4x16xbf16>
    %cst_38 = arith.constant dense<0.000000e+00> : vector<8x16xf32>
    %38 = tpu.matmul %35, %37, %cst_38 {dimension_numbers = #tpu.dot_dimension_numbers<[1], [0], [0], [1], [0, 0, 1, 1], [], []>} : vector<8x4xbf16>, vector<4x16xbf16>, vector<8x16xf32> -> vector<8x16xf32>
    %39 = arith.addf %31, %38 : vector<8x16xf32>
    %40 = arith.truncf %3 : vector<16x4xf32> to vector<16x4xbf16>
    %c0_39 = arith.constant 0 : index
    %c0_40 = arith.constant 0 : index
    %c0_41 = arith.constant 0 : index
    %41 = vector.load %arg3[%c0_39, %c0_40, %c0_41] : memref<4x8x16xbf16, #tpu.memory_space<vmem>>, vector<1x8x16xbf16>
    %42 = vector.shape_cast %41 : vector<1x8x16xbf16> to vector<8x16xbf16>
    %cst_42 = arith.constant dense<0.000000e+00> : vector<8x4xf32>
    %43 = tpu.matmul %42, %40, %cst_42 {dimension_numbers = #tpu.dot_dimension_numbers<[1], [0], [0], [1], [0, 0, 1, 1], [], []>} : vector<8x16xbf16>, vector<16x4xbf16>, vector<8x4xf32> -> vector<8x4xf32>
    %44 = arith.truncf %43 : vector<8x4xf32> to vector<8x4xbf16>
    %c0_43 = arith.constant 0 : index
    %c0_44 = arith.constant 0 : index
    %c0_45 = arith.constant 0 : index
    %45 = vector.load %arg2[%c0_43, %c0_44, %c0_45] : memref<4x4x16xbf16, #tpu.memory_space<vmem>>, vector<1x4x16xbf16>
    %46 = vector.shape_cast %45 : vector<1x4x16xbf16> to vector<4x16xbf16>
    %cst_46 = arith.constant dense<0.000000e+00> : vector<8x16xf32>
    %47 = tpu.matmul %44, %46, %cst_46 {dimension_numbers = #tpu.dot_dimension_numbers<[1], [0], [0], [1], [0, 0, 1, 1], [], []>} : vector<8x4xbf16>, vector<4x16xbf16>, vector<8x16xf32> -> vector<8x16xf32>
    %c1_47 = arith.constant 1 : index
    %c0_48 = arith.constant 0 : index
    %c0_49 = arith.constant 0 : index
    %48 = vector.load %arg3[%c1_47, %c0_48, %c0_49] : memref<4x8x16xbf16, #tpu.memory_space<vmem>>, vector<1x8x16xbf16>
    %49 = vector.shape_cast %48 : vector<1x8x16xbf16> to vector<8x16xbf16>
    %cst_50 = arith.constant dense<0.000000e+00> : vector<8x4xf32>
    %50 = tpu.matmul %49, %40, %cst_50 {dimension_numbers = #tpu.dot_dimension_numbers<[1], [0], [0], [1], [0, 0, 1, 1], [], []>} : vector<8x16xbf16>, vector<16x4xbf16>, vector<8x4xf32> -> vector<8x4xf32>
    %51 = arith.truncf %50 : vector<8x4xf32> to vector<8x4xbf16>
    %c1_51 = arith.constant 1 : index
    %c0_52 = arith.constant 0 : index
    %c0_53 = arith.constant 0 : index
    %52 = vector.load %arg2[%c1_51, %c0_52, %c0_53] : memref<4x4x16xbf16, #tpu.memory_space<vmem>>, vector<1x4x16xbf16>
    %53 = vector.shape_cast %52 : vector<1x4x16xbf16> to vector<4x16xbf16>
    %cst_54 = arith.constant dense<0.000000e+00> : vector<8x16xf32>
    %54 = tpu.matmul %51, %53, %cst_54 {dimension_numbers = #tpu.dot_dimension_numbers<[1], [0], [0], [1], [0, 0, 1, 1], [], []>} : vector<8x4xbf16>, vector<4x16xbf16>, vector<8x16xf32> -> vector<8x16xf32>
    %55 = arith.addf %47, %54 : vector<8x16xf32>
    %c2_55 = arith.constant 2 : index
    %c0_56 = arith.constant 0 : index
    %c0_57 = arith.constant 0 : index
    %56 = vector.load %arg3[%c2_55, %c0_56, %c0_57] : memref<4x8x16xbf16, #tpu.memory_space<vmem>>, vector<1x8x16xbf16>
    %57 = vector.shape_cast %56 : vector<1x8x16xbf16> to vector<8x16xbf16>
    %cst_58 = arith.constant dense<0.000000e+00> : vector<8x4xf32>
    %58 = tpu.matmul %57, %40, %cst_58 {dimension_numbers = #tpu.dot_dimension_numbers<[1], [0], [0], [1], [0, 0, 1, 1], [], []>} : vector<8x16xbf16>, vector<16x4xbf16>, vector<8x4xf32> -> vector<8x4xf32>
    %59 = arith.truncf %58 : vector<8x4xf32> to vector<8x4xbf16>
    %c2_59 = arith.constant 2 : index
    %c0_60 = arith.constant 0 : index
    %c0_61 = arith.constant 0 : index
    %60 = vector.load %arg2[%c2_59, %c0_60, %c0_61] : memref<4x4x16xbf16, #tpu.memory_space<vmem>>, vector<1x4x16xbf16>
    %61 = vector.shape_cast %60 : vector<1x4x16xbf16> to vector<4x16xbf16>
    %cst_62 = arith.constant dense<0.000000e+00> : vector<8x16xf32>
    %62 = tpu.matmul %59, %61, %cst_62 {dimension_numbers = #tpu.dot_dimension_numbers<[1], [0], [0], [1], [0, 0, 1, 1], [], []>} : vector<8x4xbf16>, vector<4x16xbf16>, vector<8x16xf32> -> vector<8x16xf32>
    %63 = arith.addf %55, %62 : vector<8x16xf32>
    %c3_63 = arith.constant 3 : index
    %c0_64 = arith.constant 0 : index
    %c0_65 = arith.constant 0 : index
    %64 = vector.load %arg3[%c3_63, %c0_64, %c0_65] : memref<4x8x16xbf16, #tpu.memory_space<vmem>>, vector<1x8x16xbf16>
    %65 = vector.shape_cast %64 : vector<1x8x16xbf16> to vector<8x16xbf16>
    %cst_66 = arith.constant dense<0.000000e+00> : vector<8x4xf32>
    %66 = tpu.matmul %65, %40, %cst_66 {dimension_numbers = #tpu.dot_dimension_numbers<[1], [0], [0], [1], [0, 0, 1, 1], [], []>} : vector<8x16xbf16>, vector<16x4xbf16>, vector<8x4xf32> -> vector<8x4xf32>
    %67 = arith.truncf %66 : vector<8x4xf32> to vector<8x4xbf16>
    %c3_67 = arith.constant 3 : index
    %c0_68 = arith.constant 0 : index
    %c0_69 = arith.constant 0 : index
    %68 = vector.load %arg2[%c3_67, %c0_68, %c0_69] : memref<4x4x16xbf16, #tpu.memory_space<vmem>>, vector<1x4x16xbf16>
    %69 = vector.shape_cast %68 : vector<1x4x16xbf16> to vector<4x16xbf16>
    %cst_70 = arith.constant dense<0.000000e+00> : vector<8x16xf32>
    %70 = tpu.matmul %67, %69, %cst_70 {dimension_numbers = #tpu.dot_dimension_numbers<[1], [0], [0], [1], [0, 0, 1, 1], [], []>} : vector<8x4xbf16>, vector<4x16xbf16>, vector<8x16xf32> -> vector<8x16xf32>
    %71 = arith.addf %63, %70 : vector<8x16xf32>
    %cst_71 = arith.constant 0.000000e+00 : f32
    %72 = vector.broadcast %cst_71 : f32 to vector<8x16xf32>
    %73 = arith.cmpf oge, %39, %72 : vector<8x16xf32>
    %cst_72 = arith.constant 2.000000e-01 : f32
    %74 = vector.broadcast %cst_72 : f32 to vector<8x16xf32>
    %75 = arith.mulf %74, %39 : vector<8x16xf32>
    %76 = arith.select %73, %39, %75 : vector<8x16xi1>, vector<8x16xf32>
    %cst_73 = arith.constant 0.000000e+00 : f32
    %77 = vector.broadcast %cst_73 : f32 to vector<8x16xf32>
    %78 = arith.cmpf oge, %71, %77 : vector<8x16xf32>
    %cst_74 = arith.constant 2.000000e-01 : f32
    %79 = vector.broadcast %cst_74 : f32 to vector<8x16xf32>
    %80 = arith.mulf %79, %71 : vector<8x16xf32>
    %81 = arith.select %78, %71, %80 : vector<8x16xi1>, vector<8x16xf32>
    %82 = arith.truncf %76 : vector<8x16xf32> to vector<8x16xbf16>
    %c0_75 = arith.constant 0 : index
    %c0_76 = arith.constant 0 : index
    %c0_77 = arith.constant 0 : index
    %83 = vector.load %arg5[%c0_75, %c0_76, %c0_77] : memref<4x4x8xbf16, #tpu.memory_space<vmem>>, vector<1x4x8xbf16>
    %84 = vector.shape_cast %83 : vector<1x4x8xbf16> to vector<4x8xbf16>
    %cst_78 = arith.constant dense<0.000000e+00> : vector<4x16xf32>
    %85 = tpu.matmul %84, %82, %cst_78 {dimension_numbers = #tpu.dot_dimension_numbers<[1], [0], [0], [1], [0, 0, 1, 1], [], []>} : vector<4x8xbf16>, vector<8x16xbf16>, vector<4x16xf32> -> vector<4x16xf32>
    %86 = arith.truncf %85 : vector<4x16xf32> to vector<4x16xbf16>
    %c0_79 = arith.constant 0 : index
    %c0_80 = arith.constant 0 : index
    %c0_81 = arith.constant 0 : index
    %87 = vector.load %arg4[%c0_79, %c0_80, %c0_81] : memref<4x16x32xbf16, #tpu.memory_space<vmem>>, vector<1x16x32xbf16>
    %88 = vector.shape_cast %87 : vector<1x16x32xbf16> to vector<16x32xbf16>
    %cst_82 = arith.constant dense<0.000000e+00> : vector<4x32xf32>
    %89 = tpu.matmul %86, %88, %cst_82 {dimension_numbers = #tpu.dot_dimension_numbers<[1], [0], [0], [1], [0, 0, 1, 1], [], []>} : vector<4x16xbf16>, vector<16x32xbf16>, vector<4x32xf32> -> vector<4x32xf32>
    %c1_83 = arith.constant 1 : index
    %c0_84 = arith.constant 0 : index
    %c0_85 = arith.constant 0 : index
    %90 = vector.load %arg5[%c1_83, %c0_84, %c0_85] : memref<4x4x8xbf16, #tpu.memory_space<vmem>>, vector<1x4x8xbf16>
    %91 = vector.shape_cast %90 : vector<1x4x8xbf16> to vector<4x8xbf16>
    %cst_86 = arith.constant dense<0.000000e+00> : vector<4x16xf32>
    %92 = tpu.matmul %91, %82, %cst_86 {dimension_numbers = #tpu.dot_dimension_numbers<[1], [0], [0], [1], [0, 0, 1, 1], [], []>} : vector<4x8xbf16>, vector<8x16xbf16>, vector<4x16xf32> -> vector<4x16xf32>
    %93 = arith.truncf %92 : vector<4x16xf32> to vector<4x16xbf16>
    %c1_87 = arith.constant 1 : index
    %c0_88 = arith.constant 0 : index
    %c0_89 = arith.constant 0 : index
    %94 = vector.load %arg4[%c1_87, %c0_88, %c0_89] : memref<4x16x32xbf16, #tpu.memory_space<vmem>>, vector<1x16x32xbf16>
    %95 = vector.shape_cast %94 : vector<1x16x32xbf16> to vector<16x32xbf16>
    %cst_90 = arith.constant dense<0.000000e+00> : vector<4x32xf32>
    %96 = tpu.matmul %93, %95, %cst_90 {dimension_numbers = #tpu.dot_dimension_numbers<[1], [0], [0], [1], [0, 0, 1, 1], [], []>} : vector<4x16xbf16>, vector<16x32xbf16>, vector<4x32xf32> -> vector<4x32xf32>
    %97 = arith.addf %89, %96 : vector<4x32xf32>
    %c2_91 = arith.constant 2 : index
    %c0_92 = arith.constant 0 : index
    %c0_93 = arith.constant 0 : index
    %98 = vector.load %arg5[%c2_91, %c0_92, %c0_93] : memref<4x4x8xbf16, #tpu.memory_space<vmem>>, vector<1x4x8xbf16>
    %99 = vector.shape_cast %98 : vector<1x4x8xbf16> to vector<4x8xbf16>
    %cst_94 = arith.constant dense<0.000000e+00> : vector<4x16xf32>
    %100 = tpu.matmul %99, %82, %cst_94 {dimension_numbers = #tpu.dot_dimension_numbers<[1], [0], [0], [1], [0, 0, 1, 1], [], []>} : vector<4x8xbf16>, vector<8x16xbf16>, vector<4x16xf32> -> vector<4x16xf32>
    %101 = arith.truncf %100 : vector<4x16xf32> to vector<4x16xbf16>
    %c2_95 = arith.constant 2 : index
    %c0_96 = arith.constant 0 : index
    %c0_97 = arith.constant 0 : index
    %102 = vector.load %arg4[%c2_95, %c0_96, %c0_97] : memref<4x16x32xbf16, #tpu.memory_space<vmem>>, vector<1x16x32xbf16>
    %103 = vector.shape_cast %102 : vector<1x16x32xbf16> to vector<16x32xbf16>
    %cst_98 = arith.constant dense<0.000000e+00> : vector<4x32xf32>
    %104 = tpu.matmul %101, %103, %cst_98 {dimension_numbers = #tpu.dot_dimension_numbers<[1], [0], [0], [1], [0, 0, 1, 1], [], []>} : vector<4x16xbf16>, vector<16x32xbf16>, vector<4x32xf32> -> vector<4x32xf32>
    %105 = arith.addf %97, %104 : vector<4x32xf32>
    %c3_99 = arith.constant 3 : index
    %c0_100 = arith.constant 0 : index
    %c0_101 = arith.constant 0 : index
    %106 = vector.load %arg5[%c3_99, %c0_100, %c0_101] : memref<4x4x8xbf16, #tpu.memory_space<vmem>>, vector<1x4x8xbf16>
    %107 = vector.shape_cast %106 : vector<1x4x8xbf16> to vector<4x8xbf16>
    %cst_102 = arith.constant dense<0.000000e+00> : vector<4x16xf32>
    %108 = tpu.matmul %107, %82, %cst_102 {dimension_numbers = #tpu.dot_dimension_numbers<[1], [0], [0], [1], [0, 0, 1, 1], [], []>} : vector<4x8xbf16>, vector<8x16xbf16>, vector<4x16xf32> -> vector<4x16xf32>
    %109 = arith.truncf %108 : vector<4x16xf32> to vector<4x16xbf16>
    %c3_103 = arith.constant 3 : index
    %c0_104 = arith.constant 0 : index
    %c0_105 = arith.constant 0 : index
    %110 = vector.load %arg4[%c3_103, %c0_104, %c0_105] : memref<4x16x32xbf16, #tpu.memory_space<vmem>>, vector<1x16x32xbf16>
    %111 = vector.shape_cast %110 : vector<1x16x32xbf16> to vector<16x32xbf16>
    %cst_106 = arith.constant dense<0.000000e+00> : vector<4x32xf32>
    %112 = tpu.matmul %109, %111, %cst_106 {dimension_numbers = #tpu.dot_dimension_numbers<[1], [0], [0], [1], [0, 0, 1, 1], [], []>} : vector<4x16xbf16>, vector<16x32xbf16>, vector<4x32xf32> -> vector<4x32xf32>
    %113 = arith.addf %105, %112 : vector<4x32xf32>
    %114 = arith.truncf %81 : vector<8x16xf32> to vector<8x16xbf16>
    %c0_107 = arith.constant 0 : index
    %c0_108 = arith.constant 0 : index
    %c0_109 = arith.constant 0 : index
    %115 = vector.load %arg5[%c0_107, %c0_108, %c0_109] : memref<4x4x8xbf16, #tpu.memory_space<vmem>>, vector<1x4x8xbf16>
    %116 = vector.shape_cast %115 : vector<1x4x8xbf16> to vector<4x8xbf16>
    %cst_110 = arith.constant dense<0.000000e+00> : vector<4x16xf32>
    %117 = tpu.matmul %116, %114, %cst_110 {dimension_numbers = #tpu.dot_dimension_numbers<[1], [0], [0], [1], [0, 0, 1, 1], [], []>} : vector<4x8xbf16>, vector<8x16xbf16>, vector<4x16xf32> -> vector<4x16xf32>
    %118 = arith.truncf %117 : vector<4x16xf32> to vector<4x16xbf16>
    %c0_111 = arith.constant 0 : index
    %c0_112 = arith.constant 0 : index
    %c0_113 = arith.constant 0 : index
    %119 = vector.load %arg4[%c0_111, %c0_112, %c0_113] : memref<4x16x32xbf16, #tpu.memory_space<vmem>>, vector<1x16x32xbf16>
    %120 = vector.shape_cast %119 : vector<1x16x32xbf16> to vector<16x32xbf16>
    %cst_114 = arith.constant dense<0.000000e+00> : vector<4x32xf32>
    %121 = tpu.matmul %118, %120, %cst_114 {dimension_numbers = #tpu.dot_dimension_numbers<[1], [0], [0], [1], [0, 0, 1, 1], [], []>} : vector<4x16xbf16>, vector<16x32xbf16>, vector<4x32xf32> -> vector<4x32xf32>
    %c1_115 = arith.constant 1 : index
    %c0_116 = arith.constant 0 : index
    %c0_117 = arith.constant 0 : index
    %122 = vector.load %arg5[%c1_115, %c0_116, %c0_117] : memref<4x4x8xbf16, #tpu.memory_space<vmem>>, vector<1x4x8xbf16>
    %123 = vector.shape_cast %122 : vector<1x4x8xbf16> to vector<4x8xbf16>
    %cst_118 = arith.constant dense<0.000000e+00> : vector<4x16xf32>
    %124 = tpu.matmul %123, %114, %cst_118 {dimension_numbers = #tpu.dot_dimension_numbers<[1], [0], [0], [1], [0, 0, 1, 1], [], []>} : vector<4x8xbf16>, vector<8x16xbf16>, vector<4x16xf32> -> vector<4x16xf32>
    %125 = arith.truncf %124 : vector<4x16xf32> to vector<4x16xbf16>
    %c1_119 = arith.constant 1 : index
    %c0_120 = arith.constant 0 : index
    %c0_121 = arith.constant 0 : index
    %126 = vector.load %arg4[%c1_119, %c0_120, %c0_121] : memref<4x16x32xbf16, #tpu.memory_space<vmem>>, vector<1x16x32xbf16>
    %127 = vector.shape_cast %126 : vector<1x16x32xbf16> to vector<16x32xbf16>
    %cst_122 = arith.constant dense<0.000000e+00> : vector<4x32xf32>
    %128 = tpu.matmul %125, %127, %cst_122 {dimension_numbers = #tpu.dot_dimension_numbers<[1], [0], [0], [1], [0, 0, 1, 1], [], []>} : vector<4x16xbf16>, vector<16x32xbf16>, vector<4x32xf32> -> vector<4x32xf32>
    %129 = arith.addf %121, %128 : vector<4x32xf32>
    %c2_123 = arith.constant 2 : index
    %c0_124 = arith.constant 0 : index
    %c0_125 = arith.constant 0 : index
    %130 = vector.load %arg5[%c2_123, %c0_124, %c0_125] : memref<4x4x8xbf16, #tpu.memory_space<vmem>>, vector<1x4x8xbf16>
    %131 = vector.shape_cast %130 : vector<1x4x8xbf16> to vector<4x8xbf16>
    %cst_126 = arith.constant dense<0.000000e+00> : vector<4x16xf32>
    %132 = tpu.matmul %131, %114, %cst_126 {dimension_numbers = #tpu.dot_dimension_numbers<[1], [0], [0], [1], [0, 0, 1, 1], [], []>} : vector<4x8xbf16>, vector<8x16xbf16>, vector<4x16xf32> -> vector<4x16xf32>
    %133 = arith.truncf %132 : vector<4x16xf32> to vector<4x16xbf16>
    %c2_127 = arith.constant 2 : index
    %c0_128 = arith.constant 0 : index
    %c0_129 = arith.constant 0 : index
    %134 = vector.load %arg4[%c2_127, %c0_128, %c0_129] : memref<4x16x32xbf16, #tpu.memory_space<vmem>>, vector<1x16x32xbf16>
    %135 = vector.shape_cast %134 : vector<1x16x32xbf16> to vector<16x32xbf16>
    %cst_130 = arith.constant dense<0.000000e+00> : vector<4x32xf32>
    %136 = tpu.matmul %133, %135, %cst_130 {dimension_numbers = #tpu.dot_dimension_numbers<[1], [0], [0], [1], [0, 0, 1, 1], [], []>} : vector<4x16xbf16>, vector<16x32xbf16>, vector<4x32xf32> -> vector<4x32xf32>
    %137 = arith.addf %129, %136 : vector<4x32xf32>
    %c3_131 = arith.constant 3 : index
    %c0_132 = arith.constant 0 : index
    %c0_133 = arith.constant 0 : index
    %138 = vector.load %arg5[%c3_131, %c0_132, %c0_133] : memref<4x4x8xbf16, #tpu.memory_space<vmem>>, vector<1x4x8xbf16>
    %139 = vector.shape_cast %138 : vector<1x4x8xbf16> to vector<4x8xbf16>
    %cst_134 = arith.constant dense<0.000000e+00> : vector<4x16xf32>
    %140 = tpu.matmul %139, %114, %cst_134 {dimension_numbers = #tpu.dot_dimension_numbers<[1], [0], [0], [1], [0, 0, 1, 1], [], []>} : vector<4x8xbf16>, vector<8x16xbf16>, vector<4x16xf32> -> vector<4x16xf32>
    %141 = arith.truncf %140 : vector<4x16xf32> to vector<4x16xbf16>
    %c3_135 = arith.constant 3 : index
    %c0_136 = arith.constant 0 : index
    %c0_137 = arith.constant 0 : index
    %142 = vector.load %arg4[%c3_135, %c0_136, %c0_137] : memref<4x16x32xbf16, #tpu.memory_space<vmem>>, vector<1x16x32xbf16>
    %143 = vector.shape_cast %142 : vector<1x16x32xbf16> to vector<16x32xbf16>
    %cst_138 = arith.constant dense<0.000000e+00> : vector<4x32xf32>
    %144 = tpu.matmul %141, %143, %cst_138 {dimension_numbers = #tpu.dot_dimension_numbers<[1], [0], [0], [1], [0, 0, 1, 1], [], []>} : vector<4x16xbf16>, vector<16x32xbf16>, vector<4x32xf32> -> vector<4x32xf32>
    %145 = arith.addf %137, %144 : vector<4x32xf32>
    %cst_139 = arith.constant dense<0.000000e+00> : vector<32xf32>
    %146 = vector.multi_reduction <add>, %113, %cst_139 [0] : vector<4x32xf32> to vector<32xf32>
    %147 = vector.shape_cast %146 : vector<32xf32> to vector<1x32xf32>
    %cst_140 = arith.constant 0.000000e+00 : f32
    %148 = vector.broadcast %cst_140 : f32 to vector<1x32xf32>
    %149 = arith.addf %148, %147 : vector<1x32xf32>
    %cst_141 = arith.constant dense<0.000000e+00> : vector<32xf32>
    %150 = vector.multi_reduction <add>, %145, %cst_141 [0] : vector<4x32xf32> to vector<32xf32>
    %151 = vector.shape_cast %150 : vector<32xf32> to vector<1x32xf32>
    %152 = arith.addf %149, %151 : vector<1x32xf32>
    %cst_142 = arith.constant 8.000000e+00 : f32
    %153 = vector.broadcast %cst_142 : f32 to vector<1x32xf32>
    %154 = arith.divf %152, %153 : vector<1x32xf32>
    %155 = vector.broadcast %154 : vector<1x32xf32> to vector<4x32xf32>
    %156 = arith.subf %113, %155 : vector<4x32xf32>
    %157 = arith.mulf %156, %156 : vector<4x32xf32>
    %cst_143 = arith.constant dense<0.000000e+00> : vector<32xf32>
    %158 = vector.multi_reduction <add>, %157, %cst_143 [0] : vector<4x32xf32> to vector<32xf32>
    %159 = vector.shape_cast %158 : vector<32xf32> to vector<1x32xf32>
    %cst_144 = arith.constant 0.000000e+00 : f32
    %160 = vector.broadcast %cst_144 : f32 to vector<1x32xf32>
    %161 = arith.addf %160, %159 : vector<1x32xf32>
    %162 = vector.broadcast %154 : vector<1x32xf32> to vector<4x32xf32>
    %163 = arith.subf %145, %162 : vector<4x32xf32>
    %164 = arith.mulf %163, %163 : vector<4x32xf32>
    %cst_145 = arith.constant dense<0.000000e+00> : vector<32xf32>
    %165 = vector.multi_reduction <add>, %164, %cst_145 [0] : vector<4x32xf32> to vector<32xf32>
    %166 = vector.shape_cast %165 : vector<32xf32> to vector<1x32xf32>
    %167 = arith.addf %161, %166 : vector<1x32xf32>
    %cst_146 = arith.constant 8.000000e+00 : f32
    %168 = vector.broadcast %cst_146 : f32 to vector<1x32xf32>
    %169 = arith.divf %167, %168 : vector<1x32xf32>
    %cst_147 = arith.constant 9.99999974E-6 : f32
    %170 = vector.broadcast %cst_147 : f32 to vector<1x32xf32>
    %171 = arith.addf %169, %170 : vector<1x32xf32>
    %172 = math.rsqrt %171 : vector<1x32xf32>
    %c0_148 = arith.constant 0 : index
    %c0_149 = arith.constant 0 : index
    %173 = vector.load %arg6[%c0_148, %c0_149] : memref<1x32xf32, #tpu.memory_space<vmem>>, vector<1x32xf32>
    %c0_150 = arith.constant 0 : index
    %c0_151 = arith.constant 0 : index
    %174 = vector.load %arg7[%c0_150, %c0_151] : memref<1x32xf32, #tpu.memory_space<vmem>>, vector<1x32xf32>
    %175 = vector.broadcast %154 : vector<1x32xf32> to vector<4x32xf32>
    %176 = arith.subf %113, %175 : vector<4x32xf32>
    %177 = vector.broadcast %172 : vector<1x32xf32> to vector<4x32xf32>
    %178 = arith.mulf %176, %177 : vector<4x32xf32>
    %179 = vector.broadcast %173 : vector<1x32xf32> to vector<4x32xf32>
    %180 = arith.mulf %178, %179 : vector<4x32xf32>
    %181 = vector.broadcast %174 : vector<1x32xf32> to vector<4x32xf32>
    %182 = arith.addf %180, %181 : vector<4x32xf32>
    %183 = vector.broadcast %154 : vector<1x32xf32> to vector<4x32xf32>
    %184 = arith.subf %145, %183 : vector<4x32xf32>
    %185 = vector.broadcast %172 : vector<1x32xf32> to vector<4x32xf32>
    %186 = arith.mulf %184, %185 : vector<4x32xf32>
    %187 = vector.broadcast %173 : vector<1x32xf32> to vector<4x32xf32>
    %188 = arith.mulf %186, %187 : vector<4x32xf32>
    %189 = vector.broadcast %174 : vector<1x32xf32> to vector<4x32xf32>
    %190 = arith.addf %188, %189 : vector<4x32xf32>
    %cst_152 = arith.constant 0.000000e+00 : f32
    %191 = vector.broadcast %cst_152 : f32 to vector<4x32xf32>
    %192 = arith.cmpf oge, %182, %191 : vector<4x32xf32>
    %cst_153 = arith.constant 2.000000e-01 : f32
    %193 = vector.broadcast %cst_153 : f32 to vector<4x32xf32>
    %194 = arith.mulf %193, %182 : vector<4x32xf32>
    %195 = arith.select %192, %182, %194 : vector<4x32xi1>, vector<4x32xf32>
    %cst_154 = arith.constant 0.000000e+00 : f32
    %196 = vector.broadcast %cst_154 : f32 to vector<4x32xf32>
    %197 = arith.cmpf oge, %190, %196 : vector<4x32xf32>
    %cst_155 = arith.constant 2.000000e-01 : f32
    %198 = vector.broadcast %cst_155 : f32 to vector<4x32xf32>
    %199 = arith.mulf %198, %190 : vector<4x32xf32>
    %200 = arith.select %197, %190, %199 : vector<4x32xi1>, vector<4x32xf32>
    %201 = arith.truncf %195 : vector<4x32xf32> to vector<4x32xbf16>
    %c0_156 = arith.constant 0 : index
    %c0_157 = arith.constant 0 : index
    %c0_158 = arith.constant 0 : index
    %202 = vector.load %arg9[%c0_156, %c0_157, %c0_158] : memref<4x1x4xbf16, #tpu.memory_space<vmem>>, vector<1x1x4xbf16>
    %203 = vector.shape_cast %202 : vector<1x1x4xbf16> to vector<1x4xbf16>
    %cst_159 = arith.constant dense<0.000000e+00> : vector<1x32xf32>
    %204 = tpu.matmul %203, %201, %cst_159 {dimension_numbers = #tpu.dot_dimension_numbers<[1], [0], [0], [1], [0, 0, 1, 1], [], []>} : vector<1x4xbf16>, vector<4x32xbf16>, vector<1x32xf32> -> vector<1x32xf32>
    %205 = arith.truncf %204 : vector<1x32xf32> to vector<1x32xbf16>
    %c0_160 = arith.constant 0 : index
    %c0_161 = arith.constant 0 : index
    %c0_162 = arith.constant 0 : index
    %206 = vector.load %arg8[%c0_160, %c0_161, %c0_162] : memref<4x32x8xbf16, #tpu.memory_space<vmem>>, vector<1x32x8xbf16>
    %207 = vector.shape_cast %206 : vector<1x32x8xbf16> to vector<32x8xbf16>
    %cst_163 = arith.constant dense<0.000000e+00> : vector<1x8xf32>
    %208 = tpu.matmul %205, %207, %cst_163 {dimension_numbers = #tpu.dot_dimension_numbers<[1], [0], [0], [1], [0, 0, 1, 1], [], []>} : vector<1x32xbf16>, vector<32x8xbf16>, vector<1x8xf32> -> vector<1x8xf32>
    %c1_164 = arith.constant 1 : index
    %c0_165 = arith.constant 0 : index
    %c0_166 = arith.constant 0 : index
    %209 = vector.load %arg9[%c1_164, %c0_165, %c0_166] : memref<4x1x4xbf16, #tpu.memory_space<vmem>>, vector<1x1x4xbf16>
    %210 = vector.shape_cast %209 : vector<1x1x4xbf16> to vector<1x4xbf16>
    %cst_167 = arith.constant dense<0.000000e+00> : vector<1x32xf32>
    %211 = tpu.matmul %210, %201, %cst_167 {dimension_numbers = #tpu.dot_dimension_numbers<[1], [0], [0], [1], [0, 0, 1, 1], [], []>} : vector<1x4xbf16>, vector<4x32xbf16>, vector<1x32xf32> -> vector<1x32xf32>
    %212 = arith.truncf %211 : vector<1x32xf32> to vector<1x32xbf16>
    %c1_168 = arith.constant 1 : index
    %c0_169 = arith.constant 0 : index
    %c0_170 = arith.constant 0 : index
    %213 = vector.load %arg8[%c1_168, %c0_169, %c0_170] : memref<4x32x8xbf16, #tpu.memory_space<vmem>>, vector<1x32x8xbf16>
    %214 = vector.shape_cast %213 : vector<1x32x8xbf16> to vector<32x8xbf16>
    %cst_171 = arith.constant dense<0.000000e+00> : vector<1x8xf32>
    %215 = tpu.matmul %212, %214, %cst_171 {dimension_numbers = #tpu.dot_dimension_numbers<[1], [0], [0], [1], [0, 0, 1, 1], [], []>} : vector<1x32xbf16>, vector<32x8xbf16>, vector<1x8xf32> -> vector<1x8xf32>
    %216 = arith.addf %208, %215 : vector<1x8xf32>
    %c2_172 = arith.constant 2 : index
    %c0_173 = arith.constant 0 : index
    %c0_174 = arith.constant 0 : index
    %217 = vector.load %arg9[%c2_172, %c0_173, %c0_174] : memref<4x1x4xbf16, #tpu.memory_space<vmem>>, vector<1x1x4xbf16>
    %218 = vector.shape_cast %217 : vector<1x1x4xbf16> to vector<1x4xbf16>
    %cst_175 = arith.constant dense<0.000000e+00> : vector<1x32xf32>
    %219 = tpu.matmul %218, %201, %cst_175 {dimension_numbers = #tpu.dot_dimension_numbers<[1], [0], [0], [1], [0, 0, 1, 1], [], []>} : vector<1x4xbf16>, vector<4x32xbf16>, vector<1x32xf32> -> vector<1x32xf32>
    %220 = arith.truncf %219 : vector<1x32xf32> to vector<1x32xbf16>
    %c2_176 = arith.constant 2 : index
    %c0_177 = arith.constant 0 : index
    %c0_178 = arith.constant 0 : index
    %221 = vector.load %arg8[%c2_176, %c0_177, %c0_178] : memref<4x32x8xbf16, #tpu.memory_space<vmem>>, vector<1x32x8xbf16>
    %222 = vector.shape_cast %221 : vector<1x32x8xbf16> to vector<32x8xbf16>
    %cst_179 = arith.constant dense<0.000000e+00> : vector<1x8xf32>
    %223 = tpu.matmul %220, %222, %cst_179 {dimension_numbers = #tpu.dot_dimension_numbers<[1], [0], [0], [1], [0, 0, 1, 1], [], []>} : vector<1x32xbf16>, vector<32x8xbf16>, vector<1x8xf32> -> vector<1x8xf32>
    %224 = arith.addf %216, %223 : vector<1x8xf32>
    %c3_180 = arith.constant 3 : index
    %c0_181 = arith.constant 0 : index
    %c0_182 = arith.constant 0 : index
    %225 = vector.load %arg9[%c3_180, %c0_181, %c0_182] : memref<4x1x4xbf16, #tpu.memory_space<vmem>>, vector<1x1x4xbf16>
    %226 = vector.shape_cast %225 : vector<1x1x4xbf16> to vector<1x4xbf16>
    %cst_183 = arith.constant dense<0.000000e+00> : vector<1x32xf32>
    %227 = tpu.matmul %226, %201, %cst_183 {dimension_numbers = #tpu.dot_dimension_numbers<[1], [0], [0], [1], [0, 0, 1, 1], [], []>} : vector<1x4xbf16>, vector<4x32xbf16>, vector<1x32xf32> -> vector<1x32xf32>
    %228 = arith.truncf %227 : vector<1x32xf32> to vector<1x32xbf16>
    %c3_184 = arith.constant 3 : index
    %c0_185 = arith.constant 0 : index
    %c0_186 = arith.constant 0 : index
    %229 = vector.load %arg8[%c3_184, %c0_185, %c0_186] : memref<4x32x8xbf16, #tpu.memory_space<vmem>>, vector<1x32x8xbf16>
    %230 = vector.shape_cast %229 : vector<1x32x8xbf16> to vector<32x8xbf16>
    %cst_187 = arith.constant dense<0.000000e+00> : vector<1x8xf32>
    %231 = tpu.matmul %228, %230, %cst_187 {dimension_numbers = #tpu.dot_dimension_numbers<[1], [0], [0], [1], [0, 0, 1, 1], [], []>} : vector<1x32xbf16>, vector<32x8xbf16>, vector<1x8xf32> -> vector<1x8xf32>
    %232 = arith.addf %224, %231 : vector<1x8xf32>
    %233 = arith.truncf %200 : vector<4x32xf32> to vector<4x32xbf16>
    %c0_188 = arith.constant 0 : index
    %c0_189 = arith.constant 0 : index
    %c0_190 = arith.constant 0 : index
    %234 = vector.load %arg9[%c0_188, %c0_189, %c0_190] : memref<4x1x4xbf16, #tpu.memory_space<vmem>>, vector<1x1x4xbf16>
    %235 = vector.shape_cast %234 : vector<1x1x4xbf16> to vector<1x4xbf16>
    %cst_191 = arith.constant dense<0.000000e+00> : vector<1x32xf32>
    %236 = tpu.matmul %235, %233, %cst_191 {dimension_numbers = #tpu.dot_dimension_numbers<[1], [0], [0], [1], [0, 0, 1, 1], [], []>} : vector<1x4xbf16>, vector<4x32xbf16>, vector<1x32xf32> -> vector<1x32xf32>
    %237 = arith.truncf %236 : vector<1x32xf32> to vector<1x32xbf16>
    %c0_192 = arith.constant 0 : index
    %c0_193 = arith.constant 0 : index
    %c0_194 = arith.constant 0 : index
    %238 = vector.load %arg8[%c0_192, %c0_193, %c0_194] : memref<4x32x8xbf16, #tpu.memory_space<vmem>>, vector<1x32x8xbf16>
    %239 = vector.shape_cast %238 : vector<1x32x8xbf16> to vector<32x8xbf16>
    %cst_195 = arith.constant dense<0.000000e+00> : vector<1x8xf32>
    %240 = tpu.matmul %237, %239, %cst_195 {dimension_numbers = #tpu.dot_dimension_numbers<[1], [0], [0], [1], [0, 0, 1, 1], [], []>} : vector<1x32xbf16>, vector<32x8xbf16>, vector<1x8xf32> -> vector<1x8xf32>
    %c1_196 = arith.constant 1 : index
    %c0_197 = arith.constant 0 : index
    %c0_198 = arith.constant 0 : index
    %241 = vector.load %arg9[%c1_196, %c0_197, %c0_198] : memref<4x1x4xbf16, #tpu.memory_space<vmem>>, vector<1x1x4xbf16>
    %242 = vector.shape_cast %241 : vector<1x1x4xbf16> to vector<1x4xbf16>
    %cst_199 = arith.constant dense<0.000000e+00> : vector<1x32xf32>
    %243 = tpu.matmul %242, %233, %cst_199 {dimension_numbers = #tpu.dot_dimension_numbers<[1], [0], [0], [1], [0, 0, 1, 1], [], []>} : vector<1x4xbf16>, vector<4x32xbf16>, vector<1x32xf32> -> vector<1x32xf32>
    %244 = arith.truncf %243 : vector<1x32xf32> to vector<1x32xbf16>
    %c1_200 = arith.constant 1 : index
    %c0_201 = arith.constant 0 : index
    %c0_202 = arith.constant 0 : index
    %245 = vector.load %arg8[%c1_200, %c0_201, %c0_202] : memref<4x32x8xbf16, #tpu.memory_space<vmem>>, vector<1x32x8xbf16>
    %246 = vector.shape_cast %245 : vector<1x32x8xbf16> to vector<32x8xbf16>
    %cst_203 = arith.constant dense<0.000000e+00> : vector<1x8xf32>
    %247 = tpu.matmul %244, %246, %cst_203 {dimension_numbers = #tpu.dot_dimension_numbers<[1], [0], [0], [1], [0, 0, 1, 1], [], []>} : vector<1x32xbf16>, vector<32x8xbf16>, vector<1x8xf32> -> vector<1x8xf32>
    %248 = arith.addf %240, %247 : vector<1x8xf32>
    %c2_204 = arith.constant 2 : index
    %c0_205 = arith.constant 0 : index
    %c0_206 = arith.constant 0 : index
    %249 = vector.load %arg9[%c2_204, %c0_205, %c0_206] : memref<4x1x4xbf16, #tpu.memory_space<vmem>>, vector<1x1x4xbf16>
    %250 = vector.shape_cast %249 : vector<1x1x4xbf16> to vector<1x4xbf16>
    %cst_207 = arith.constant dense<0.000000e+00> : vector<1x32xf32>
    %251 = tpu.matmul %250, %233, %cst_207 {dimension_numbers = #tpu.dot_dimension_numbers<[1], [0], [0], [1], [0, 0, 1, 1], [], []>} : vector<1x4xbf16>, vector<4x32xbf16>, vector<1x32xf32> -> vector<1x32xf32>
    %252 = arith.truncf %251 : vector<1x32xf32> to vector<1x32xbf16>
    %c2_208 = arith.constant 2 : index
    %c0_209 = arith.constant 0 : index
    %c0_210 = arith.constant 0 : index
    %253 = vector.load %arg8[%c2_208, %c0_209, %c0_210] : memref<4x32x8xbf16, #tpu.memory_space<vmem>>, vector<1x32x8xbf16>
    %254 = vector.shape_cast %253 : vector<1x32x8xbf16> to vector<32x8xbf16>
    %cst_211 = arith.constant dense<0.000000e+00> : vector<1x8xf32>
    %255 = tpu.matmul %252, %254, %cst_211 {dimension_numbers = #tpu.dot_dimension_numbers<[1], [0], [0], [1], [0, 0, 1, 1], [], []>} : vector<1x32xbf16>, vector<32x8xbf16>, vector<1x8xf32> -> vector<1x8xf32>
    %256 = arith.addf %248, %255 : vector<1x8xf32>
    %c3_212 = arith.constant 3 : index
    %c0_213 = arith.constant 0 : index
    %c0_214 = arith.constant 0 : index
    %257 = vector.load %arg9[%c3_212, %c0_213, %c0_214] : memref<4x1x4xbf16, #tpu.memory_space<vmem>>, vector<1x1x4xbf16>
    %258 = vector.shape_cast %257 : vector<1x1x4xbf16> to vector<1x4xbf16>
    %cst_215 = arith.constant dense<0.000000e+00> : vector<1x32xf32>
    %259 = tpu.matmul %258, %233, %cst_215 {dimension_numbers = #tpu.dot_dimension_numbers<[1], [0], [0], [1], [0, 0, 1, 1], [], []>} : vector<1x4xbf16>, vector<4x32xbf16>, vector<1x32xf32> -> vector<1x32xf32>
    %260 = arith.truncf %259 : vector<1x32xf32> to vector<1x32xbf16>
    %c3_216 = arith.constant 3 : index
    %c0_217 = arith.constant 0 : index
    %c0_218 = arith.constant 0 : index
    %261 = vector.load %arg8[%c3_216, %c0_217, %c0_218] : memref<4x32x8xbf16, #tpu.memory_space<vmem>>, vector<1x32x8xbf16>
    %262 = vector.shape_cast %261 : vector<1x32x8xbf16> to vector<32x8xbf16>
    %cst_219 = arith.constant dense<0.000000e+00> : vector<1x8xf32>
    %263 = tpu.matmul %260, %262, %cst_219 {dimension_numbers = #tpu.dot_dimension_numbers<[1], [0], [0], [1], [0, 0, 1, 1], [], []>} : vector<1x32xbf16>, vector<32x8xbf16>, vector<1x8xf32> -> vector<1x8xf32>
    %264 = arith.addf %256, %263 : vector<1x8xf32>
    %265 = arith.truncf %5 : vector<16x4xf32> to vector<16x4xbf16>
    %c0_220 = arith.constant 0 : index
    %c0_221 = arith.constant 0 : index
    %c0_222 = arith.constant 0 : index
    %266 = vector.load %arg11[%c0_220, %c0_221, %c0_222] : memref<4x8x16xbf16, #tpu.memory_space<vmem>>, vector<1x8x16xbf16>
    %267 = vector.shape_cast %266 : vector<1x8x16xbf16> to vector<8x16xbf16>
    %cst_223 = arith.constant dense<0.000000e+00> : vector<8x4xf32>
    %268 = tpu.matmul %267, %265, %cst_223 {dimension_numbers = #tpu.dot_dimension_numbers<[1], [0], [0], [1], [0, 0, 1, 1], [], []>} : vector<8x16xbf16>, vector<16x4xbf16>, vector<8x4xf32> -> vector<8x4xf32>
    %269 = arith.truncf %268 : vector<8x4xf32> to vector<8x4xbf16>
    %c0_224 = arith.constant 0 : index
    %c0_225 = arith.constant 0 : index
    %c0_226 = arith.constant 0 : index
    %270 = vector.load %arg10[%c0_224, %c0_225, %c0_226] : memref<4x4x16xbf16, #tpu.memory_space<vmem>>, vector<1x4x16xbf16>
    %271 = vector.shape_cast %270 : vector<1x4x16xbf16> to vector<4x16xbf16>
    %cst_227 = arith.constant dense<0.000000e+00> : vector<8x16xf32>
    %272 = tpu.matmul %269, %271, %cst_227 {dimension_numbers = #tpu.dot_dimension_numbers<[1], [0], [0], [1], [0, 0, 1, 1], [], []>} : vector<8x4xbf16>, vector<4x16xbf16>, vector<8x16xf32> -> vector<8x16xf32>
    %c1_228 = arith.constant 1 : index
    %c0_229 = arith.constant 0 : index
    %c0_230 = arith.constant 0 : index
    %273 = vector.load %arg11[%c1_228, %c0_229, %c0_230] : memref<4x8x16xbf16, #tpu.memory_space<vmem>>, vector<1x8x16xbf16>
    %274 = vector.shape_cast %273 : vector<1x8x16xbf16> to vector<8x16xbf16>
    %cst_231 = arith.constant dense<0.000000e+00> : vector<8x4xf32>
    %275 = tpu.matmul %274, %265, %cst_231 {dimension_numbers = #tpu.dot_dimension_numbers<[1], [0], [0], [1], [0, 0, 1, 1], [], []>} : vector<8x16xbf16>, vector<16x4xbf16>, vector<8x4xf32> -> vector<8x4xf32>
    %276 = arith.truncf %275 : vector<8x4xf32> to vector<8x4xbf16>
    %c1_232 = arith.constant 1 : index
    %c0_233 = arith.constant 0 : index
    %c0_234 = arith.constant 0 : index
    %277 = vector.load %arg10[%c1_232, %c0_233, %c0_234] : memref<4x4x16xbf16, #tpu.memory_space<vmem>>, vector<1x4x16xbf16>
    %278 = vector.shape_cast %277 : vector<1x4x16xbf16> to vector<4x16xbf16>
    %cst_235 = arith.constant dense<0.000000e+00> : vector<8x16xf32>
    %279 = tpu.matmul %276, %278, %cst_235 {dimension_numbers = #tpu.dot_dimension_numbers<[1], [0], [0], [1], [0, 0, 1, 1], [], []>} : vector<8x4xbf16>, vector<4x16xbf16>, vector<8x16xf32> -> vector<8x16xf32>
    %280 = arith.addf %272, %279 : vector<8x16xf32>
    %c2_236 = arith.constant 2 : index
    %c0_237 = arith.constant 0 : index
    %c0_238 = arith.constant 0 : index
    %281 = vector.load %arg11[%c2_236, %c0_237, %c0_238] : memref<4x8x16xbf16, #tpu.memory_space<vmem>>, vector<1x8x16xbf16>
    %282 = vector.shape_cast %281 : vector<1x8x16xbf16> to vector<8x16xbf16>
    %cst_239 = arith.constant dense<0.000000e+00> : vector<8x4xf32>
    %283 = tpu.matmul %282, %265, %cst_239 {dimension_numbers = #tpu.dot_dimension_numbers<[1], [0], [0], [1], [0, 0, 1, 1], [], []>} : vector<8x16xbf16>, vector<16x4xbf16>, vector<8x4xf32> -> vector<8x4xf32>
    %284 = arith.truncf %283 : vector<8x4xf32> to vector<8x4xbf16>
    %c2_240 = arith.constant 2 : index
    %c0_241 = arith.constant 0 : index
    %c0_242 = arith.constant 0 : index
    %285 = vector.load %arg10[%c2_240, %c0_241, %c0_242] : memref<4x4x16xbf16, #tpu.memory_space<vmem>>, vector<1x4x16xbf16>
    %286 = vector.shape_cast %285 : vector<1x4x16xbf16> to vector<4x16xbf16>
    %cst_243 = arith.constant dense<0.000000e+00> : vector<8x16xf32>
    %287 = tpu.matmul %284, %286, %cst_243 {dimension_numbers = #tpu.dot_dimension_numbers<[1], [0], [0], [1], [0, 0, 1, 1], [], []>} : vector<8x4xbf16>, vector<4x16xbf16>, vector<8x16xf32> -> vector<8x16xf32>
    %288 = arith.addf %280, %287 : vector<8x16xf32>
    %c3_244 = arith.constant 3 : index
    %c0_245 = arith.constant 0 : index
    %c0_246 = arith.constant 0 : index
    %289 = vector.load %arg11[%c3_244, %c0_245, %c0_246] : memref<4x8x16xbf16, #tpu.memory_space<vmem>>, vector<1x8x16xbf16>
    %290 = vector.shape_cast %289 : vector<1x8x16xbf16> to vector<8x16xbf16>
    %cst_247 = arith.constant dense<0.000000e+00> : vector<8x4xf32>
    %291 = tpu.matmul %290, %265, %cst_247 {dimension_numbers = #tpu.dot_dimension_numbers<[1], [0], [0], [1], [0, 0, 1, 1], [], []>} : vector<8x16xbf16>, vector<16x4xbf16>, vector<8x4xf32> -> vector<8x4xf32>
    %292 = arith.truncf %291 : vector<8x4xf32> to vector<8x4xbf16>
    %c3_248 = arith.constant 3 : index
    %c0_249 = arith.constant 0 : index
    %c0_250 = arith.constant 0 : index
    %293 = vector.load %arg10[%c3_248, %c0_249, %c0_250] : memref<4x4x16xbf16, #tpu.memory_space<vmem>>, vector<1x4x16xbf16>
    %294 = vector.shape_cast %293 : vector<1x4x16xbf16> to vector<4x16xbf16>
    %cst_251 = arith.constant dense<0.000000e+00> : vector<8x16xf32>
    %295 = tpu.matmul %292, %294, %cst_251 {dimension_numbers = #tpu.dot_dimension_numbers<[1], [0], [0], [1], [0, 0, 1, 1], [], []>} : vector<8x4xbf16>, vector<4x16xbf16>, vector<8x16xf32> -> vector<8x16xf32>
    %296 = arith.addf %288, %295 : vector<8x16xf32>
    %297 = arith.truncf %7 : vector<16x4xf32> to vector<16x4xbf16>
    %c0_252 = arith.constant 0 : index
    %c0_253 = arith.constant 0 : index
    %c0_254 = arith.constant 0 : index
    %298 = vector.load %arg11[%c0_252, %c0_253, %c0_254] : memref<4x8x16xbf16, #tpu.memory_space<vmem>>, vector<1x8x16xbf16>
    %299 = vector.shape_cast %298 : vector<1x8x16xbf16> to vector<8x16xbf16>
    %cst_255 = arith.constant dense<0.000000e+00> : vector<8x4xf32>
    %300 = tpu.matmul %299, %297, %cst_255 {dimension_numbers = #tpu.dot_dimension_numbers<[1], [0], [0], [1], [0, 0, 1, 1], [], []>} : vector<8x16xbf16>, vector<16x4xbf16>, vector<8x4xf32> -> vector<8x4xf32>
    %301 = arith.truncf %300 : vector<8x4xf32> to vector<8x4xbf16>
    %c0_256 = arith.constant 0 : index
    %c0_257 = arith.constant 0 : index
    %c0_258 = arith.constant 0 : index
    %302 = vector.load %arg10[%c0_256, %c0_257, %c0_258] : memref<4x4x16xbf16, #tpu.memory_space<vmem>>, vector<1x4x16xbf16>
    %303 = vector.shape_cast %302 : vector<1x4x16xbf16> to vector<4x16xbf16>
    %cst_259 = arith.constant dense<0.000000e+00> : vector<8x16xf32>
    %304 = tpu.matmul %301, %303, %cst_259 {dimension_numbers = #tpu.dot_dimension_numbers<[1], [0], [0], [1], [0, 0, 1, 1], [], []>} : vector<8x4xbf16>, vector<4x16xbf16>, vector<8x16xf32> -> vector<8x16xf32>
    %c1_260 = arith.constant 1 : index
    %c0_261 = arith.constant 0 : index
    %c0_262 = arith.constant 0 : index
    %305 = vector.load %arg11[%c1_260, %c0_261, %c0_262] : memref<4x8x16xbf16, #tpu.memory_space<vmem>>, vector<1x8x16xbf16>
    %306 = vector.shape_cast %305 : vector<1x8x16xbf16> to vector<8x16xbf16>
    %cst_263 = arith.constant dense<0.000000e+00> : vector<8x4xf32>
    %307 = tpu.matmul %306, %297, %cst_263 {dimension_numbers = #tpu.dot_dimension_numbers<[1], [0], [0], [1], [0, 0, 1, 1], [], []>} : vector<8x16xbf16>, vector<16x4xbf16>, vector<8x4xf32> -> vector<8x4xf32>
    %308 = arith.truncf %307 : vector<8x4xf32> to vector<8x4xbf16>
    %c1_264 = arith.constant 1 : index
    %c0_265 = arith.constant 0 : index
    %c0_266 = arith.constant 0 : index
    %309 = vector.load %arg10[%c1_264, %c0_265, %c0_266] : memref<4x4x16xbf16, #tpu.memory_space<vmem>>, vector<1x4x16xbf16>
    %310 = vector.shape_cast %309 : vector<1x4x16xbf16> to vector<4x16xbf16>
    %cst_267 = arith.constant dense<0.000000e+00> : vector<8x16xf32>
    %311 = tpu.matmul %308, %310, %cst_267 {dimension_numbers = #tpu.dot_dimension_numbers<[1], [0], [0], [1], [0, 0, 1, 1], [], []>} : vector<8x4xbf16>, vector<4x16xbf16>, vector<8x16xf32> -> vector<8x16xf32>
    %312 = arith.addf %304, %311 : vector<8x16xf32>
    %c2_268 = arith.constant 2 : index
    %c0_269 = arith.constant 0 : index
    %c0_270 = arith.constant 0 : index
    %313 = vector.load %arg11[%c2_268, %c0_269, %c0_270] : memref<4x8x16xbf16, #tpu.memory_space<vmem>>, vector<1x8x16xbf16>
    %314 = vector.shape_cast %313 : vector<1x8x16xbf16> to vector<8x16xbf16>
    %cst_271 = arith.constant dense<0.000000e+00> : vector<8x4xf32>
    %315 = tpu.matmul %314, %297, %cst_271 {dimension_numbers = #tpu.dot_dimension_numbers<[1], [0], [0], [1], [0, 0, 1, 1], [], []>} : vector<8x16xbf16>, vector<16x4xbf16>, vector<8x4xf32> -> vector<8x4xf32>
    %316 = arith.truncf %315 : vector<8x4xf32> to vector<8x4xbf16>
    %c2_272 = arith.constant 2 : index
    %c0_273 = arith.constant 0 : index
    %c0_274 = arith.constant 0 : index
    %317 = vector.load %arg10[%c2_272, %c0_273, %c0_274] : memref<4x4x16xbf16, #tpu.memory_space<vmem>>, vector<1x4x16xbf16>
    %318 = vector.shape_cast %317 : vector<1x4x16xbf16> to vector<4x16xbf16>
    %cst_275 = arith.constant dense<0.000000e+00> : vector<8x16xf32>
    %319 = tpu.matmul %316, %318, %cst_275 {dimension_numbers = #tpu.dot_dimension_numbers<[1], [0], [0], [1], [0, 0, 1, 1], [], []>} : vector<8x4xbf16>, vector<4x16xbf16>, vector<8x16xf32> -> vector<8x16xf32>
    %320 = arith.addf %312, %319 : vector<8x16xf32>
    %c3_276 = arith.constant 3 : index
    %c0_277 = arith.constant 0 : index
    %c0_278 = arith.constant 0 : index
    %321 = vector.load %arg11[%c3_276, %c0_277, %c0_278] : memref<4x8x16xbf16, #tpu.memory_space<vmem>>, vector<1x8x16xbf16>
    %322 = vector.shape_cast %321 : vector<1x8x16xbf16> to vector<8x16xbf16>
    %cst_279 = arith.constant dense<0.000000e+00> : vector<8x4xf32>
    %323 = tpu.matmul %322, %297, %cst_279 {dimension_numbers = #tpu.dot_dimension_numbers<[1], [0], [0], [1], [0, 0, 1, 1], [], []>} : vector<8x16xbf16>, vector<16x4xbf16>, vector<8x4xf32> -> vector<8x4xf32>
    %324 = arith.truncf %323 : vector<8x4xf32> to vector<8x4xbf16>
    %c3_280 = arith.constant 3 : index
    %c0_281 = arith.constant 0 : index
    %c0_282 = arith.constant 0 : index
    %325 = vector.load %arg10[%c3_280, %c0_281, %c0_282] : memref<4x4x16xbf16, #tpu.memory_space<vmem>>, vector<1x4x16xbf16>
    %326 = vector.shape_cast %325 : vector<1x4x16xbf16> to vector<4x16xbf16>
    %cst_283 = arith.constant dense<0.000000e+00> : vector<8x16xf32>
    %327 = tpu.matmul %324, %326, %cst_283 {dimension_numbers = #tpu.dot_dimension_numbers<[1], [0], [0], [1], [0, 0, 1, 1], [], []>} : vector<8x4xbf16>, vector<4x16xbf16>, vector<8x16xf32> -> vector<8x16xf32>
    %328 = arith.addf %320, %327 : vector<8x16xf32>
    %cst_284 = arith.constant 0.000000e+00 : f32
    %329 = vector.broadcast %cst_284 : f32 to vector<8x16xf32>
    %330 = arith.cmpf oge, %296, %329 : vector<8x16xf32>
    %cst_285 = arith.constant 2.000000e-01 : f32
    %331 = vector.broadcast %cst_285 : f32 to vector<8x16xf32>
    %332 = arith.mulf %331, %296 : vector<8x16xf32>
    %333 = arith.select %330, %296, %332 : vector<8x16xi1>, vector<8x16xf32>
    %cst_286 = arith.constant 0.000000e+00 : f32
    %334 = vector.broadcast %cst_286 : f32 to vector<8x16xf32>
    %335 = arith.cmpf oge, %328, %334 : vector<8x16xf32>
    %cst_287 = arith.constant 2.000000e-01 : f32
    %336 = vector.broadcast %cst_287 : f32 to vector<8x16xf32>
    %337 = arith.mulf %336, %328 : vector<8x16xf32>
    %338 = arith.select %335, %328, %337 : vector<8x16xi1>, vector<8x16xf32>
    %339 = arith.truncf %333 : vector<8x16xf32> to vector<8x16xbf16>
    %c0_288 = arith.constant 0 : index
    %c0_289 = arith.constant 0 : index
    %c0_290 = arith.constant 0 : index
    %340 = vector.load %arg13[%c0_288, %c0_289, %c0_290] : memref<4x4x8xbf16, #tpu.memory_space<vmem>>, vector<1x4x8xbf16>
    %341 = vector.shape_cast %340 : vector<1x4x8xbf16> to vector<4x8xbf16>
    %cst_291 = arith.constant dense<0.000000e+00> : vector<4x16xf32>
    %342 = tpu.matmul %341, %339, %cst_291 {dimension_numbers = #tpu.dot_dimension_numbers<[1], [0], [0], [1], [0, 0, 1, 1], [], []>} : vector<4x8xbf16>, vector<8x16xbf16>, vector<4x16xf32> -> vector<4x16xf32>
    %343 = arith.truncf %342 : vector<4x16xf32> to vector<4x16xbf16>
    %c0_292 = arith.constant 0 : index
    %c0_293 = arith.constant 0 : index
    %c0_294 = arith.constant 0 : index
    %344 = vector.load %arg12[%c0_292, %c0_293, %c0_294] : memref<4x16x32xbf16, #tpu.memory_space<vmem>>, vector<1x16x32xbf16>
    %345 = vector.shape_cast %344 : vector<1x16x32xbf16> to vector<16x32xbf16>
    %cst_295 = arith.constant dense<0.000000e+00> : vector<4x32xf32>
    %346 = tpu.matmul %343, %345, %cst_295 {dimension_numbers = #tpu.dot_dimension_numbers<[1], [0], [0], [1], [0, 0, 1, 1], [], []>} : vector<4x16xbf16>, vector<16x32xbf16>, vector<4x32xf32> -> vector<4x32xf32>
    %c1_296 = arith.constant 1 : index
    %c0_297 = arith.constant 0 : index
    %c0_298 = arith.constant 0 : index
    %347 = vector.load %arg13[%c1_296, %c0_297, %c0_298] : memref<4x4x8xbf16, #tpu.memory_space<vmem>>, vector<1x4x8xbf16>
    %348 = vector.shape_cast %347 : vector<1x4x8xbf16> to vector<4x8xbf16>
    %cst_299 = arith.constant dense<0.000000e+00> : vector<4x16xf32>
    %349 = tpu.matmul %348, %339, %cst_299 {dimension_numbers = #tpu.dot_dimension_numbers<[1], [0], [0], [1], [0, 0, 1, 1], [], []>} : vector<4x8xbf16>, vector<8x16xbf16>, vector<4x16xf32> -> vector<4x16xf32>
    %350 = arith.truncf %349 : vector<4x16xf32> to vector<4x16xbf16>
    %c1_300 = arith.constant 1 : index
    %c0_301 = arith.constant 0 : index
    %c0_302 = arith.constant 0 : index
    %351 = vector.load %arg12[%c1_300, %c0_301, %c0_302] : memref<4x16x32xbf16, #tpu.memory_space<vmem>>, vector<1x16x32xbf16>
    %352 = vector.shape_cast %351 : vector<1x16x32xbf16> to vector<16x32xbf16>
    %cst_303 = arith.constant dense<0.000000e+00> : vector<4x32xf32>
    %353 = tpu.matmul %350, %352, %cst_303 {dimension_numbers = #tpu.dot_dimension_numbers<[1], [0], [0], [1], [0, 0, 1, 1], [], []>} : vector<4x16xbf16>, vector<16x32xbf16>, vector<4x32xf32> -> vector<4x32xf32>
    %354 = arith.addf %346, %353 : vector<4x32xf32>
    %c2_304 = arith.constant 2 : index
    %c0_305 = arith.constant 0 : index
    %c0_306 = arith.constant 0 : index
    %355 = vector.load %arg13[%c2_304, %c0_305, %c0_306] : memref<4x4x8xbf16, #tpu.memory_space<vmem>>, vector<1x4x8xbf16>
    %356 = vector.shape_cast %355 : vector<1x4x8xbf16> to vector<4x8xbf16>
    %cst_307 = arith.constant dense<0.000000e+00> : vector<4x16xf32>
    %357 = tpu.matmul %356, %339, %cst_307 {dimension_numbers = #tpu.dot_dimension_numbers<[1], [0], [0], [1], [0, 0, 1, 1], [], []>} : vector<4x8xbf16>, vector<8x16xbf16>, vector<4x16xf32> -> vector<4x16xf32>
    %358 = arith.truncf %357 : vector<4x16xf32> to vector<4x16xbf16>
    %c2_308 = arith.constant 2 : index
    %c0_309 = arith.constant 0 : index
    %c0_310 = arith.constant 0 : index
    %359 = vector.load %arg12[%c2_308, %c0_309, %c0_310] : memref<4x16x32xbf16, #tpu.memory_space<vmem>>, vector<1x16x32xbf16>
    %360 = vector.shape_cast %359 : vector<1x16x32xbf16> to vector<16x32xbf16>
    %cst_311 = arith.constant dense<0.000000e+00> : vector<4x32xf32>
    %361 = tpu.matmul %358, %360, %cst_311 {dimension_numbers = #tpu.dot_dimension_numbers<[1], [0], [0], [1], [0, 0, 1, 1], [], []>} : vector<4x16xbf16>, vector<16x32xbf16>, vector<4x32xf32> -> vector<4x32xf32>
    %362 = arith.addf %354, %361 : vector<4x32xf32>
    %c3_312 = arith.constant 3 : index
    %c0_313 = arith.constant 0 : index
    %c0_314 = arith.constant 0 : index
    %363 = vector.load %arg13[%c3_312, %c0_313, %c0_314] : memref<4x4x8xbf16, #tpu.memory_space<vmem>>, vector<1x4x8xbf16>
    %364 = vector.shape_cast %363 : vector<1x4x8xbf16> to vector<4x8xbf16>
    %cst_315 = arith.constant dense<0.000000e+00> : vector<4x16xf32>
    %365 = tpu.matmul %364, %339, %cst_315 {dimension_numbers = #tpu.dot_dimension_numbers<[1], [0], [0], [1], [0, 0, 1, 1], [], []>} : vector<4x8xbf16>, vector<8x16xbf16>, vector<4x16xf32> -> vector<4x16xf32>
    %366 = arith.truncf %365 : vector<4x16xf32> to vector<4x16xbf16>
    %c3_316 = arith.constant 3 : index
    %c0_317 = arith.constant 0 : index
    %c0_318 = arith.constant 0 : index
    %367 = vector.load %arg12[%c3_316, %c0_317, %c0_318] : memref<4x16x32xbf16, #tpu.memory_space<vmem>>, vector<1x16x32xbf16>
    %368 = vector.shape_cast %367 : vector<1x16x32xbf16> to vector<16x32xbf16>
    %cst_319 = arith.constant dense<0.000000e+00> : vector<4x32xf32>
    %369 = tpu.matmul %366, %368, %cst_319 {dimension_numbers = #tpu.dot_dimension_numbers<[1], [0], [0], [1], [0, 0, 1, 1], [], []>} : vector<4x16xbf16>, vector<16x32xbf16>, vector<4x32xf32> -> vector<4x32xf32>
    %370 = arith.addf %362, %369 : vector<4x32xf32>
    %371 = arith.truncf %338 : vector<8x16xf32> to vector<8x16xbf16>
    %c0_320 = arith.constant 0 : index
    %c0_321 = arith.constant 0 : index
    %c0_322 = arith.constant 0 : index
    %372 = vector.load %arg13[%c0_320, %c0_321, %c0_322] : memref<4x4x8xbf16, #tpu.memory_space<vmem>>, vector<1x4x8xbf16>
    %373 = vector.shape_cast %372 : vector<1x4x8xbf16> to vector<4x8xbf16>
    %cst_323 = arith.constant dense<0.000000e+00> : vector<4x16xf32>
    %374 = tpu.matmul %373, %371, %cst_323 {dimension_numbers = #tpu.dot_dimension_numbers<[1], [0], [0], [1], [0, 0, 1, 1], [], []>} : vector<4x8xbf16>, vector<8x16xbf16>, vector<4x16xf32> -> vector<4x16xf32>
    %375 = arith.truncf %374 : vector<4x16xf32> to vector<4x16xbf16>
    %c0_324 = arith.constant 0 : index
    %c0_325 = arith.constant 0 : index
    %c0_326 = arith.constant 0 : index
    %376 = vector.load %arg12[%c0_324, %c0_325, %c0_326] : memref<4x16x32xbf16, #tpu.memory_space<vmem>>, vector<1x16x32xbf16>
    %377 = vector.shape_cast %376 : vector<1x16x32xbf16> to vector<16x32xbf16>
    %cst_327 = arith.constant dense<0.000000e+00> : vector<4x32xf32>
    %378 = tpu.matmul %375, %377, %cst_327 {dimension_numbers = #tpu.dot_dimension_numbers<[1], [0], [0], [1], [0, 0, 1, 1], [], []>} : vector<4x16xbf16>, vector<16x32xbf16>, vector<4x32xf32> -> vector<4x32xf32>
    %c1_328 = arith.constant 1 : index
    %c0_329 = arith.constant 0 : index
    %c0_330 = arith.constant 0 : index
    %379 = vector.load %arg13[%c1_328, %c0_329, %c0_330] : memref<4x4x8xbf16, #tpu.memory_space<vmem>>, vector<1x4x8xbf16>
    %380 = vector.shape_cast %379 : vector<1x4x8xbf16> to vector<4x8xbf16>
    %cst_331 = arith.constant dense<0.000000e+00> : vector<4x16xf32>
    %381 = tpu.matmul %380, %371, %cst_331 {dimension_numbers = #tpu.dot_dimension_numbers<[1], [0], [0], [1], [0, 0, 1, 1], [], []>} : vector<4x8xbf16>, vector<8x16xbf16>, vector<4x16xf32> -> vector<4x16xf32>
    %382 = arith.truncf %381 : vector<4x16xf32> to vector<4x16xbf16>
    %c1_332 = arith.constant 1 : index
    %c0_333 = arith.constant 0 : index
    %c0_334 = arith.constant 0 : index
    %383 = vector.load %arg12[%c1_332, %c0_333, %c0_334] : memref<4x16x32xbf16, #tpu.memory_space<vmem>>, vector<1x16x32xbf16>
    %384 = vector.shape_cast %383 : vector<1x16x32xbf16> to vector<16x32xbf16>
    %cst_335 = arith.constant dense<0.000000e+00> : vector<4x32xf32>
    %385 = tpu.matmul %382, %384, %cst_335 {dimension_numbers = #tpu.dot_dimension_numbers<[1], [0], [0], [1], [0, 0, 1, 1], [], []>} : vector<4x16xbf16>, vector<16x32xbf16>, vector<4x32xf32> -> vector<4x32xf32>
    %386 = arith.addf %378, %385 : vector<4x32xf32>
    %c2_336 = arith.constant 2 : index
    %c0_337 = arith.constant 0 : index
    %c0_338 = arith.constant 0 : index
    %387 = vector.load %arg13[%c2_336, %c0_337, %c0_338] : memref<4x4x8xbf16, #tpu.memory_space<vmem>>, vector<1x4x8xbf16>
    %388 = vector.shape_cast %387 : vector<1x4x8xbf16> to vector<4x8xbf16>
    %cst_339 = arith.constant dense<0.000000e+00> : vector<4x16xf32>
    %389 = tpu.matmul %388, %371, %cst_339 {dimension_numbers = #tpu.dot_dimension_numbers<[1], [0], [0], [1], [0, 0, 1, 1], [], []>} : vector<4x8xbf16>, vector<8x16xbf16>, vector<4x16xf32> -> vector<4x16xf32>
    %390 = arith.truncf %389 : vector<4x16xf32> to vector<4x16xbf16>
    %c2_340 = arith.constant 2 : index
    %c0_341 = arith.constant 0 : index
    %c0_342 = arith.constant 0 : index
    %391 = vector.load %arg12[%c2_340, %c0_341, %c0_342] : memref<4x16x32xbf16, #tpu.memory_space<vmem>>, vector<1x16x32xbf16>
    %392 = vector.shape_cast %391 : vector<1x16x32xbf16> to vector<16x32xbf16>
    %cst_343 = arith.constant dense<0.000000e+00> : vector<4x32xf32>
    %393 = tpu.matmul %390, %392, %cst_343 {dimension_numbers = #tpu.dot_dimension_numbers<[1], [0], [0], [1], [0, 0, 1, 1], [], []>} : vector<4x16xbf16>, vector<16x32xbf16>, vector<4x32xf32> -> vector<4x32xf32>
    %394 = arith.addf %386, %393 : vector<4x32xf32>
    %c3_344 = arith.constant 3 : index
    %c0_345 = arith.constant 0 : index
    %c0_346 = arith.constant 0 : index
    %395 = vector.load %arg13[%c3_344, %c0_345, %c0_346] : memref<4x4x8xbf16, #tpu.memory_space<vmem>>, vector<1x4x8xbf16>
    %396 = vector.shape_cast %395 : vector<1x4x8xbf16> to vector<4x8xbf16>
    %cst_347 = arith.constant dense<0.000000e+00> : vector<4x16xf32>
    %397 = tpu.matmul %396, %371, %cst_347 {dimension_numbers = #tpu.dot_dimension_numbers<[1], [0], [0], [1], [0, 0, 1, 1], [], []>} : vector<4x8xbf16>, vector<8x16xbf16>, vector<4x16xf32> -> vector<4x16xf32>
    %398 = arith.truncf %397 : vector<4x16xf32> to vector<4x16xbf16>
    %c3_348 = arith.constant 3 : index
    %c0_349 = arith.constant 0 : index
    %c0_350 = arith.constant 0 : index
    %399 = vector.load %arg12[%c3_348, %c0_349, %c0_350] : memref<4x16x32xbf16, #tpu.memory_space<vmem>>, vector<1x16x32xbf16>
    %400 = vector.shape_cast %399 : vector<1x16x32xbf16> to vector<16x32xbf16>
    %cst_351 = arith.constant dense<0.000000e+00> : vector<4x32xf32>
    %401 = tpu.matmul %398, %400, %cst_351 {dimension_numbers = #tpu.dot_dimension_numbers<[1], [0], [0], [1], [0, 0, 1, 1], [], []>} : vector<4x16xbf16>, vector<16x32xbf16>, vector<4x32xf32> -> vector<4x32xf32>
    %402 = arith.addf %394, %401 : vector<4x32xf32>
    %cst_352 = arith.constant dense<0.000000e+00> : vector<32xf32>
    %403 = vector.multi_reduction <add>, %370, %cst_352 [0] : vector<4x32xf32> to vector<32xf32>
    %404 = vector.shape_cast %403 : vector<32xf32> to vector<1x32xf32>
    %cst_353 = arith.constant 0.000000e+00 : f32
    %405 = vector.broadcast %cst_353 : f32 to vector<1x32xf32>
    %406 = arith.addf %405, %404 : vector<1x32xf32>
    %cst_354 = arith.constant dense<0.000000e+00> : vector<32xf32>
    %407 = vector.multi_reduction <add>, %402, %cst_354 [0] : vector<4x32xf32> to vector<32xf32>
    %408 = vector.shape_cast %407 : vector<32xf32> to vector<1x32xf32>
    %409 = arith.addf %406, %408 : vector<1x32xf32>
    %cst_355 = arith.constant 8.000000e+00 : f32
    %410 = vector.broadcast %cst_355 : f32 to vector<1x32xf32>
    %411 = arith.divf %409, %410 : vector<1x32xf32>
    %412 = vector.broadcast %411 : vector<1x32xf32> to vector<4x32xf32>
    %413 = arith.subf %370, %412 : vector<4x32xf32>
    %414 = arith.mulf %413, %413 : vector<4x32xf32>
    %cst_356 = arith.constant dense<0.000000e+00> : vector<32xf32>
    %415 = vector.multi_reduction <add>, %414, %cst_356 [0] : vector<4x32xf32> to vector<32xf32>
    %416 = vector.shape_cast %415 : vector<32xf32> to vector<1x32xf32>
    %cst_357 = arith.constant 0.000000e+00 : f32
    %417 = vector.broadcast %cst_357 : f32 to vector<1x32xf32>
    %418 = arith.addf %417, %416 : vector<1x32xf32>
    %419 = vector.broadcast %411 : vector<1x32xf32> to vector<4x32xf32>
    %420 = arith.subf %402, %419 : vector<4x32xf32>
    %421 = arith.mulf %420, %420 : vector<4x32xf32>
    %cst_358 = arith.constant dense<0.000000e+00> : vector<32xf32>
    %422 = vector.multi_reduction <add>, %421, %cst_358 [0] : vector<4x32xf32> to vector<32xf32>
    %423 = vector.shape_cast %422 : vector<32xf32> to vector<1x32xf32>
    %424 = arith.addf %418, %423 : vector<1x32xf32>
    %cst_359 = arith.constant 8.000000e+00 : f32
    %425 = vector.broadcast %cst_359 : f32 to vector<1x32xf32>
    %426 = arith.divf %424, %425 : vector<1x32xf32>
    %cst_360 = arith.constant 9.99999974E-6 : f32
    %427 = vector.broadcast %cst_360 : f32 to vector<1x32xf32>
    %428 = arith.addf %426, %427 : vector<1x32xf32>
    %429 = math.rsqrt %428 : vector<1x32xf32>
    %c0_361 = arith.constant 0 : index
    %c0_362 = arith.constant 0 : index
    %430 = vector.load %arg14[%c0_361, %c0_362] : memref<1x32xf32, #tpu.memory_space<vmem>>, vector<1x32xf32>
    %c0_363 = arith.constant 0 : index
    %c0_364 = arith.constant 0 : index
    %431 = vector.load %arg15[%c0_363, %c0_364] : memref<1x32xf32, #tpu.memory_space<vmem>>, vector<1x32xf32>
    %432 = vector.broadcast %411 : vector<1x32xf32> to vector<4x32xf32>
    %433 = arith.subf %370, %432 : vector<4x32xf32>
    %434 = vector.broadcast %429 : vector<1x32xf32> to vector<4x32xf32>
    %435 = arith.mulf %433, %434 : vector<4x32xf32>
    %436 = vector.broadcast %430 : vector<1x32xf32> to vector<4x32xf32>
    %437 = arith.mulf %435, %436 : vector<4x32xf32>
    %438 = vector.broadcast %431 : vector<1x32xf32> to vector<4x32xf32>
    %439 = arith.addf %437, %438 : vector<4x32xf32>
    %440 = vector.broadcast %411 : vector<1x32xf32> to vector<4x32xf32>
    %441 = arith.subf %402, %440 : vector<4x32xf32>
    %442 = vector.broadcast %429 : vector<1x32xf32> to vector<4x32xf32>
    %443 = arith.mulf %441, %442 : vector<4x32xf32>
    %444 = vector.broadcast %430 : vector<1x32xf32> to vector<4x32xf32>
    %445 = arith.mulf %443, %444 : vector<4x32xf32>
    %446 = vector.broadcast %431 : vector<1x32xf32> to vector<4x32xf32>
    %447 = arith.addf %445, %446 : vector<4x32xf32>
    %cst_365 = arith.constant 0.000000e+00 : f32
    %448 = vector.broadcast %cst_365 : f32 to vector<4x32xf32>
    %449 = arith.cmpf oge, %439, %448 : vector<4x32xf32>
    %cst_366 = arith.constant 2.000000e-01 : f32
    %450 = vector.broadcast %cst_366 : f32 to vector<4x32xf32>
    %451 = arith.mulf %450, %439 : vector<4x32xf32>
    %452 = arith.select %449, %439, %451 : vector<4x32xi1>, vector<4x32xf32>
    %cst_367 = arith.constant 0.000000e+00 : f32
    %453 = vector.broadcast %cst_367 : f32 to vector<4x32xf32>
    %454 = arith.cmpf oge, %447, %453 : vector<4x32xf32>
    %cst_368 = arith.constant 2.000000e-01 : f32
    %455 = vector.broadcast %cst_368 : f32 to vector<4x32xf32>
    %456 = arith.mulf %455, %447 : vector<4x32xf32>
    %457 = arith.select %454, %447, %456 : vector<4x32xi1>, vector<4x32xf32>
    %458 = arith.truncf %452 : vector<4x32xf32> to vector<4x32xbf16>
    %c0_369 = arith.constant 0 : index
    %c0_370 = arith.constant 0 : index
    %c0_371 = arith.constant 0 : index
    %459 = vector.load %arg17[%c0_369, %c0_370, %c0_371] : memref<4x1x4xbf16, #tpu.memory_space<vmem>>, vector<1x1x4xbf16>
    %460 = vector.shape_cast %459 : vector<1x1x4xbf16> to vector<1x4xbf16>
    %cst_372 = arith.constant dense<0.000000e+00> : vector<1x32xf32>
    %461 = tpu.matmul %460, %458, %cst_372 {dimension_numbers = #tpu.dot_dimension_numbers<[1], [0], [0], [1], [0, 0, 1, 1], [], []>} : vector<1x4xbf16>, vector<4x32xbf16>, vector<1x32xf32> -> vector<1x32xf32>
    %462 = arith.truncf %461 : vector<1x32xf32> to vector<1x32xbf16>
    %c0_373 = arith.constant 0 : index
    %c0_374 = arith.constant 0 : index
    %c0_375 = arith.constant 0 : index
    %463 = vector.load %arg16[%c0_373, %c0_374, %c0_375] : memref<4x32x8xbf16, #tpu.memory_space<vmem>>, vector<1x32x8xbf16>
    %464 = vector.shape_cast %463 : vector<1x32x8xbf16> to vector<32x8xbf16>
    %cst_376 = arith.constant dense<0.000000e+00> : vector<1x8xf32>
    %465 = tpu.matmul %462, %464, %cst_376 {dimension_numbers = #tpu.dot_dimension_numbers<[1], [0], [0], [1], [0, 0, 1, 1], [], []>} : vector<1x32xbf16>, vector<32x8xbf16>, vector<1x8xf32> -> vector<1x8xf32>
    %c1_377 = arith.constant 1 : index
    %c0_378 = arith.constant 0 : index
    %c0_379 = arith.constant 0 : index
    %466 = vector.load %arg17[%c1_377, %c0_378, %c0_379] : memref<4x1x4xbf16, #tpu.memory_space<vmem>>, vector<1x1x4xbf16>
    %467 = vector.shape_cast %466 : vector<1x1x4xbf16> to vector<1x4xbf16>
    %cst_380 = arith.constant dense<0.000000e+00> : vector<1x32xf32>
    %468 = tpu.matmul %467, %458, %cst_380 {dimension_numbers = #tpu.dot_dimension_numbers<[1], [0], [0], [1], [0, 0, 1, 1], [], []>} : vector<1x4xbf16>, vector<4x32xbf16>, vector<1x32xf32> -> vector<1x32xf32>
    %469 = arith.truncf %468 : vector<1x32xf32> to vector<1x32xbf16>
    %c1_381 = arith.constant 1 : index
    %c0_382 = arith.constant 0 : index
    %c0_383 = arith.constant 0 : index
    %470 = vector.load %arg16[%c1_381, %c0_382, %c0_383] : memref<4x32x8xbf16, #tpu.memory_space<vmem>>, vector<1x32x8xbf16>
    %471 = vector.shape_cast %470 : vector<1x32x8xbf16> to vector<32x8xbf16>
    %cst_384 = arith.constant dense<0.000000e+00> : vector<1x8xf32>
    %472 = tpu.matmul %469, %471, %cst_384 {dimension_numbers = #tpu.dot_dimension_numbers<[1], [0], [0], [1], [0, 0, 1, 1], [], []>} : vector<1x32xbf16>, vector<32x8xbf16>, vector<1x8xf32> -> vector<1x8xf32>
    %473 = arith.addf %465, %472 : vector<1x8xf32>
    %c2_385 = arith.constant 2 : index
    %c0_386 = arith.constant 0 : index
    %c0_387 = arith.constant 0 : index
    %474 = vector.load %arg17[%c2_385, %c0_386, %c0_387] : memref<4x1x4xbf16, #tpu.memory_space<vmem>>, vector<1x1x4xbf16>
    %475 = vector.shape_cast %474 : vector<1x1x4xbf16> to vector<1x4xbf16>
    %cst_388 = arith.constant dense<0.000000e+00> : vector<1x32xf32>
    %476 = tpu.matmul %475, %458, %cst_388 {dimension_numbers = #tpu.dot_dimension_numbers<[1], [0], [0], [1], [0, 0, 1, 1], [], []>} : vector<1x4xbf16>, vector<4x32xbf16>, vector<1x32xf32> -> vector<1x32xf32>
    %477 = arith.truncf %476 : vector<1x32xf32> to vector<1x32xbf16>
    %c2_389 = arith.constant 2 : index
    %c0_390 = arith.constant 0 : index
    %c0_391 = arith.constant 0 : index
    %478 = vector.load %arg16[%c2_389, %c0_390, %c0_391] : memref<4x32x8xbf16, #tpu.memory_space<vmem>>, vector<1x32x8xbf16>
    %479 = vector.shape_cast %478 : vector<1x32x8xbf16> to vector<32x8xbf16>
    %cst_392 = arith.constant dense<0.000000e+00> : vector<1x8xf32>
    %480 = tpu.matmul %477, %479, %cst_392 {dimension_numbers = #tpu.dot_dimension_numbers<[1], [0], [0], [1], [0, 0, 1, 1], [], []>} : vector<1x32xbf16>, vector<32x8xbf16>, vector<1x8xf32> -> vector<1x8xf32>
    %481 = arith.addf %473, %480 : vector<1x8xf32>
    %c3_393 = arith.constant 3 : index
    %c0_394 = arith.constant 0 : index
    %c0_395 = arith.constant 0 : index
    %482 = vector.load %arg17[%c3_393, %c0_394, %c0_395] : memref<4x1x4xbf16, #tpu.memory_space<vmem>>, vector<1x1x4xbf16>
    %483 = vector.shape_cast %482 : vector<1x1x4xbf16> to vector<1x4xbf16>
    %cst_396 = arith.constant dense<0.000000e+00> : vector<1x32xf32>
    %484 = tpu.matmul %483, %458, %cst_396 {dimension_numbers = #tpu.dot_dimension_numbers<[1], [0], [0], [1], [0, 0, 1, 1], [], []>} : vector<1x4xbf16>, vector<4x32xbf16>, vector<1x32xf32> -> vector<1x32xf32>
    %485 = arith.truncf %484 : vector<1x32xf32> to vector<1x32xbf16>
    %c3_397 = arith.constant 3 : index
    %c0_398 = arith.constant 0 : index
    %c0_399 = arith.constant 0 : index
    %486 = vector.load %arg16[%c3_397, %c0_398, %c0_399] : memref<4x32x8xbf16, #tpu.memory_space<vmem>>, vector<1x32x8xbf16>
    %487 = vector.shape_cast %486 : vector<1x32x8xbf16> to vector<32x8xbf16>
    %cst_400 = arith.constant dense<0.000000e+00> : vector<1x8xf32>
    %488 = tpu.matmul %485, %487, %cst_400 {dimension_numbers = #tpu.dot_dimension_numbers<[1], [0], [0], [1], [0, 0, 1, 1], [], []>} : vector<1x32xbf16>, vector<32x8xbf16>, vector<1x8xf32> -> vector<1x8xf32>
    %489 = arith.addf %481, %488 : vector<1x8xf32>
    %490 = arith.truncf %457 : vector<4x32xf32> to vector<4x32xbf16>
    %c0_401 = arith.constant 0 : index
    %c0_402 = arith.constant 0 : index
    %c0_403 = arith.constant 0 : index
    %491 = vector.load %arg17[%c0_401, %c0_402, %c0_403] : memref<4x1x4xbf16, #tpu.memory_space<vmem>>, vector<1x1x4xbf16>
    %492 = vector.shape_cast %491 : vector<1x1x4xbf16> to vector<1x4xbf16>
    %cst_404 = arith.constant dense<0.000000e+00> : vector<1x32xf32>
    %493 = tpu.matmul %492, %490, %cst_404 {dimension_numbers = #tpu.dot_dimension_numbers<[1], [0], [0], [1], [0, 0, 1, 1], [], []>} : vector<1x4xbf16>, vector<4x32xbf16>, vector<1x32xf32> -> vector<1x32xf32>
    %494 = arith.truncf %493 : vector<1x32xf32> to vector<1x32xbf16>
    %c0_405 = arith.constant 0 : index
    %c0_406 = arith.constant 0 : index
    %c0_407 = arith.constant 0 : index
    %495 = vector.load %arg16[%c0_405, %c0_406, %c0_407] : memref<4x32x8xbf16, #tpu.memory_space<vmem>>, vector<1x32x8xbf16>
    %496 = vector.shape_cast %495 : vector<1x32x8xbf16> to vector<32x8xbf16>
    %cst_408 = arith.constant dense<0.000000e+00> : vector<1x8xf32>
    %497 = tpu.matmul %494, %496, %cst_408 {dimension_numbers = #tpu.dot_dimension_numbers<[1], [0], [0], [1], [0, 0, 1, 1], [], []>} : vector<1x32xbf16>, vector<32x8xbf16>, vector<1x8xf32> -> vector<1x8xf32>
    %c1_409 = arith.constant 1 : index
    %c0_410 = arith.constant 0 : index
    %c0_411 = arith.constant 0 : index
    %498 = vector.load %arg17[%c1_409, %c0_410, %c0_411] : memref<4x1x4xbf16, #tpu.memory_space<vmem>>, vector<1x1x4xbf16>
    %499 = vector.shape_cast %498 : vector<1x1x4xbf16> to vector<1x4xbf16>
    %cst_412 = arith.constant dense<0.000000e+00> : vector<1x32xf32>
    %500 = tpu.matmul %499, %490, %cst_412 {dimension_numbers = #tpu.dot_dimension_numbers<[1], [0], [0], [1], [0, 0, 1, 1], [], []>} : vector<1x4xbf16>, vector<4x32xbf16>, vector<1x32xf32> -> vector<1x32xf32>
    %501 = arith.truncf %500 : vector<1x32xf32> to vector<1x32xbf16>
    %c1_413 = arith.constant 1 : index
    %c0_414 = arith.constant 0 : index
    %c0_415 = arith.constant 0 : index
    %502 = vector.load %arg16[%c1_413, %c0_414, %c0_415] : memref<4x32x8xbf16, #tpu.memory_space<vmem>>, vector<1x32x8xbf16>
    %503 = vector.shape_cast %502 : vector<1x32x8xbf16> to vector<32x8xbf16>
    %cst_416 = arith.constant dense<0.000000e+00> : vector<1x8xf32>
    %504 = tpu.matmul %501, %503, %cst_416 {dimension_numbers = #tpu.dot_dimension_numbers<[1], [0], [0], [1], [0, 0, 1, 1], [], []>} : vector<1x32xbf16>, vector<32x8xbf16>, vector<1x8xf32> -> vector<1x8xf32>
    %505 = arith.addf %497, %504 : vector<1x8xf32>
    %c2_417 = arith.constant 2 : index
    %c0_418 = arith.constant 0 : index
    %c0_419 = arith.constant 0 : index
    %506 = vector.load %arg17[%c2_417, %c0_418, %c0_419] : memref<4x1x4xbf16, #tpu.memory_space<vmem>>, vector<1x1x4xbf16>
    %507 = vector.shape_cast %506 : vector<1x1x4xbf16> to vector<1x4xbf16>
    %cst_420 = arith.constant dense<0.000000e+00> : vector<1x32xf32>
    %508 = tpu.matmul %507, %490, %cst_420 {dimension_numbers = #tpu.dot_dimension_numbers<[1], [0], [0], [1], [0, 0, 1, 1], [], []>} : vector<1x4xbf16>, vector<4x32xbf16>, vector<1x32xf32> -> vector<1x32xf32>
    %509 = arith.truncf %508 : vector<1x32xf32> to vector<1x32xbf16>
    %c2_421 = arith.constant 2 : index
    %c0_422 = arith.constant 0 : index
    %c0_423 = arith.constant 0 : index
    %510 = vector.load %arg16[%c2_421, %c0_422, %c0_423] : memref<4x32x8xbf16, #tpu.memory_space<vmem>>, vector<1x32x8xbf16>
    %511 = vector.shape_cast %510 : vector<1x32x8xbf16> to vector<32x8xbf16>
    %cst_424 = arith.constant dense<0.000000e+00> : vector<1x8xf32>
    %512 = tpu.matmul %509, %511, %cst_424 {dimension_numbers = #tpu.dot_dimension_numbers<[1], [0], [0], [1], [0, 0, 1, 1], [], []>} : vector<1x32xbf16>, vector<32x8xbf16>, vector<1x8xf32> -> vector<1x8xf32>
    %513 = arith.addf %505, %512 : vector<1x8xf32>
    %c3_425 = arith.constant 3 : index
    %c0_426 = arith.constant 0 : index
    %c0_427 = arith.constant 0 : index
    %514 = vector.load %arg17[%c3_425, %c0_426, %c0_427] : memref<4x1x4xbf16, #tpu.memory_space<vmem>>, vector<1x1x4xbf16>
    %515 = vector.shape_cast %514 : vector<1x1x4xbf16> to vector<1x4xbf16>
    %cst_428 = arith.constant dense<0.000000e+00> : vector<1x32xf32>
    %516 = tpu.matmul %515, %490, %cst_428 {dimension_numbers = #tpu.dot_dimension_numbers<[1], [0], [0], [1], [0, 0, 1, 1], [], []>} : vector<1x4xbf16>, vector<4x32xbf16>, vector<1x32xf32> -> vector<1x32xf32>
    %517 = arith.truncf %516 : vector<1x32xf32> to vector<1x32xbf16>
    %c3_429 = arith.constant 3 : index
    %c0_430 = arith.constant 0 : index
    %c0_431 = arith.constant 0 : index
    %518 = vector.load %arg16[%c3_429, %c0_430, %c0_431] : memref<4x32x8xbf16, #tpu.memory_space<vmem>>, vector<1x32x8xbf16>
    %519 = vector.shape_cast %518 : vector<1x32x8xbf16> to vector<32x8xbf16>
    %cst_432 = arith.constant dense<0.000000e+00> : vector<1x8xf32>
    %520 = tpu.matmul %517, %519, %cst_432 {dimension_numbers = #tpu.dot_dimension_numbers<[1], [0], [0], [1], [0, 0, 1, 1], [], []>} : vector<1x32xbf16>, vector<32x8xbf16>, vector<1x8xf32> -> vector<1x8xf32>
    %521 = arith.addf %513, %520 : vector<1x8xf32>
    %c0_433 = arith.constant 0 : index
    %c0_434 = arith.constant 0 : index
    %c0_435 = arith.constant 0 : index
    %522 = vector.load %arg19[%c0_433, %c0_434, %c0_435] : memref<4x16x8xbf16, #tpu.memory_space<vmem>>, vector<1x16x8xbf16>
    %523 = vector.shape_cast %522 : vector<1x16x8xbf16> to vector<16x8xbf16>
    %524 = arith.truncf %232 : vector<1x8xf32> to vector<1x8xbf16>
    %525 = vector.extract_strided_slice %523 {offsets = [0, 0], sizes = [8, 8], strides = [1, 1]} : vector<16x8xbf16> to vector<8x8xbf16>
    %cst_436 = arith.constant dense<0.000000e+00> : vector<1x8xf32>
    %526 = tpu.matmul %524, %525, %cst_436 {dimension_numbers = #tpu.dot_dimension_numbers<[1], [0], [0], [1], [0, 0, 1, 1], [], []>} : vector<1x8xbf16>, vector<8x8xbf16>, vector<1x8xf32> -> vector<1x8xf32>
    %527 = arith.truncf %489 : vector<1x8xf32> to vector<1x8xbf16>
    %528 = vector.extract_strided_slice %523 {offsets = [8, 0], sizes = [8, 8], strides = [1, 1]} : vector<16x8xbf16> to vector<8x8xbf16>
    %cst_437 = arith.constant dense<0.000000e+00> : vector<1x8xf32>
    %529 = tpu.matmul %527, %528, %cst_437 {dimension_numbers = #tpu.dot_dimension_numbers<[1], [0], [0], [1], [0, 0, 1, 1], [], []>} : vector<1x8xbf16>, vector<8x8xbf16>, vector<1x8xf32> -> vector<1x8xf32>
    %530 = arith.addf %526, %529 : vector<1x8xf32>
    %c0_438 = arith.constant 0 : index
    %c0_439 = arith.constant 0 : index
    %c0_440 = arith.constant 0 : index
    %531 = vector.load %arg18[%c0_438, %c0_439, %c0_440] : memref<4x16x1xbf16, #tpu.memory_space<vmem>>, vector<1x16x1xbf16>
    %532 = vector.shape_cast %531 : vector<1x16x1xbf16> to vector<16x1xbf16>
    %533 = arith.truncf %530 : vector<1x8xf32> to vector<1x8xbf16>
    %cst_441 = arith.constant dense<0.000000e+00> : vector<16x8xf32>
    %534 = tpu.matmul %532, %533, %cst_441 {dimension_numbers = #tpu.dot_dimension_numbers<[1], [0], [0], [1], [0, 0, 1, 1], [], []>} : vector<16x1xbf16>, vector<1x8xbf16>, vector<16x8xf32> -> vector<16x8xf32>
    %c1_442 = arith.constant 1 : index
    %c0_443 = arith.constant 0 : index
    %c0_444 = arith.constant 0 : index
    %535 = vector.load %arg19[%c1_442, %c0_443, %c0_444] : memref<4x16x8xbf16, #tpu.memory_space<vmem>>, vector<1x16x8xbf16>
    %536 = vector.shape_cast %535 : vector<1x16x8xbf16> to vector<16x8xbf16>
    %537 = arith.truncf %232 : vector<1x8xf32> to vector<1x8xbf16>
    %538 = vector.extract_strided_slice %536 {offsets = [0, 0], sizes = [8, 8], strides = [1, 1]} : vector<16x8xbf16> to vector<8x8xbf16>
    %cst_445 = arith.constant dense<0.000000e+00> : vector<1x8xf32>
    %539 = tpu.matmul %537, %538, %cst_445 {dimension_numbers = #tpu.dot_dimension_numbers<[1], [0], [0], [1], [0, 0, 1, 1], [], []>} : vector<1x8xbf16>, vector<8x8xbf16>, vector<1x8xf32> -> vector<1x8xf32>
    %540 = arith.truncf %489 : vector<1x8xf32> to vector<1x8xbf16>
    %541 = vector.extract_strided_slice %536 {offsets = [8, 0], sizes = [8, 8], strides = [1, 1]} : vector<16x8xbf16> to vector<8x8xbf16>
    %cst_446 = arith.constant dense<0.000000e+00> : vector<1x8xf32>
    %542 = tpu.matmul %540, %541, %cst_446 {dimension_numbers = #tpu.dot_dimension_numbers<[1], [0], [0], [1], [0, 0, 1, 1], [], []>} : vector<1x8xbf16>, vector<8x8xbf16>, vector<1x8xf32> -> vector<1x8xf32>
    %543 = arith.addf %539, %542 : vector<1x8xf32>
    %c1_447 = arith.constant 1 : index
    %c0_448 = arith.constant 0 : index
    %c0_449 = arith.constant 0 : index
    %544 = vector.load %arg18[%c1_447, %c0_448, %c0_449] : memref<4x16x1xbf16, #tpu.memory_space<vmem>>, vector<1x16x1xbf16>
    %545 = vector.shape_cast %544 : vector<1x16x1xbf16> to vector<16x1xbf16>
    %546 = arith.truncf %543 : vector<1x8xf32> to vector<1x8xbf16>
    %cst_450 = arith.constant dense<0.000000e+00> : vector<16x8xf32>
    %547 = tpu.matmul %545, %546, %cst_450 {dimension_numbers = #tpu.dot_dimension_numbers<[1], [0], [0], [1], [0, 0, 1, 1], [], []>} : vector<16x1xbf16>, vector<1x8xbf16>, vector<16x8xf32> -> vector<16x8xf32>
    %548 = arith.addf %534, %547 : vector<16x8xf32>
    %c2_451 = arith.constant 2 : index
    %c0_452 = arith.constant 0 : index
    %c0_453 = arith.constant 0 : index
    %549 = vector.load %arg19[%c2_451, %c0_452, %c0_453] : memref<4x16x8xbf16, #tpu.memory_space<vmem>>, vector<1x16x8xbf16>
    %550 = vector.shape_cast %549 : vector<1x16x8xbf16> to vector<16x8xbf16>
    %551 = arith.truncf %232 : vector<1x8xf32> to vector<1x8xbf16>
    %552 = vector.extract_strided_slice %550 {offsets = [0, 0], sizes = [8, 8], strides = [1, 1]} : vector<16x8xbf16> to vector<8x8xbf16>
    %cst_454 = arith.constant dense<0.000000e+00> : vector<1x8xf32>
    %553 = tpu.matmul %551, %552, %cst_454 {dimension_numbers = #tpu.dot_dimension_numbers<[1], [0], [0], [1], [0, 0, 1, 1], [], []>} : vector<1x8xbf16>, vector<8x8xbf16>, vector<1x8xf32> -> vector<1x8xf32>
    %554 = arith.truncf %489 : vector<1x8xf32> to vector<1x8xbf16>
    %555 = vector.extract_strided_slice %550 {offsets = [8, 0], sizes = [8, 8], strides = [1, 1]} : vector<16x8xbf16> to vector<8x8xbf16>
    %cst_455 = arith.constant dense<0.000000e+00> : vector<1x8xf32>
    %556 = tpu.matmul %554, %555, %cst_455 {dimension_numbers = #tpu.dot_dimension_numbers<[1], [0], [0], [1], [0, 0, 1, 1], [], []>} : vector<1x8xbf16>, vector<8x8xbf16>, vector<1x8xf32> -> vector<1x8xf32>
    %557 = arith.addf %553, %556 : vector<1x8xf32>
    %c2_456 = arith.constant 2 : index
    %c0_457 = arith.constant 0 : index
    %c0_458 = arith.constant 0 : index
    %558 = vector.load %arg18[%c2_456, %c0_457, %c0_458] : memref<4x16x1xbf16, #tpu.memory_space<vmem>>, vector<1x16x1xbf16>
    %559 = vector.shape_cast %558 : vector<1x16x1xbf16> to vector<16x1xbf16>
    %560 = arith.truncf %557 : vector<1x8xf32> to vector<1x8xbf16>
    %cst_459 = arith.constant dense<0.000000e+00> : vector<16x8xf32>
    %561 = tpu.matmul %559, %560, %cst_459 {dimension_numbers = #tpu.dot_dimension_numbers<[1], [0], [0], [1], [0, 0, 1, 1], [], []>} : vector<16x1xbf16>, vector<1x8xbf16>, vector<16x8xf32> -> vector<16x8xf32>
    %562 = arith.addf %548, %561 : vector<16x8xf32>
    %c3_460 = arith.constant 3 : index
    %c0_461 = arith.constant 0 : index
    %c0_462 = arith.constant 0 : index
    %563 = vector.load %arg19[%c3_460, %c0_461, %c0_462] : memref<4x16x8xbf16, #tpu.memory_space<vmem>>, vector<1x16x8xbf16>
    %564 = vector.shape_cast %563 : vector<1x16x8xbf16> to vector<16x8xbf16>
    %565 = arith.truncf %232 : vector<1x8xf32> to vector<1x8xbf16>
    %566 = vector.extract_strided_slice %564 {offsets = [0, 0], sizes = [8, 8], strides = [1, 1]} : vector<16x8xbf16> to vector<8x8xbf16>
    %cst_463 = arith.constant dense<0.000000e+00> : vector<1x8xf32>
    %567 = tpu.matmul %565, %566, %cst_463 {dimension_numbers = #tpu.dot_dimension_numbers<[1], [0], [0], [1], [0, 0, 1, 1], [], []>} : vector<1x8xbf16>, vector<8x8xbf16>, vector<1x8xf32> -> vector<1x8xf32>
    %568 = arith.truncf %489 : vector<1x8xf32> to vector<1x8xbf16>
    %569 = vector.extract_strided_slice %564 {offsets = [8, 0], sizes = [8, 8], strides = [1, 1]} : vector<16x8xbf16> to vector<8x8xbf16>
    %cst_464 = arith.constant dense<0.000000e+00> : vector<1x8xf32>
    %570 = tpu.matmul %568, %569, %cst_464 {dimension_numbers = #tpu.dot_dimension_numbers<[1], [0], [0], [1], [0, 0, 1, 1], [], []>} : vector<1x8xbf16>, vector<8x8xbf16>, vector<1x8xf32> -> vector<1x8xf32>
    %571 = arith.addf %567, %570 : vector<1x8xf32>
    %c3_465 = arith.constant 3 : index
    %c0_466 = arith.constant 0 : index
    %c0_467 = arith.constant 0 : index
    %572 = vector.load %arg18[%c3_465, %c0_466, %c0_467] : memref<4x16x1xbf16, #tpu.memory_space<vmem>>, vector<1x16x1xbf16>
    %573 = vector.shape_cast %572 : vector<1x16x1xbf16> to vector<16x1xbf16>
    %574 = arith.truncf %571 : vector<1x8xf32> to vector<1x8xbf16>
    %cst_468 = arith.constant dense<0.000000e+00> : vector<16x8xf32>
    %575 = tpu.matmul %573, %574, %cst_468 {dimension_numbers = #tpu.dot_dimension_numbers<[1], [0], [0], [1], [0, 0, 1, 1], [], []>} : vector<16x1xbf16>, vector<1x8xbf16>, vector<16x8xf32> -> vector<16x8xf32>
    %576 = arith.addf %562, %575 : vector<16x8xf32>
    %c0_469 = arith.constant 0 : index
    %c0_470 = arith.constant 0 : index
    %c0_471 = arith.constant 0 : index
    %577 = vector.load %arg19[%c0_469, %c0_470, %c0_471] : memref<4x16x8xbf16, #tpu.memory_space<vmem>>, vector<1x16x8xbf16>
    %578 = vector.shape_cast %577 : vector<1x16x8xbf16> to vector<16x8xbf16>
    %579 = arith.truncf %264 : vector<1x8xf32> to vector<1x8xbf16>
    %580 = vector.extract_strided_slice %578 {offsets = [0, 0], sizes = [8, 8], strides = [1, 1]} : vector<16x8xbf16> to vector<8x8xbf16>
    %cst_472 = arith.constant dense<0.000000e+00> : vector<1x8xf32>
    %581 = tpu.matmul %579, %580, %cst_472 {dimension_numbers = #tpu.dot_dimension_numbers<[1], [0], [0], [1], [0, 0, 1, 1], [], []>} : vector<1x8xbf16>, vector<8x8xbf16>, vector<1x8xf32> -> vector<1x8xf32>
    %582 = arith.truncf %521 : vector<1x8xf32> to vector<1x8xbf16>
    %583 = vector.extract_strided_slice %578 {offsets = [8, 0], sizes = [8, 8], strides = [1, 1]} : vector<16x8xbf16> to vector<8x8xbf16>
    %cst_473 = arith.constant dense<0.000000e+00> : vector<1x8xf32>
    %584 = tpu.matmul %582, %583, %cst_473 {dimension_numbers = #tpu.dot_dimension_numbers<[1], [0], [0], [1], [0, 0, 1, 1], [], []>} : vector<1x8xbf16>, vector<8x8xbf16>, vector<1x8xf32> -> vector<1x8xf32>
    %585 = arith.addf %581, %584 : vector<1x8xf32>
    %c0_474 = arith.constant 0 : index
    %c0_475 = arith.constant 0 : index
    %c0_476 = arith.constant 0 : index
    %586 = vector.load %arg18[%c0_474, %c0_475, %c0_476] : memref<4x16x1xbf16, #tpu.memory_space<vmem>>, vector<1x16x1xbf16>
    %587 = vector.shape_cast %586 : vector<1x16x1xbf16> to vector<16x1xbf16>
    %588 = arith.truncf %585 : vector<1x8xf32> to vector<1x8xbf16>
    %cst_477 = arith.constant dense<0.000000e+00> : vector<16x8xf32>
    %589 = tpu.matmul %587, %588, %cst_477 {dimension_numbers = #tpu.dot_dimension_numbers<[1], [0], [0], [1], [0, 0, 1, 1], [], []>} : vector<16x1xbf16>, vector<1x8xbf16>, vector<16x8xf32> -> vector<16x8xf32>
    %c1_478 = arith.constant 1 : index
    %c0_479 = arith.constant 0 : index
    %c0_480 = arith.constant 0 : index
    %590 = vector.load %arg19[%c1_478, %c0_479, %c0_480] : memref<4x16x8xbf16, #tpu.memory_space<vmem>>, vector<1x16x8xbf16>
    %591 = vector.shape_cast %590 : vector<1x16x8xbf16> to vector<16x8xbf16>
    %592 = arith.truncf %264 : vector<1x8xf32> to vector<1x8xbf16>
    %593 = vector.extract_strided_slice %591 {offsets = [0, 0], sizes = [8, 8], strides = [1, 1]} : vector<16x8xbf16> to vector<8x8xbf16>
    %cst_481 = arith.constant dense<0.000000e+00> : vector<1x8xf32>
    %594 = tpu.matmul %592, %593, %cst_481 {dimension_numbers = #tpu.dot_dimension_numbers<[1], [0], [0], [1], [0, 0, 1, 1], [], []>} : vector<1x8xbf16>, vector<8x8xbf16>, vector<1x8xf32> -> vector<1x8xf32>
    %595 = arith.truncf %521 : vector<1x8xf32> to vector<1x8xbf16>
    %596 = vector.extract_strided_slice %591 {offsets = [8, 0], sizes = [8, 8], strides = [1, 1]} : vector<16x8xbf16> to vector<8x8xbf16>
    %cst_482 = arith.constant dense<0.000000e+00> : vector<1x8xf32>
    %597 = tpu.matmul %595, %596, %cst_482 {dimension_numbers = #tpu.dot_dimension_numbers<[1], [0], [0], [1], [0, 0, 1, 1], [], []>} : vector<1x8xbf16>, vector<8x8xbf16>, vector<1x8xf32> -> vector<1x8xf32>
    %598 = arith.addf %594, %597 : vector<1x8xf32>
    %c1_483 = arith.constant 1 : index
    %c0_484 = arith.constant 0 : index
    %c0_485 = arith.constant 0 : index
    %599 = vector.load %arg18[%c1_483, %c0_484, %c0_485] : memref<4x16x1xbf16, #tpu.memory_space<vmem>>, vector<1x16x1xbf16>
    %600 = vector.shape_cast %599 : vector<1x16x1xbf16> to vector<16x1xbf16>
    %601 = arith.truncf %598 : vector<1x8xf32> to vector<1x8xbf16>
    %cst_486 = arith.constant dense<0.000000e+00> : vector<16x8xf32>
    %602 = tpu.matmul %600, %601, %cst_486 {dimension_numbers = #tpu.dot_dimension_numbers<[1], [0], [0], [1], [0, 0, 1, 1], [], []>} : vector<16x1xbf16>, vector<1x8xbf16>, vector<16x8xf32> -> vector<16x8xf32>
    %603 = arith.addf %589, %602 : vector<16x8xf32>
    %c2_487 = arith.constant 2 : index
    %c0_488 = arith.constant 0 : index
    %c0_489 = arith.constant 0 : index
    %604 = vector.load %arg19[%c2_487, %c0_488, %c0_489] : memref<4x16x8xbf16, #tpu.memory_space<vmem>>, vector<1x16x8xbf16>
    %605 = vector.shape_cast %604 : vector<1x16x8xbf16> to vector<16x8xbf16>
    %606 = arith.truncf %264 : vector<1x8xf32> to vector<1x8xbf16>
    %607 = vector.extract_strided_slice %605 {offsets = [0, 0], sizes = [8, 8], strides = [1, 1]} : vector<16x8xbf16> to vector<8x8xbf16>
    %cst_490 = arith.constant dense<0.000000e+00> : vector<1x8xf32>
    %608 = tpu.matmul %606, %607, %cst_490 {dimension_numbers = #tpu.dot_dimension_numbers<[1], [0], [0], [1], [0, 0, 1, 1], [], []>} : vector<1x8xbf16>, vector<8x8xbf16>, vector<1x8xf32> -> vector<1x8xf32>
    %609 = arith.truncf %521 : vector<1x8xf32> to vector<1x8xbf16>
    %610 = vector.extract_strided_slice %605 {offsets = [8, 0], sizes = [8, 8], strides = [1, 1]} : vector<16x8xbf16> to vector<8x8xbf16>
    %cst_491 = arith.constant dense<0.000000e+00> : vector<1x8xf32>
    %611 = tpu.matmul %609, %610, %cst_491 {dimension_numbers = #tpu.dot_dimension_numbers<[1], [0], [0], [1], [0, 0, 1, 1], [], []>} : vector<1x8xbf16>, vector<8x8xbf16>, vector<1x8xf32> -> vector<1x8xf32>
    %612 = arith.addf %608, %611 : vector<1x8xf32>
    %c2_492 = arith.constant 2 : index
    %c0_493 = arith.constant 0 : index
    %c0_494 = arith.constant 0 : index
    %613 = vector.load %arg18[%c2_492, %c0_493, %c0_494] : memref<4x16x1xbf16, #tpu.memory_space<vmem>>, vector<1x16x1xbf16>
    %614 = vector.shape_cast %613 : vector<1x16x1xbf16> to vector<16x1xbf16>
    %615 = arith.truncf %612 : vector<1x8xf32> to vector<1x8xbf16>
    %cst_495 = arith.constant dense<0.000000e+00> : vector<16x8xf32>
    %616 = tpu.matmul %614, %615, %cst_495 {dimension_numbers = #tpu.dot_dimension_numbers<[1], [0], [0], [1], [0, 0, 1, 1], [], []>} : vector<16x1xbf16>, vector<1x8xbf16>, vector<16x8xf32> -> vector<16x8xf32>
    %617 = arith.addf %603, %616 : vector<16x8xf32>
    %c3_496 = arith.constant 3 : index
    %c0_497 = arith.constant 0 : index
    %c0_498 = arith.constant 0 : index
    %618 = vector.load %arg19[%c3_496, %c0_497, %c0_498] : memref<4x16x8xbf16, #tpu.memory_space<vmem>>, vector<1x16x8xbf16>
    %619 = vector.shape_cast %618 : vector<1x16x8xbf16> to vector<16x8xbf16>
    %620 = arith.truncf %264 : vector<1x8xf32> to vector<1x8xbf16>
    %621 = vector.extract_strided_slice %619 {offsets = [0, 0], sizes = [8, 8], strides = [1, 1]} : vector<16x8xbf16> to vector<8x8xbf16>
    %cst_499 = arith.constant dense<0.000000e+00> : vector<1x8xf32>
    %622 = tpu.matmul %620, %621, %cst_499 {dimension_numbers = #tpu.dot_dimension_numbers<[1], [0], [0], [1], [0, 0, 1, 1], [], []>} : vector<1x8xbf16>, vector<8x8xbf16>, vector<1x8xf32> -> vector<1x8xf32>
    %623 = arith.truncf %521 : vector<1x8xf32> to vector<1x8xbf16>
    %624 = vector.extract_strided_slice %619 {offsets = [8, 0], sizes = [8, 8], strides = [1, 1]} : vector<16x8xbf16> to vector<8x8xbf16>
    %cst_500 = arith.constant dense<0.000000e+00> : vector<1x8xf32>
    %625 = tpu.matmul %623, %624, %cst_500 {dimension_numbers = #tpu.dot_dimension_numbers<[1], [0], [0], [1], [0, 0, 1, 1], [], []>} : vector<1x8xbf16>, vector<8x8xbf16>, vector<1x8xf32> -> vector<1x8xf32>
    %626 = arith.addf %622, %625 : vector<1x8xf32>
    %c3_501 = arith.constant 3 : index
    %c0_502 = arith.constant 0 : index
    %c0_503 = arith.constant 0 : index
    %627 = vector.load %arg18[%c3_501, %c0_502, %c0_503] : memref<4x16x1xbf16, #tpu.memory_space<vmem>>, vector<1x16x1xbf16>
    %628 = vector.shape_cast %627 : vector<1x16x1xbf16> to vector<16x1xbf16>
    %629 = arith.truncf %626 : vector<1x8xf32> to vector<1x8xbf16>
    %cst_504 = arith.constant dense<0.000000e+00> : vector<16x8xf32>
    %630 = tpu.matmul %628, %629, %cst_504 {dimension_numbers = #tpu.dot_dimension_numbers<[1], [0], [0], [1], [0, 0, 1, 1], [], []>} : vector<16x1xbf16>, vector<1x8xbf16>, vector<16x8xf32> -> vector<16x8xf32>
    %631 = arith.addf %617, %630 : vector<16x8xf32>
    %cst_505 = arith.constant 0.000000e+00 : f32
    %632 = vector.broadcast %cst_505 : f32 to vector<16x8xf32>
    %633 = arith.cmpf oge, %576, %632 : vector<16x8xf32>
    %cst_506 = arith.constant 2.000000e-01 : f32
    %634 = vector.broadcast %cst_506 : f32 to vector<16x8xf32>
    %635 = arith.mulf %634, %576 : vector<16x8xf32>
    %636 = arith.select %633, %576, %635 : vector<16x8xi1>, vector<16x8xf32>
    %cst_507 = arith.constant 0.000000e+00 : f32
    %637 = vector.broadcast %cst_507 : f32 to vector<16x8xf32>
    %638 = arith.cmpf oge, %631, %637 : vector<16x8xf32>
    %cst_508 = arith.constant 2.000000e-01 : f32
    %639 = vector.broadcast %cst_508 : f32 to vector<16x8xf32>
    %640 = arith.mulf %639, %631 : vector<16x8xf32>
    %641 = arith.select %638, %631, %640 : vector<16x8xi1>, vector<16x8xf32>
    %c0_509 = arith.constant 0 : index
    %c0_510 = arith.constant 0 : index
    %c0_511 = arith.constant 0 : index
    %642 = vector.load %arg21[%c0_509, %c0_510, %c0_511] : memref<4x8x4xbf16, #tpu.memory_space<vmem>>, vector<1x8x4xbf16>
    %643 = vector.shape_cast %642 : vector<1x8x4xbf16> to vector<8x4xbf16>
    %644 = arith.truncf %636 : vector<16x8xf32> to vector<16x8xbf16>
    %cst_512 = arith.constant dense<0.000000e+00> : vector<16x4xf32>
    %645 = tpu.matmul %644, %643, %cst_512 {dimension_numbers = #tpu.dot_dimension_numbers<[1], [0], [0], [1], [0, 0, 1, 1], [], []>} : vector<16x8xbf16>, vector<8x4xbf16>, vector<16x4xf32> -> vector<16x4xf32>
    %c0_513 = arith.constant 0 : index
    %c0_514 = arith.constant 0 : index
    %c0_515 = arith.constant 0 : index
    %646 = vector.load %arg20[%c0_513, %c0_514, %c0_515] : memref<4x32x16xbf16, #tpu.memory_space<vmem>>, vector<1x32x16xbf16>
    %647 = vector.shape_cast %646 : vector<1x32x16xbf16> to vector<32x16xbf16>
    %648 = arith.truncf %645 : vector<16x4xf32> to vector<16x4xbf16>
    %cst_516 = arith.constant dense<0.000000e+00> : vector<32x4xf32>
    %649 = tpu.matmul %647, %648, %cst_516 {dimension_numbers = #tpu.dot_dimension_numbers<[1], [0], [0], [1], [0, 0, 1, 1], [], []>} : vector<32x16xbf16>, vector<16x4xbf16>, vector<32x4xf32> -> vector<32x4xf32>
    %c1_517 = arith.constant 1 : index
    %c0_518 = arith.constant 0 : index
    %c0_519 = arith.constant 0 : index
    %650 = vector.load %arg21[%c1_517, %c0_518, %c0_519] : memref<4x8x4xbf16, #tpu.memory_space<vmem>>, vector<1x8x4xbf16>
    %651 = vector.shape_cast %650 : vector<1x8x4xbf16> to vector<8x4xbf16>
    %652 = arith.truncf %636 : vector<16x8xf32> to vector<16x8xbf16>
    %cst_520 = arith.constant dense<0.000000e+00> : vector<16x4xf32>
    %653 = tpu.matmul %652, %651, %cst_520 {dimension_numbers = #tpu.dot_dimension_numbers<[1], [0], [0], [1], [0, 0, 1, 1], [], []>} : vector<16x8xbf16>, vector<8x4xbf16>, vector<16x4xf32> -> vector<16x4xf32>
    %c1_521 = arith.constant 1 : index
    %c0_522 = arith.constant 0 : index
    %c0_523 = arith.constant 0 : index
    %654 = vector.load %arg20[%c1_521, %c0_522, %c0_523] : memref<4x32x16xbf16, #tpu.memory_space<vmem>>, vector<1x32x16xbf16>
    %655 = vector.shape_cast %654 : vector<1x32x16xbf16> to vector<32x16xbf16>
    %656 = arith.truncf %653 : vector<16x4xf32> to vector<16x4xbf16>
    %cst_524 = arith.constant dense<0.000000e+00> : vector<32x4xf32>
    %657 = tpu.matmul %655, %656, %cst_524 {dimension_numbers = #tpu.dot_dimension_numbers<[1], [0], [0], [1], [0, 0, 1, 1], [], []>} : vector<32x16xbf16>, vector<16x4xbf16>, vector<32x4xf32> -> vector<32x4xf32>
    %658 = arith.addf %649, %657 : vector<32x4xf32>
    %c2_525 = arith.constant 2 : index
    %c0_526 = arith.constant 0 : index
    %c0_527 = arith.constant 0 : index
    %659 = vector.load %arg21[%c2_525, %c0_526, %c0_527] : memref<4x8x4xbf16, #tpu.memory_space<vmem>>, vector<1x8x4xbf16>
    %660 = vector.shape_cast %659 : vector<1x8x4xbf16> to vector<8x4xbf16>
    %661 = arith.truncf %636 : vector<16x8xf32> to vector<16x8xbf16>
    %cst_528 = arith.constant dense<0.000000e+00> : vector<16x4xf32>
    %662 = tpu.matmul %661, %660, %cst_528 {dimension_numbers = #tpu.dot_dimension_numbers<[1], [0], [0], [1], [0, 0, 1, 1], [], []>} : vector<16x8xbf16>, vector<8x4xbf16>, vector<16x4xf32> -> vector<16x4xf32>
    %c2_529 = arith.constant 2 : index
    %c0_530 = arith.constant 0 : index
    %c0_531 = arith.constant 0 : index
    %663 = vector.load %arg20[%c2_529, %c0_530, %c0_531] : memref<4x32x16xbf16, #tpu.memory_space<vmem>>, vector<1x32x16xbf16>
    %664 = vector.shape_cast %663 : vector<1x32x16xbf16> to vector<32x16xbf16>
    %665 = arith.truncf %662 : vector<16x4xf32> to vector<16x4xbf16>
    %cst_532 = arith.constant dense<0.000000e+00> : vector<32x4xf32>
    %666 = tpu.matmul %664, %665, %cst_532 {dimension_numbers = #tpu.dot_dimension_numbers<[1], [0], [0], [1], [0, 0, 1, 1], [], []>} : vector<32x16xbf16>, vector<16x4xbf16>, vector<32x4xf32> -> vector<32x4xf32>
    %667 = arith.addf %658, %666 : vector<32x4xf32>
    %c3_533 = arith.constant 3 : index
    %c0_534 = arith.constant 0 : index
    %c0_535 = arith.constant 0 : index
    %668 = vector.load %arg21[%c3_533, %c0_534, %c0_535] : memref<4x8x4xbf16, #tpu.memory_space<vmem>>, vector<1x8x4xbf16>
    %669 = vector.shape_cast %668 : vector<1x8x4xbf16> to vector<8x4xbf16>
    %670 = arith.truncf %636 : vector<16x8xf32> to vector<16x8xbf16>
    %cst_536 = arith.constant dense<0.000000e+00> : vector<16x4xf32>
    %671 = tpu.matmul %670, %669, %cst_536 {dimension_numbers = #tpu.dot_dimension_numbers<[1], [0], [0], [1], [0, 0, 1, 1], [], []>} : vector<16x8xbf16>, vector<8x4xbf16>, vector<16x4xf32> -> vector<16x4xf32>
    %c3_537 = arith.constant 3 : index
    %c0_538 = arith.constant 0 : index
    %c0_539 = arith.constant 0 : index
    %672 = vector.load %arg20[%c3_537, %c0_538, %c0_539] : memref<4x32x16xbf16, #tpu.memory_space<vmem>>, vector<1x32x16xbf16>
    %673 = vector.shape_cast %672 : vector<1x32x16xbf16> to vector<32x16xbf16>
    %674 = arith.truncf %671 : vector<16x4xf32> to vector<16x4xbf16>
    %cst_540 = arith.constant dense<0.000000e+00> : vector<32x4xf32>
    %675 = tpu.matmul %673, %674, %cst_540 {dimension_numbers = #tpu.dot_dimension_numbers<[1], [0], [0], [1], [0, 0, 1, 1], [], []>} : vector<32x16xbf16>, vector<16x4xbf16>, vector<32x4xf32> -> vector<32x4xf32>
    %676 = arith.addf %667, %675 : vector<32x4xf32>
    %c0_541 = arith.constant 0 : index
    %c0_542 = arith.constant 0 : index
    %c0_543 = arith.constant 0 : index
    %677 = vector.load %arg21[%c0_541, %c0_542, %c0_543] : memref<4x8x4xbf16, #tpu.memory_space<vmem>>, vector<1x8x4xbf16>
    %678 = vector.shape_cast %677 : vector<1x8x4xbf16> to vector<8x4xbf16>
    %679 = arith.truncf %641 : vector<16x8xf32> to vector<16x8xbf16>
    %cst_544 = arith.constant dense<0.000000e+00> : vector<16x4xf32>
    %680 = tpu.matmul %679, %678, %cst_544 {dimension_numbers = #tpu.dot_dimension_numbers<[1], [0], [0], [1], [0, 0, 1, 1], [], []>} : vector<16x8xbf16>, vector<8x4xbf16>, vector<16x4xf32> -> vector<16x4xf32>
    %c0_545 = arith.constant 0 : index
    %c0_546 = arith.constant 0 : index
    %c0_547 = arith.constant 0 : index
    %681 = vector.load %arg20[%c0_545, %c0_546, %c0_547] : memref<4x32x16xbf16, #tpu.memory_space<vmem>>, vector<1x32x16xbf16>
    %682 = vector.shape_cast %681 : vector<1x32x16xbf16> to vector<32x16xbf16>
    %683 = arith.truncf %680 : vector<16x4xf32> to vector<16x4xbf16>
    %cst_548 = arith.constant dense<0.000000e+00> : vector<32x4xf32>
    %684 = tpu.matmul %682, %683, %cst_548 {dimension_numbers = #tpu.dot_dimension_numbers<[1], [0], [0], [1], [0, 0, 1, 1], [], []>} : vector<32x16xbf16>, vector<16x4xbf16>, vector<32x4xf32> -> vector<32x4xf32>
    %c1_549 = arith.constant 1 : index
    %c0_550 = arith.constant 0 : index
    %c0_551 = arith.constant 0 : index
    %685 = vector.load %arg21[%c1_549, %c0_550, %c0_551] : memref<4x8x4xbf16, #tpu.memory_space<vmem>>, vector<1x8x4xbf16>
    %686 = vector.shape_cast %685 : vector<1x8x4xbf16> to vector<8x4xbf16>
    %687 = arith.truncf %641 : vector<16x8xf32> to vector<16x8xbf16>
    %cst_552 = arith.constant dense<0.000000e+00> : vector<16x4xf32>
    %688 = tpu.matmul %687, %686, %cst_552 {dimension_numbers = #tpu.dot_dimension_numbers<[1], [0], [0], [1], [0, 0, 1, 1], [], []>} : vector<16x8xbf16>, vector<8x4xbf16>, vector<16x4xf32> -> vector<16x4xf32>
    %c1_553 = arith.constant 1 : index
    %c0_554 = arith.constant 0 : index
    %c0_555 = arith.constant 0 : index
    %689 = vector.load %arg20[%c1_553, %c0_554, %c0_555] : memref<4x32x16xbf16, #tpu.memory_space<vmem>>, vector<1x32x16xbf16>
    %690 = vector.shape_cast %689 : vector<1x32x16xbf16> to vector<32x16xbf16>
    %691 = arith.truncf %688 : vector<16x4xf32> to vector<16x4xbf16>
    %cst_556 = arith.constant dense<0.000000e+00> : vector<32x4xf32>
    %692 = tpu.matmul %690, %691, %cst_556 {dimension_numbers = #tpu.dot_dimension_numbers<[1], [0], [0], [1], [0, 0, 1, 1], [], []>} : vector<32x16xbf16>, vector<16x4xbf16>, vector<32x4xf32> -> vector<32x4xf32>
    %693 = arith.addf %684, %692 : vector<32x4xf32>
    %c2_557 = arith.constant 2 : index
    %c0_558 = arith.constant 0 : index
    %c0_559 = arith.constant 0 : index
    %694 = vector.load %arg21[%c2_557, %c0_558, %c0_559] : memref<4x8x4xbf16, #tpu.memory_space<vmem>>, vector<1x8x4xbf16>
    %695 = vector.shape_cast %694 : vector<1x8x4xbf16> to vector<8x4xbf16>
    %696 = arith.truncf %641 : vector<16x8xf32> to vector<16x8xbf16>
    %cst_560 = arith.constant dense<0.000000e+00> : vector<16x4xf32>
    %697 = tpu.matmul %696, %695, %cst_560 {dimension_numbers = #tpu.dot_dimension_numbers<[1], [0], [0], [1], [0, 0, 1, 1], [], []>} : vector<16x8xbf16>, vector<8x4xbf16>, vector<16x4xf32> -> vector<16x4xf32>
    %c2_561 = arith.constant 2 : index
    %c0_562 = arith.constant 0 : index
    %c0_563 = arith.constant 0 : index
    %698 = vector.load %arg20[%c2_561, %c0_562, %c0_563] : memref<4x32x16xbf16, #tpu.memory_space<vmem>>, vector<1x32x16xbf16>
    %699 = vector.shape_cast %698 : vector<1x32x16xbf16> to vector<32x16xbf16>
    %700 = arith.truncf %697 : vector<16x4xf32> to vector<16x4xbf16>
    %cst_564 = arith.constant dense<0.000000e+00> : vector<32x4xf32>
    %701 = tpu.matmul %699, %700, %cst_564 {dimension_numbers = #tpu.dot_dimension_numbers<[1], [0], [0], [1], [0, 0, 1, 1], [], []>} : vector<32x16xbf16>, vector<16x4xbf16>, vector<32x4xf32> -> vector<32x4xf32>
    %702 = arith.addf %693, %701 : vector<32x4xf32>
    %c3_565 = arith.constant 3 : index
    %c0_566 = arith.constant 0 : index
    %c0_567 = arith.constant 0 : index
    %703 = vector.load %arg21[%c3_565, %c0_566, %c0_567] : memref<4x8x4xbf16, #tpu.memory_space<vmem>>, vector<1x8x4xbf16>
    %704 = vector.shape_cast %703 : vector<1x8x4xbf16> to vector<8x4xbf16>
    %705 = arith.truncf %641 : vector<16x8xf32> to vector<16x8xbf16>
    %cst_568 = arith.constant dense<0.000000e+00> : vector<16x4xf32>
    %706 = tpu.matmul %705, %704, %cst_568 {dimension_numbers = #tpu.dot_dimension_numbers<[1], [0], [0], [1], [0, 0, 1, 1], [], []>} : vector<16x8xbf16>, vector<8x4xbf16>, vector<16x4xf32> -> vector<16x4xf32>
    %c3_569 = arith.constant 3 : index
    %c0_570 = arith.constant 0 : index
    %c0_571 = arith.constant 0 : index
    %707 = vector.load %arg20[%c3_569, %c0_570, %c0_571] : memref<4x32x16xbf16, #tpu.memory_space<vmem>>, vector<1x32x16xbf16>
    %708 = vector.shape_cast %707 : vector<1x32x16xbf16> to vector<32x16xbf16>
    %709 = arith.truncf %706 : vector<16x4xf32> to vector<16x4xbf16>
    %cst_572 = arith.constant dense<0.000000e+00> : vector<32x4xf32>
    %710 = tpu.matmul %708, %709, %cst_572 {dimension_numbers = #tpu.dot_dimension_numbers<[1], [0], [0], [1], [0, 0, 1, 1], [], []>} : vector<32x16xbf16>, vector<16x4xbf16>, vector<32x4xf32> -> vector<32x4xf32>
    %711 = arith.addf %702, %710 : vector<32x4xf32>
    %cst_573 = arith.constant dense<0.000000e+00> : vector<32xf32>
    %712 = vector.multi_reduction <add>, %676, %cst_573 [1] : vector<32x4xf32> to vector<32xf32>
    %713 = vector.shape_cast %712 : vector<32xf32> to vector<32x1xf32>
    %cst_574 = arith.constant 0.000000e+00 : f32
    %714 = vector.broadcast %cst_574 : f32 to vector<32x1xf32>
    %715 = arith.addf %714, %713 : vector<32x1xf32>
    %cst_575 = arith.constant dense<0.000000e+00> : vector<32xf32>
    %716 = vector.multi_reduction <add>, %711, %cst_575 [1] : vector<32x4xf32> to vector<32xf32>
    %717 = vector.shape_cast %716 : vector<32xf32> to vector<32x1xf32>
    %718 = arith.addf %715, %717 : vector<32x1xf32>
    %cst_576 = arith.constant 8.000000e+00 : f32
    %719 = vector.broadcast %cst_576 : f32 to vector<32x1xf32>
    %720 = arith.divf %718, %719 : vector<32x1xf32>
    %721 = vector.broadcast %720 : vector<32x1xf32> to vector<32x4xf32>
    %722 = arith.subf %676, %721 : vector<32x4xf32>
    %723 = arith.mulf %722, %722 : vector<32x4xf32>
    %cst_577 = arith.constant dense<0.000000e+00> : vector<32xf32>
    %724 = vector.multi_reduction <add>, %723, %cst_577 [1] : vector<32x4xf32> to vector<32xf32>
    %725 = vector.shape_cast %724 : vector<32xf32> to vector<32x1xf32>
    %cst_578 = arith.constant 0.000000e+00 : f32
    %726 = vector.broadcast %cst_578 : f32 to vector<32x1xf32>
    %727 = arith.addf %726, %725 : vector<32x1xf32>
    %728 = vector.broadcast %720 : vector<32x1xf32> to vector<32x4xf32>
    %729 = arith.subf %711, %728 : vector<32x4xf32>
    %730 = arith.mulf %729, %729 : vector<32x4xf32>
    %cst_579 = arith.constant dense<0.000000e+00> : vector<32xf32>
    %731 = vector.multi_reduction <add>, %730, %cst_579 [1] : vector<32x4xf32> to vector<32xf32>
    %732 = vector.shape_cast %731 : vector<32xf32> to vector<32x1xf32>
    %733 = arith.addf %727, %732 : vector<32x1xf32>
    %cst_580 = arith.constant 8.000000e+00 : f32
    %734 = vector.broadcast %cst_580 : f32 to vector<32x1xf32>
    %735 = arith.divf %733, %734 : vector<32x1xf32>
    %cst_581 = arith.constant 9.99999974E-6 : f32
    %736 = vector.broadcast %cst_581 : f32 to vector<32x1xf32>
    %737 = arith.addf %735, %736 : vector<32x1xf32>
    %738 = math.rsqrt %737 : vector<32x1xf32>
    %c0_582 = arith.constant 0 : index
    %c0_583 = arith.constant 0 : index
    %739 = vector.load %arg22[%c0_582, %c0_583] : memref<32x1xf32, #tpu.memory_space<vmem>>, vector<32x1xf32>
    %c0_584 = arith.constant 0 : index
    %c0_585 = arith.constant 0 : index
    %740 = vector.load %arg23[%c0_584, %c0_585] : memref<32x1xf32, #tpu.memory_space<vmem>>, vector<32x1xf32>
    %741 = vector.broadcast %720 : vector<32x1xf32> to vector<32x4xf32>
    %742 = arith.subf %676, %741 : vector<32x4xf32>
    %743 = vector.broadcast %738 : vector<32x1xf32> to vector<32x4xf32>
    %744 = arith.mulf %742, %743 : vector<32x4xf32>
    %745 = vector.broadcast %739 : vector<32x1xf32> to vector<32x4xf32>
    %746 = arith.mulf %744, %745 : vector<32x4xf32>
    %747 = vector.broadcast %740 : vector<32x1xf32> to vector<32x4xf32>
    %748 = arith.addf %746, %747 : vector<32x4xf32>
    %749 = vector.broadcast %720 : vector<32x1xf32> to vector<32x4xf32>
    %750 = arith.subf %711, %749 : vector<32x4xf32>
    %751 = vector.broadcast %738 : vector<32x1xf32> to vector<32x4xf32>
    %752 = arith.mulf %750, %751 : vector<32x4xf32>
    %753 = vector.broadcast %739 : vector<32x1xf32> to vector<32x4xf32>
    %754 = arith.mulf %752, %753 : vector<32x4xf32>
    %755 = vector.broadcast %740 : vector<32x1xf32> to vector<32x4xf32>
    %756 = arith.addf %754, %755 : vector<32x4xf32>
    %cst_586 = arith.constant 0.000000e+00 : f32
    %757 = vector.broadcast %cst_586 : f32 to vector<32x4xf32>
    %758 = arith.cmpf oge, %748, %757 : vector<32x4xf32>
    %cst_587 = arith.constant 2.000000e-01 : f32
    %759 = vector.broadcast %cst_587 : f32 to vector<32x4xf32>
    %760 = arith.mulf %759, %748 : vector<32x4xf32>
    %761 = arith.select %758, %748, %760 : vector<32x4xi1>, vector<32x4xf32>
    %cst_588 = arith.constant 0.000000e+00 : f32
    %762 = vector.broadcast %cst_588 : f32 to vector<32x4xf32>
    %763 = arith.cmpf oge, %756, %762 : vector<32x4xf32>
    %cst_589 = arith.constant 2.000000e-01 : f32
    %764 = vector.broadcast %cst_589 : f32 to vector<32x4xf32>
    %765 = arith.mulf %764, %756 : vector<32x4xf32>
    %766 = arith.select %763, %756, %765 : vector<32x4xi1>, vector<32x4xf32>
    %c0_590 = arith.constant 0 : index
    %c0_591 = arith.constant 0 : index
    %c0_592 = arith.constant 0 : index
    %767 = vector.load %arg25[%c0_590, %c0_591, %c0_592] : memref<4x4x1xbf16, #tpu.memory_space<vmem>>, vector<1x4x1xbf16>
    %768 = vector.shape_cast %767 : vector<1x4x1xbf16> to vector<4x1xbf16>
    %769 = arith.truncf %761 : vector<32x4xf32> to vector<32x4xbf16>
    %cst_593 = arith.constant dense<0.000000e+00> : vector<32x1xf32>
    %770 = tpu.matmul %769, %768, %cst_593 {dimension_numbers = #tpu.dot_dimension_numbers<[1], [0], [0], [1], [0, 0, 1, 1], [], []>} : vector<32x4xbf16>, vector<4x1xbf16>, vector<32x1xf32> -> vector<32x1xf32>
    %c0_594 = arith.constant 0 : index
    %c0_595 = arith.constant 0 : index
    %c0_596 = arith.constant 0 : index
    %771 = vector.load %arg24[%c0_594, %c0_595, %c0_596] : memref<4x1x32xbf16, #tpu.memory_space<vmem>>, vector<1x1x32xbf16>
    %772 = vector.shape_cast %771 : vector<1x1x32xbf16> to vector<1x32xbf16>
    %773 = arith.truncf %770 : vector<32x1xf32> to vector<32x1xbf16>
    %cst_597 = arith.constant dense<0.000000e+00> : vector<1x1xf32>
    %774 = tpu.matmul %772, %773, %cst_597 {dimension_numbers = #tpu.dot_dimension_numbers<[1], [0], [0], [1], [0, 0, 1, 1], [], []>} : vector<1x32xbf16>, vector<32x1xbf16>, vector<1x1xf32> -> vector<1x1xf32>
    %c1_598 = arith.constant 1 : index
    %c0_599 = arith.constant 0 : index
    %c0_600 = arith.constant 0 : index
    %775 = vector.load %arg25[%c1_598, %c0_599, %c0_600] : memref<4x4x1xbf16, #tpu.memory_space<vmem>>, vector<1x4x1xbf16>
    %776 = vector.shape_cast %775 : vector<1x4x1xbf16> to vector<4x1xbf16>
    %777 = arith.truncf %761 : vector<32x4xf32> to vector<32x4xbf16>
    %cst_601 = arith.constant dense<0.000000e+00> : vector<32x1xf32>
    %778 = tpu.matmul %777, %776, %cst_601 {dimension_numbers = #tpu.dot_dimension_numbers<[1], [0], [0], [1], [0, 0, 1, 1], [], []>} : vector<32x4xbf16>, vector<4x1xbf16>, vector<32x1xf32> -> vector<32x1xf32>
    %c1_602 = arith.constant 1 : index
    %c0_603 = arith.constant 0 : index
    %c0_604 = arith.constant 0 : index
    %779 = vector.load %arg24[%c1_602, %c0_603, %c0_604] : memref<4x1x32xbf16, #tpu.memory_space<vmem>>, vector<1x1x32xbf16>
    %780 = vector.shape_cast %779 : vector<1x1x32xbf16> to vector<1x32xbf16>
    %781 = arith.truncf %778 : vector<32x1xf32> to vector<32x1xbf16>
    %cst_605 = arith.constant dense<0.000000e+00> : vector<1x1xf32>
    %782 = tpu.matmul %780, %781, %cst_605 {dimension_numbers = #tpu.dot_dimension_numbers<[1], [0], [0], [1], [0, 0, 1, 1], [], []>} : vector<1x32xbf16>, vector<32x1xbf16>, vector<1x1xf32> -> vector<1x1xf32>
    %783 = arith.addf %774, %782 : vector<1x1xf32>
    %c2_606 = arith.constant 2 : index
    %c0_607 = arith.constant 0 : index
    %c0_608 = arith.constant 0 : index
    %784 = vector.load %arg25[%c2_606, %c0_607, %c0_608] : memref<4x4x1xbf16, #tpu.memory_space<vmem>>, vector<1x4x1xbf16>
    %785 = vector.shape_cast %784 : vector<1x4x1xbf16> to vector<4x1xbf16>
    %786 = arith.truncf %761 : vector<32x4xf32> to vector<32x4xbf16>
    %cst_609 = arith.constant dense<0.000000e+00> : vector<32x1xf32>
    %787 = tpu.matmul %786, %785, %cst_609 {dimension_numbers = #tpu.dot_dimension_numbers<[1], [0], [0], [1], [0, 0, 1, 1], [], []>} : vector<32x4xbf16>, vector<4x1xbf16>, vector<32x1xf32> -> vector<32x1xf32>
    %c2_610 = arith.constant 2 : index
    %c0_611 = arith.constant 0 : index
    %c0_612 = arith.constant 0 : index
    %788 = vector.load %arg24[%c2_610, %c0_611, %c0_612] : memref<4x1x32xbf16, #tpu.memory_space<vmem>>, vector<1x1x32xbf16>
    %789 = vector.shape_cast %788 : vector<1x1x32xbf16> to vector<1x32xbf16>
    %790 = arith.truncf %787 : vector<32x1xf32> to vector<32x1xbf16>
    %cst_613 = arith.constant dense<0.000000e+00> : vector<1x1xf32>
    %791 = tpu.matmul %789, %790, %cst_613 {dimension_numbers = #tpu.dot_dimension_numbers<[1], [0], [0], [1], [0, 0, 1, 1], [], []>} : vector<1x32xbf16>, vector<32x1xbf16>, vector<1x1xf32> -> vector<1x1xf32>
    %792 = arith.addf %783, %791 : vector<1x1xf32>
    %c3_614 = arith.constant 3 : index
    %c0_615 = arith.constant 0 : index
    %c0_616 = arith.constant 0 : index
    %793 = vector.load %arg25[%c3_614, %c0_615, %c0_616] : memref<4x4x1xbf16, #tpu.memory_space<vmem>>, vector<1x4x1xbf16>
    %794 = vector.shape_cast %793 : vector<1x4x1xbf16> to vector<4x1xbf16>
    %795 = arith.truncf %761 : vector<32x4xf32> to vector<32x4xbf16>
    %cst_617 = arith.constant dense<0.000000e+00> : vector<32x1xf32>
    %796 = tpu.matmul %795, %794, %cst_617 {dimension_numbers = #tpu.dot_dimension_numbers<[1], [0], [0], [1], [0, 0, 1, 1], [], []>} : vector<32x4xbf16>, vector<4x1xbf16>, vector<32x1xf32> -> vector<32x1xf32>
    %c3_618 = arith.constant 3 : index
    %c0_619 = arith.constant 0 : index
    %c0_620 = arith.constant 0 : index
    %797 = vector.load %arg24[%c3_618, %c0_619, %c0_620] : memref<4x1x32xbf16, #tpu.memory_space<vmem>>, vector<1x1x32xbf16>
    %798 = vector.shape_cast %797 : vector<1x1x32xbf16> to vector<1x32xbf16>
    %799 = arith.truncf %796 : vector<32x1xf32> to vector<32x1xbf16>
    %cst_621 = arith.constant dense<0.000000e+00> : vector<1x1xf32>
    %800 = tpu.matmul %798, %799, %cst_621 {dimension_numbers = #tpu.dot_dimension_numbers<[1], [0], [0], [1], [0, 0, 1, 1], [], []>} : vector<1x32xbf16>, vector<32x1xbf16>, vector<1x1xf32> -> vector<1x1xf32>
    %801 = arith.addf %792, %800 : vector<1x1xf32>
    %c0_622 = arith.constant 0 : index
    %c0_623 = arith.constant 0 : index
    %c0_624 = arith.constant 0 : index
    %802 = vector.load %arg25[%c0_622, %c0_623, %c0_624] : memref<4x4x1xbf16, #tpu.memory_space<vmem>>, vector<1x4x1xbf16>
    %803 = vector.shape_cast %802 : vector<1x4x1xbf16> to vector<4x1xbf16>
    %804 = arith.truncf %766 : vector<32x4xf32> to vector<32x4xbf16>
    %cst_625 = arith.constant dense<0.000000e+00> : vector<32x1xf32>
    %805 = tpu.matmul %804, %803, %cst_625 {dimension_numbers = #tpu.dot_dimension_numbers<[1], [0], [0], [1], [0, 0, 1, 1], [], []>} : vector<32x4xbf16>, vector<4x1xbf16>, vector<32x1xf32> -> vector<32x1xf32>
    %c0_626 = arith.constant 0 : index
    %c0_627 = arith.constant 0 : index
    %c0_628 = arith.constant 0 : index
    %806 = vector.load %arg24[%c0_626, %c0_627, %c0_628] : memref<4x1x32xbf16, #tpu.memory_space<vmem>>, vector<1x1x32xbf16>
    %807 = vector.shape_cast %806 : vector<1x1x32xbf16> to vector<1x32xbf16>
    %808 = arith.truncf %805 : vector<32x1xf32> to vector<32x1xbf16>
    %cst_629 = arith.constant dense<0.000000e+00> : vector<1x1xf32>
    %809 = tpu.matmul %807, %808, %cst_629 {dimension_numbers = #tpu.dot_dimension_numbers<[1], [0], [0], [1], [0, 0, 1, 1], [], []>} : vector<1x32xbf16>, vector<32x1xbf16>, vector<1x1xf32> -> vector<1x1xf32>
    %c1_630 = arith.constant 1 : index
    %c0_631 = arith.constant 0 : index
    %c0_632 = arith.constant 0 : index
    %810 = vector.load %arg25[%c1_630, %c0_631, %c0_632] : memref<4x4x1xbf16, #tpu.memory_space<vmem>>, vector<1x4x1xbf16>
    %811 = vector.shape_cast %810 : vector<1x4x1xbf16> to vector<4x1xbf16>
    %812 = arith.truncf %766 : vector<32x4xf32> to vector<32x4xbf16>
    %cst_633 = arith.constant dense<0.000000e+00> : vector<32x1xf32>
    %813 = tpu.matmul %812, %811, %cst_633 {dimension_numbers = #tpu.dot_dimension_numbers<[1], [0], [0], [1], [0, 0, 1, 1], [], []>} : vector<32x4xbf16>, vector<4x1xbf16>, vector<32x1xf32> -> vector<32x1xf32>
    %c1_634 = arith.constant 1 : index
    %c0_635 = arith.constant 0 : index
    %c0_636 = arith.constant 0 : index
    %814 = vector.load %arg24[%c1_634, %c0_635, %c0_636] : memref<4x1x32xbf16, #tpu.memory_space<vmem>>, vector<1x1x32xbf16>
    %815 = vector.shape_cast %814 : vector<1x1x32xbf16> to vector<1x32xbf16>
    %816 = arith.truncf %813 : vector<32x1xf32> to vector<32x1xbf16>
    %cst_637 = arith.constant dense<0.000000e+00> : vector<1x1xf32>
    %817 = tpu.matmul %815, %816, %cst_637 {dimension_numbers = #tpu.dot_dimension_numbers<[1], [0], [0], [1], [0, 0, 1, 1], [], []>} : vector<1x32xbf16>, vector<32x1xbf16>, vector<1x1xf32> -> vector<1x1xf32>
    %818 = arith.addf %809, %817 : vector<1x1xf32>
    %c2_638 = arith.constant 2 : index
    %c0_639 = arith.constant 0 : index
    %c0_640 = arith.constant 0 : index
    %819 = vector.load %arg25[%c2_638, %c0_639, %c0_640] : memref<4x4x1xbf16, #tpu.memory_space<vmem>>, vector<1x4x1xbf16>
    %820 = vector.shape_cast %819 : vector<1x4x1xbf16> to vector<4x1xbf16>
    %821 = arith.truncf %766 : vector<32x4xf32> to vector<32x4xbf16>
    %cst_641 = arith.constant dense<0.000000e+00> : vector<32x1xf32>
    %822 = tpu.matmul %821, %820, %cst_641 {dimension_numbers = #tpu.dot_dimension_numbers<[1], [0], [0], [1], [0, 0, 1, 1], [], []>} : vector<32x4xbf16>, vector<4x1xbf16>, vector<32x1xf32> -> vector<32x1xf32>
    %c2_642 = arith.constant 2 : index
    %c0_643 = arith.constant 0 : index
    %c0_644 = arith.constant 0 : index
    %823 = vector.load %arg24[%c2_642, %c0_643, %c0_644] : memref<4x1x32xbf16, #tpu.memory_space<vmem>>, vector<1x1x32xbf16>
    %824 = vector.shape_cast %823 : vector<1x1x32xbf16> to vector<1x32xbf16>
    %825 = arith.truncf %822 : vector<32x1xf32> to vector<32x1xbf16>
    %cst_645 = arith.constant dense<0.000000e+00> : vector<1x1xf32>
    %826 = tpu.matmul %824, %825, %cst_645 {dimension_numbers = #tpu.dot_dimension_numbers<[1], [0], [0], [1], [0, 0, 1, 1], [], []>} : vector<1x32xbf16>, vector<32x1xbf16>, vector<1x1xf32> -> vector<1x1xf32>
    %827 = arith.addf %818, %826 : vector<1x1xf32>
    %c3_646 = arith.constant 3 : index
    %c0_647 = arith.constant 0 : index
    %c0_648 = arith.constant 0 : index
    %828 = vector.load %arg25[%c3_646, %c0_647, %c0_648] : memref<4x4x1xbf16, #tpu.memory_space<vmem>>, vector<1x4x1xbf16>
    %829 = vector.shape_cast %828 : vector<1x4x1xbf16> to vector<4x1xbf16>
    %830 = arith.truncf %766 : vector<32x4xf32> to vector<32x4xbf16>
    %cst_649 = arith.constant dense<0.000000e+00> : vector<32x1xf32>
    %831 = tpu.matmul %830, %829, %cst_649 {dimension_numbers = #tpu.dot_dimension_numbers<[1], [0], [0], [1], [0, 0, 1, 1], [], []>} : vector<32x4xbf16>, vector<4x1xbf16>, vector<32x1xf32> -> vector<32x1xf32>
    %c3_650 = arith.constant 3 : index
    %c0_651 = arith.constant 0 : index
    %c0_652 = arith.constant 0 : index
    %832 = vector.load %arg24[%c3_650, %c0_651, %c0_652] : memref<4x1x32xbf16, #tpu.memory_space<vmem>>, vector<1x1x32xbf16>
    %833 = vector.shape_cast %832 : vector<1x1x32xbf16> to vector<1x32xbf16>
    %834 = arith.truncf %831 : vector<32x1xf32> to vector<32x1xbf16>
    %cst_653 = arith.constant dense<0.000000e+00> : vector<1x1xf32>
    %835 = tpu.matmul %833, %834, %cst_653 {dimension_numbers = #tpu.dot_dimension_numbers<[1], [0], [0], [1], [0, 0, 1, 1], [], []>} : vector<1x32xbf16>, vector<32x1xbf16>, vector<1x1xf32> -> vector<1x1xf32>
    %836 = arith.addf %827, %835 : vector<1x1xf32>
    %cst_654 = arith.constant 0.000000e+00 : f32
    %837 = vector.broadcast %cst_654 : f32 to vector<1x1xf32>
    %838 = arith.subf %837, %801 : vector<1x1xf32>
    %839 = math.exp %838 : vector<1x1xf32>
    %cst_655 = arith.constant 1.000000e+00 : f32
    %840 = vector.broadcast %cst_655 : f32 to vector<1x1xf32>
    %841 = arith.addf %840, %839 : vector<1x1xf32>
    %cst_656 = arith.constant 1.000000e+00 : f32
    %842 = vector.broadcast %cst_656 : f32 to vector<1x1xf32>
    %843 = arith.divf %842, %841 : vector<1x1xf32>
    %cst_657 = arith.constant 0.000000e+00 : f32
    %844 = vector.broadcast %cst_657 : f32 to vector<1x1xf32>
    %845 = arith.subf %844, %836 : vector<1x1xf32>
    %846 = math.exp %845 : vector<1x1xf32>
    %cst_658 = arith.constant 1.000000e+00 : f32
    %847 = vector.broadcast %cst_658 : f32 to vector<1x1xf32>
    %848 = arith.addf %847, %846 : vector<1x1xf32>
    %cst_659 = arith.constant 1.000000e+00 : f32
    %849 = vector.broadcast %cst_659 : f32 to vector<1x1xf32>
    %850 = arith.divf %849, %848 : vector<1x1xf32>
    %c0_660 = arith.constant 0 : index
    %c0_661 = arith.constant 0 : index
    %851 = vector.load %arg26[%c0_660, %c0_661] : memref<2x1xf32, #tpu.memory_space<vmem>>, vector<1x1xf32>
    tpu.vector_store %arg26[%c0_660, %c0_661], %843 {strides = array<i32>} : memref<2x1xf32, #tpu.memory_space<vmem>>, vector<1x1xf32>,
    %c1_662 = arith.constant 1 : index
    %c0_663 = arith.constant 0 : index
    %852 = vector.load %arg26[%c1_662, %c0_663] : memref<2x1xf32, #tpu.memory_space<vmem>>, vector<1x1xf32>
    tpu.vector_store %arg26[%c1_662, %c0_663], %850 {strides = array<i32>} : memref<2x1xf32, #tpu.memory_space<vmem>>, vector<1x1xf32>,
    return
  }
}

</mosaic_0001>

<bundles_post_ra>
// kernel: forward.1
= control target key start
LH: loop header
LB: loop body
LE: loop exit
PB: predicated region body
PF: predicated region fallthrough
CT: control target
= control target key end

     0   :  { %v9589_v0 = vmov 0.0   ;;  %vm9590_vm0 = vmmov 0   ;;  %vm96_vm1 = vcmask 130048   ;;  %vm194_vm2 = vcmask 1041408   ;;  %s10909_s0 = inlined_call_operand.vmem [shape: f32[2,16,4], index: 0, kind: input, shape index: {}]   ;;  %s10910_s3 = inlined_call_operand.vmem [shape: bf16[4,8,16], index: 3, kind: input, shape index: {}]   ;;  %s10911_s2 = inlined_call_operand.vmem [shape: bf16[4,4,16], index: 2, kind: input, shape index: {}]   ;;  %s10912_s5 = inlined_call_operand.vmem [shape: bf16[4,4,8], index: 5, kind: input, shape index: {}]   ;;  %s10913_s4 = inlined_call_operand.vmem [shape: bf16[4,16,32], index: 4, kind: input, shape index: {}]   ;;  %s10914_s6 = inlined_call_operand.vmem [shape: f32[1,32], index: 6, kind: input, shape index: {}]   ;;  %s10915_s7 = inlined_call_operand.vmem [shape: f32[1,32], index: 7, kind: input, shape index: {}]   ;;  %s10916_s9 = inlined_call_operand.vmem [shape: bf16[4,1,4], index: 9, kind: input, shape index: {}]   ;;  %s10917_s1 = inlined_call_operand.vmem [shape: f32[2,16,4], index: 1, kind: input, shape index: {}]   ;;  %s10918_s11 = inlined_call_operand.vmem [shape: bf16[4,8,16], index: 11, kind: input, shape index: {}]   ;;  %s10919_s8 = inlined_call_operand.vmem [shape: bf16[4,32,8], index: 8, kind: input, shape index: {}]   ;;  %s10920_s10 = inlined_call_operand.vmem [shape: bf16[4,4,16], index: 10, kind: input, shape index: {}]   ;;  %s10921_s13 = inlined_call_operand.vmem [shape: bf16[4,4,8], index: 13, kind: input, shape index: {}]   ;;  %s10922_s12 = inlined_call_operand.vmem [shape: bf16[4,16,32], index: 12, kind: input, shape index: {}]   ;;  %s10923_s14 = inlined_call_operand.vmem [shape: f32[1,32], index: 14, kind: input, shape index: {}]   ;;  %s10924_s15 = inlined_call_operand.vmem [shape: f32[1,32], index: 15, kind: input, shape index: {}]   ;;  %s10925_s17 = inlined_call_operand.vmem [shape: bf16[4,1,4], index: 17, kind: input, shape index: {}]   ;;  %s10926_s16 = inlined_call_operand.vmem [shape: bf16[4,32,8], index: 16, kind: input, shape index: {}]   ;;  %s10927_s19 = inlined_call_operand.vmem [shape: bf16[4,16,8], index: 19, kind: input, shape index: {}]   ;;  %s10928_s18 = inlined_call_operand.vmem [shape: bf16[4,16,1], index: 18, kind: input, shape index: {}]   ;;  %s10929_s21 = inlined_call_operand.vmem [shape: bf16[4,8,4], index: 21, kind: input, shape index: {}]   ;;  %s10930_s20 = inlined_call_operand.vmem [shape: bf16[4,32,16], index: 20, kind: input, shape index: {}]   ;;  %s10931_s22 = inlined_call_operand.vmem [shape: f32[32,1], index: 22, kind: input, shape index: {}]   ;;  %s10932_s23 = inlined_call_operand.vmem [shape: f32[32,1], index: 23, kind: input, shape index: {}]   ;;  %s10933_s25 = inlined_call_operand.vmem [shape: bf16[4,4,1], index: 25, kind: input, shape index: {}]   ;;  %s10934_s24 = inlined_call_operand.vmem [shape: bf16[4,1,32], index: 24, kind: input, shape index: {}]   ;;  %s10935_s26 = inlined_call_operand.vmem [shape: f32[2,1], index: 26, kind: output, shape index: {}]  }
   0x1   :  { %10945 = sst [smem:[#allocation2_spill]] %s10909_s0  ;;  %8312 = vmatprep.subr.bf16.mxu1 %v9589_v0  ;;  %8314 = vmatprep.mubr.msk.bf16.mxu1 %vm9590_vm0, %v9589_v0  ;;  %vm190_vm3 = vcmask 31744   ;;  %vm825_vm5 = vcmask 1043456   ;;  %vm821_vm6 = vcmask 64512   ;;  %vm1559_vm8 = vcmask 257024  }
   0x2   :  { %10946 = sst [smem:[#allocation3_spill]] %s10910_s3  ;;  %8324 = vmatprep.subr.bf16.mxu0 %v9589_v0  ;;  %8326 = vmatprep.mubr.msk.bf16.mxu0 %vm9590_vm0, %v9589_v0  ;;  %vm1743_vm11 = vcmask 261120  }
   0x3   :  { %10947 = sst [smem:[#allocation4_spill]] %s10911_s2  ;;  %s10957_s0 = sld [smem:[#allocation3_spill]] }
   0x4   :  { %10948 = sst [smem:[#allocation5_spill]] %s10912_s5 }
   0x5   :  { %10949 = sst [smem:[#allocation6_spill]] %s10913_s4  ;;  %s10958_s4 = sld [smem:[#allocation4_spill]] }
   0x6   :  { %10950 = sst [smem:[#allocation7_spill]] %s10914_s6  ;;  %s10959_s3 = sld [smem:[#allocation5_spill]] }
   0x7   :  { %10951 = sst [smem:[#allocation8_spill]] %s10915_s7  ;;  %s10961_s28 = sld [smem:[#allocation7_spill]] }
   0x8   :  { %10952 = sst [smem:[#allocation9_spill]] %s10916_s9  ;;  %s10956_s9 = sld [smem:[#allocation2_spill]] }
   0x9   :  { %10953 = sst [smem:[#allocation10_spill]] %s10917_s1  ;;  %v95_v4 = vld [vmem:[%s10957_s0] sm:$0xf]  ;;  %v7668_v5 = vld [vmem:[%s10957_s0 + $0x4] sm:$0xf] }
   0xa   :  { %10954 = sst [smem:[#allocation11_spill]] %s10918_s11  ;;  %v7673_v6 = vld [vmem:[%s10957_s0 + $0x8] sm:$0xf]  ;;  %v7677_v9 = vld [vmem:[%s10957_s0 + $0xc] sm:$0xf]  ;;  %s10960_s11 = sld [smem:[#allocation6_spill]] }
   0xb   :  { %10955 = sst [smem:[#allocation12_spill]] %s10919_s8  ;;  %v7670_v11 = vld [vmem:[%s10958_s4 + $0x2] sm:$0x3]  ;;  %v141_v17 = vld [vmem:[%s10958_s4] sm:$0x3]  ;;  %s10965_s0 = sld [smem:[#allocation11_spill]] }
   0xc   :  { %v196_v12 = vsel %vm194_vm2, %v7670_v11, 0  ;;  %v242_v21 = vsel %vm194_vm2, %v141_v17, 0  ;;  %v7675_v27 = vld [vmem:[%s10958_s4 + $0x4] sm:$0x3]  ;;  %v7679_v35 = vld [vmem:[%s10958_s4 + $0x6] sm:$0x3] }
   0xd   :  { %8325 = vmatpush3.bf16.msra.mxu0 %v196_v12  ;;  %v336_v30 = vsel %vm194_vm2, %v7675_v27, 0  ;;  %v431_v38 = vsel %vm194_vm2, %v7679_v35, 0  ;;  %s10962_s4 = sld [smem:[#allocation8_spill]]  ;;  %s10966_s29 = sld [smem:[#allocation12_spill]] }
   0xe   :  { %v84_v1 = vld [vmem:[%s10956_s9] sm:$0xff]  ;;  %v85_v2 = vld [vmem:[%s10956_s9 + $0x8] sm:$0xff]  ;;  %v7663_v7 = vld [vmem:[%s10956_s9 + $0x10] sm:$0xff]  ;;  %8330 = vmatprep.subr.bf16.mxu0 %v9589_v0 }
   0xf   :  { %v94_v3 = vpack.c.bf16 %v85_v2, %v84_v1  ;;  %v7664_v8 = vld [vmem:[%s10956_s9 + $0x18] sm:$0xff] }
  0x10   :  { %v474_v10 = vpack.c.bf16 %v7664_v8, %v7663_v7  ;;  %v7704_v7 = vld [vmem:[%s10959_s3 + $0x6] sm:$0x3] }
  0x11   :  { %8313 = vmatpush3.bf16.msra.mxu1 %v94_v3 }
  0x12   :  { %8318 = vmatprep.subr.bf16.mxu1 %v9589_v0 }
  0x14   :  { %8315 = vmatmul.mubr.msk.bf16.vlgmr.msra.gmra.mrb[0].mxu1 %vm96_vm1, %v95_v4 }
  0x15   :  { %8319 = vmatpush3.bf16.msra.mxu1 %v94_v3  ;;  %8320 = vmatprep.mubr.msk.bf16.mxu1 %vm9590_vm0, %v9589_v0 }
  0x16   :  { %8336 = vmatprep.subr.bf16.mxu1 %v9589_v0 }
  0x1c   :  { %8321 = vmatmul.mubr.msk.bf16.vlgmr.msra.gmra.mrb[4].mxu1 %vm96_vm1, %v7668_v5 }
  0x1d   :  { %8337 = vmatpush3.bf16.msra.mxu1 %v94_v3  ;;  %8338 = vmatprep.mubr.msk.bf16.mxu1 %vm9590_vm0, %v9589_v0 }
  0x1e   :  { %8348 = vmatprep.subr.bf16.mxu1 %v9589_v0 }
  0x24   :  { %8339 = vmatmul.mubr.msk.bf16.vlgmr.msra.gmra.mrb[8].mxu1 %vm96_vm1, %v7673_v6 }
  0x25   :  { %8349 = vmatpush3.bf16.msra.mxu1 %v94_v3  ;;  %8350 = vmatprep.mubr.msk.bf16.mxu1 %vm9590_vm0, %v9589_v0 }
  0x26   :  { %8360 = vmatprep.subr.bf16.mxu1 %v9589_v0 }
  0x2c   :  { %8351 = vmatmul.mubr.msk.bf16.vlgmr.msra.gmra.mrb[12].mxu1 %vm96_vm1, %v7677_v9 }
  0x2d   :  { %8361 = vmatpush3.bf16.msra.mxu1 %v474_v10  ;;  %8362 = vmatprep.mubr.msk.bf16.mxu1 %vm9590_vm0, %v9589_v0 }
  0x2e   :  { %8366 = vmatprep.subr.bf16.mxu1 %v9589_v0 }
  0x34   :  { %8363 = vmatmul.mubr.msk.bf16.vlgmr.msra.gmra.mrb[16].mxu1 %vm96_vm1, %v95_v4  ;;  %v820_v4 = vld [vmem:[%s10959_s3] sm:$0x3] }
  0x35   :  { %8367 = vmatpush3.bf16.msra.mxu1 %v474_v10  ;;  %8368 = vmatprep.mubr.msk.bf16.mxu1 %vm9590_vm0, %v9589_v0 }
  0x36   :  { %8384 = vmatprep.subr.bf16.mxu1 %v9589_v0 }
  0x3c   :  { %8369 = vmatmul.mubr.msk.bf16.vlgmr.msra.gmra.mrb[20].mxu1 %vm96_vm1, %v7668_v5  ;;  %v7690_v5 = vld [vmem:[%s10959_s3 + $0x2] sm:$0x3] }
  0x3d   :  { %8385 = vmatpush3.bf16.msra.mxu1 %v474_v10  ;;  %8386 = vmatprep.mubr.msk.bf16.mxu1 %vm9590_vm0, %v9589_v0 }
  0x3e   :  { %8396 = vmatprep.subr.bf16.mxu1 %v9589_v0 }
  0x44   :  { %8387 = vmatmul.mubr.msk.bf16.vlgmr.msra.gmra.mrb[24].mxu1 %vm96_vm1, %v7673_v6  ;;  %v7698_v6 = vld [vmem:[%s10959_s3 + $0x4] sm:$0x3] }
  0x45   :  { %8397 = vmatpush3.bf16.msra.mxu1 %v474_v10  ;;  %8398 = vmatprep.mubr.msk.bf16.mxu1 %vm9590_vm0, %v9589_v0 }
  0x46   :  { %8408 = vmatprep.subr.bf16.mxu1 %v9589_v0 }
  0x4c   :  { %8399 = vmatmul.mubr.msk.bf16.vlgmr.msra.gmra.mrb[28].mxu1 %vm96_vm1, %v7677_v9 }
  0x4d   :  { %8410 = vmatprep.mubr.msk.bf16.mxu1 %vm9590_vm0, %v9589_v0 }
  0xe7   :  { %v134_v13 = vpop.f32.mrb[0].mxu1 }
  0xe8   :  { %v8316_v14 = vpop.f32.mrb[1].mxu1  ;;  %v140_v29 = vpack.c.bf16 %v134_v13, %v134_v13 }
  0xe9   :  { %v137_v15 = vpop.f32.mrb[2].mxu1 }
  0xea   :  { %v8317_v16 = vpop.f32.mrb[3].mxu1 }
  0xeb   :  { %v9533_v16 = vld [vmem:[%s10960_s11 + $0x8] sm:$0xff]  }
  0xef   :  { %v181_v18 = vpop.f32.mrb[4].mxu1 }
  0xf0   :  { %v187_v19 = vpack.c.bf16 %v181_v18, %v181_v18  ;;  %v8322_v20 = vpop.f32.mrb[5].mxu1 }
  0xf1   :  { %v184_v22 = vpop.f32.mrb[6].mxu1 }
  0xf2   :  { %v8323_v23 = vpop.f32.mrb[7].mxu1  ;;  %8327 = vmatmul.mubr.msk.bf16.vlgmr.msra.gmra.mrb[0].mxu0 %vm190_vm3, %v187_v19  ;;  %v9534_v22 = vld [vmem:[%s10960_s11] sm:$0xff]  }
  0xf3   :  { %8331 = vmatpush3.bf16.msra.mxu0 %v242_v21  ;;  %8332 = vmatprep.mubr.msk.bf16.mxu0 %vm9590_vm0, %v9589_v0 }
  0xf4   :  { %8342 = vmatprep.subr.bf16.mxu0 %v9589_v0 }
  0xf7   :  { %v323_v24 = vpop.f32.mrb[8].mxu1 }
  0xf8   :  { %v8340_v25 = vpop.f32.mrb[9].mxu1  ;;  %v329_v37 = vpack.c.bf16 %v323_v24, %v323_v24 }
  0xf9   :  { %v326_v26 = vpop.f32.mrb[10].mxu1 }
  0xfa   :  { %v8341_v28 = vpop.f32.mrb[11].mxu1 }
  0xfe   :  { %8333 = vmatmul.mubr.msk.bf16.vlgmr.msra.gmra.mrb[0].mxu0 %vm190_vm3, %v140_v29 }
  0xff   :  { %8343 = vmatpush3.bf16.msra.mxu0 %v336_v30  ;;  %v418_v31 = vpop.f32.mrb[12].mxu1  ;;  %8344 = vmatprep.mubr.msk.bf16.mxu0 %vm9590_vm0, %v9589_v0 }
 0x100   :  { %v8352_v32 = vpop.f32.mrb[13].mxu1  ;;  %8354 = vmatprep.subr.bf16.mxu0 %v9589_v0  ;;  %v424_v46 = vpack.c.bf16 %v418_v31, %v418_v31  ;;  %v9535_v31 = vld [vmem:[%s10960_s11 + $0x10] sm:$0xff]  }
 0x101   :  { %v421_v33 = vpop.f32.mrb[14].mxu1 }
 0x102   :  { %v8353_v34 = vpop.f32.mrb[15].mxu1 }
 0x107   :  { %v509_v36 = vpop.f32.mrb[16].mxu1 }
 0x108   :  { %v8364_v39 = vpop.f32.mrb[17].mxu1  ;;  %v515_v56 = vpack.c.bf16 %v509_v36, %v509_v36 }
 0x109   :  { %v512_v40 = vpop.f32.mrb[18].mxu1 }
 0x10a   :  { %8345 = vmatmul.mubr.msk.bf16.vlgmr.msra.gmra.mrb[0].mxu0 %vm190_vm3, %v329_v37  ;;  %v8365_v41 = vpop.f32.mrb[19].mxu1  ;;  %v9536_v37 = vld [vmem:[%s10960_s11 + $0x18] sm:$0xff]   ;;  %s10963_s11 = sld [smem:[#allocation9_spill]] }
 0x10b   :  { %8355 = vmatpush3.bf16.msra.mxu0 %v431_v38  ;;  %8356 = vmatprep.mubr.msk.bf16.mxu0 %vm9590_vm0, %v9589_v0 }
 0x10c   :  { %8372 = vmatprep.subr.bf16.mxu0 %v9589_v0 }
 0x10f   :  { %v550_v42 = vpop.f32.mrb[20].mxu1 }
 0x110   :  { %v8370_v43 = vpop.f32.mrb[21].mxu1  ;;  %v556_v50 = vpack.c.bf16 %v550_v42, %v550_v42 }
 0x111   :  { %v553_v44 = vpop.f32.mrb[22].mxu1 }
 0x112   :  { %v8371_v45 = vpop.f32.mrb[23].mxu1 }
 0x116   :  { %8357 = vmatmul.mubr.msk.bf16.vlgmr.msra.gmra.mrb[0].mxu0 %vm190_vm3, %v424_v46 }
 0x117   :  { %8373 = vmatpush3.bf16.msra.mxu0 %v196_v12  ;;  %8374 = vmatprep.mubr.msk.bf16.mxu0 %vm9590_vm0, %v9589_v0  ;;  %v677_v47 = vpop.f32.mrb[24].mxu1 }
 0x118   :  { %8378 = vmatprep.subr.bf16.mxu0 %v9589_v0  ;;  %v8388_v48 = vpop.f32.mrb[25].mxu1  ;;  %v683_v57 = vpack.c.bf16 %v677_v47, %v677_v47 }
 0x119   :  { %v680_v49 = vpop.f32.mrb[26].mxu1 }
 0x11a   :  { %v8389_v51 = vpop.f32.mrb[27].mxu1 }
 0x11e   :  { %8375 = vmatmul.mubr.msk.bf16.vlgmr.msra.gmra.mrb[4].mxu0 %vm190_vm3, %v556_v50 }
 0x11f   :  { %8379 = vmatpush3.bf16.msra.mxu0 %v242_v21  ;;  %8380 = vmatprep.mubr.msk.bf16.mxu0 %vm9590_vm0, %v9589_v0  ;;  %v762_v52 = vpop.f32.mrb[28].mxu1 }
 0x120   :  { %8390 = vmatprep.subr.bf16.mxu0 %v9589_v0  ;;  %v8400_v53 = vpop.f32.mrb[29].mxu1  ;;  %v768_v58 = vpack.c.bf16 %v762_v52, %v762_v52 }
 0x121   :  { %v765_v54 = vpop.f32.mrb[30].mxu1 }
 0x122   :  { %v8401_v55 = vpop.f32.mrb[31].mxu1 }
 0x12a   :  { %8381 = vmatmul.mubr.msk.bf16.vlgmr.msra.gmra.mrb[4].mxu0 %vm190_vm3, %v515_v56 }
 0x12b   :  { %8391 = vmatpush3.bf16.msra.mxu0 %v336_v30  ;;  %8392 = vmatprep.mubr.msk.bf16.mxu0 %vm9590_vm0, %v9589_v0 }
 0x12c   :  { %8402 = vmatprep.subr.bf16.mxu0 %v9589_v0 }
 0x136   :  { %8393 = vmatmul.mubr.msk.bf16.vlgmr.msra.gmra.mrb[4].mxu0 %vm190_vm3, %v683_v57 }
 0x137   :  { %8403 = vmatpush3.bf16.msra.mxu0 %v431_v38  ;;  %8404 = vmatprep.mubr.msk.bf16.mxu0 %vm9590_vm0, %v9589_v0 }
 0x138   :  { %8420 = vmatprep.subr.bf16.mxu0 %v9589_v0 }
 0x142   :  { %8405 = vmatmul.mubr.msk.bf16.vlgmr.msra.gmra.mrb[4].mxu0 %vm190_vm3, %v768_v58 }
 0x143   :  { %8422 = vmatprep.mubr.msk.bf16.mxu0 %vm9590_vm0, %v9589_v0  ;;  %8421 = vmatpush3.bf16.msra.mxu0 %v9533_v16 }
 0x144   :  { %8426 = vmatprep.subr.bf16.mxu0 %v9589_v0 }
 0x1e9   :  { %v467_v59 = vpop.f32.mrb[0].mxu0 }
 0x1ea   :  { %vm813_vm4 = vcmp.ge.f32.partialorder %v467_v59, 0.0  ;;  %v814_v60 = vmul.f32 0.2, %v467_v59  ;;  %v8358_v61 = vpop.f32.mrb[1].mxu0 }
 0x1eb   :  { %v470_v62 = vpop.f32.mrb[2].mxu0 }
 0x1ec   :  { %v815_v63 = vsel %vm813_vm4, %v467_v59, %v814_v60  ;;  %v8359_v1 = vpop.f32.mrb[3].mxu0  ;;  %vm4895_vm4 = vcmask 1040384  }
 0x1ed   :  { %v819_v2 = vpack.c.bf16 %v815_v63, %v815_v63 }
 0x1ef   :  { %v827_v3 = vsel %vm825_vm5, %v819_v2, 0 }
 0x1f0   :  { %8409 = vmatpush3.bf16.msra.mxu1 %v827_v3 }
 0x1f1   :  { %8414 = vmatprep.subr.bf16.mxu1 %v9589_v0 }
 0x1f3   :  { %8411 = vmatmul.mubr.msk.bf16.vlgmr.msra.gmra.mrb[32].mxu1 %vm821_vm6, %v820_v4 }
 0x1f4   :  { %8415 = vmatpush3.bf16.msra.mxu1 %v827_v3  ;;  %8416 = vmatprep.mubr.msk.bf16.mxu1 %vm9590_vm0, %v9589_v0 }
 0x1f5   :  { %8432 = vmatprep.subr.bf16.mxu1 %v9589_v0 }
 0x1fb   :  { %8417 = vmatmul.mubr.msk.bf16.vlgmr.msra.gmra.mrb[36].mxu1 %vm821_vm6, %v7690_v5 }
 0x1fc   :  { %8433 = vmatpush3.bf16.msra.mxu1 %v827_v3  ;;  %8434 = vmatprep.mubr.msk.bf16.mxu1 %vm9590_vm0, %v9589_v0 }
 0x1fd   :  { %8444 = vmatprep.subr.bf16.mxu1 %v9589_v0 }
 0x203   :  { %8435 = vmatmul.mubr.msk.bf16.vlgmr.msra.gmra.mrb[40].mxu1 %vm821_vm6, %v7698_v6 }
 0x204   :  { %8445 = vmatpush3.bf16.msra.mxu1 %v827_v3  ;;  %8446 = vmatprep.mubr.msk.bf16.mxu1 %vm9590_vm0, %v9589_v0 }
 0x205   :  { %8456 = vmatprep.subr.bf16.mxu1 %v9589_v0 }
 0x20b   :  { %8447 = vmatmul.mubr.msk.bf16.vlgmr.msra.gmra.mrb[44].mxu1 %vm821_vm6, %v7704_v7 }
 0x20c   :  { %8458 = vmatprep.mubr.msk.bf16.mxu1 %vm9590_vm0, %v9589_v0 }
 0x215   :  { %v806_v8 = vpop.f32.mrb[4].mxu0 }
 0x216   :  { %vm816_vm7 = vcmp.ge.f32.partialorder %v806_v8, 0.0  ;;  %v817_v9 = vmul.f32 0.2, %v806_v8  ;;  %v8406_v10 = vpop.f32.mrb[5].mxu0 }
 0x217   :  { %v809_v11 = vpop.f32.mrb[6].mxu0 }
 0x218   :  { %v818_v12 = vsel %vm816_vm7, %v806_v8, %v817_v9  ;;  %v8407_v13 = vpop.f32.mrb[7].mxu0  ;;  %vm4891_vm7 = vcmask 7168  }
 0x219   :  { %v1217_v14 = vpack.c.bf16 %v818_v12, %v818_v12 }
 0x21b   :  { %v1219_v15 = vsel %vm825_vm5, %v1217_v14, 0 }
 0x21c   :  { %8457 = vmatpush3.bf16.msra.mxu1 %v1219_v15 }
 0x21d   :  { %8462 = vmatprep.subr.bf16.mxu1 %v9589_v0 }
 0x21f   :  { %8459 = vmatmul.mubr.msk.bf16.vlgmr.msra.gmra.mrb[48].mxu1 %vm821_vm6, %v820_v4 }
 0x220   :  { %8463 = vmatpush3.bf16.msra.mxu1 %v1219_v15  ;;  %8464 = vmatprep.mubr.msk.bf16.mxu1 %vm9590_vm0, %v9589_v0 }
 0x221   :  { %8480 = vmatprep.subr.bf16.mxu1 %v9589_v0 }
 0x227   :  { %8465 = vmatmul.mubr.msk.bf16.vlgmr.msra.gmra.mrb[52].mxu1 %vm821_vm6, %v7690_v5 }
 0x228   :  { %8481 = vmatpush3.bf16.msra.mxu1 %v1219_v15  ;;  %8482 = vmatprep.mubr.msk.bf16.mxu1 %vm9590_vm0, %v9589_v0 }
 0x229   :  { %8492 = vmatprep.subr.bf16.mxu1 %v9589_v0 }
 0x22f   :  { %8483 = vmatmul.mubr.msk.bf16.vlgmr.msra.gmra.mrb[56].mxu1 %vm821_vm6, %v7698_v6 }
 0x230   :  { %8493 = vmatpush3.bf16.msra.mxu1 %v1219_v15  ;;  %8494 = vmatprep.mubr.msk.bf16.mxu1 %vm9590_vm0, %v9589_v0 }
 0x231   :  { %8504 = vmatprep.subr.bf16.mxu1 %v9589_v0 }
 0x237   :  { %8495 = vmatmul.mubr.msk.bf16.vlgmr.msra.gmra.mrb[60].mxu1 %vm821_vm6, %v7704_v7 }
 0x238   :  { %8506 = vmatprep.mubr.msk.bf16.mxu1 %vm9590_vm0, %v9589_v0 }
 0x2c6   :  { %v863_v17 = vpop.f32.mrb[32].mxu1 }
 0x2c7   :  { %v8412_v18 = vpop.f32.mrb[33].mxu1  ;;  %v869_v32 = vpack.c.bf16 %v863_v17, %v863_v17 }
 0x2c8   :  { %v866_v19 = vpop.f32.mrb[34].mxu1 }
 0x2c9   :  { %v8413_v20 = vpop.f32.mrb[35].mxu1 }
 0x2ce   :  { %v911_v21 = vpop.f32.mrb[36].mxu1 }
 0x2cf   :  { %v917_v23 = vpack.c.bf16 %v911_v21, %v911_v21  ;;  %v8418_v24 = vpop.f32.mrb[37].mxu1 }
 0x2d0   :  { %v914_v25 = vpop.f32.mrb[38].mxu1 }
 0x2d1   :  { %v8419_v26 = vpop.f32.mrb[39].mxu1  ;;  %8423 = vmatmul.mubr.msk.bf16.vlgmr.msra.gmra.mrb[8].mxu0 %vm96_vm1, %v917_v23 }
 0x2d2   :  { %8427 = vmatpush3.bf16.msra.mxu0 %v9534_v22  ;;  %8428 = vmatprep.mubr.msk.bf16.mxu0 %vm9590_vm0, %v9589_v0 }
 0x2d3   :  { %8438 = vmatprep.subr.bf16.mxu0 %v9589_v0 }
 0x2d6   :  { %v1058_v27 = vpop.f32.mrb[40].mxu1 }
 0x2d7   :  { %v8436_v28 = vpop.f32.mrb[41].mxu1  ;;  %v1064_v38 = vpack.c.bf16 %v1058_v27, %v1058_v27 }
 0x2d8   :  { %v1061_v29 = vpop.f32.mrb[42].mxu1 }
 0x2d9   :  { %v8437_v30 = vpop.f32.mrb[43].mxu1 }
 0x2dd   :  { %8429 = vmatmul.mubr.msk.bf16.vlgmr.msra.gmra.mrb[8].mxu0 %vm96_vm1, %v869_v32 }
 0x2de   :  { %8439 = vmatpush3.bf16.msra.mxu0 %v9535_v31  ;;  %v1157_v33 = vpop.f32.mrb[44].mxu1  ;;  %8440 = vmatprep.mubr.msk.bf16.mxu0 %vm9590_vm0, %v9589_v0 }
 0x2df   :  { %v8448_v34 = vpop.f32.mrb[45].mxu1  ;;  %8450 = vmatprep.subr.bf16.mxu0 %v9589_v0  ;;  %v1163_v40 = vpack.c.bf16 %v1157_v33, %v1157_v33 }
 0x2e0   :  { %v1160_v35 = vpop.f32.mrb[46].mxu1 }
 0x2e1   :  { %v8449_v36 = vpop.f32.mrb[47].mxu1 }
 0x2e9   :  { %8441 = vmatmul.mubr.msk.bf16.vlgmr.msra.gmra.mrb[8].mxu0 %vm96_vm1, %v1064_v38 }
 0x2ea   :  { %8451 = vmatpush3.bf16.msra.mxu0 %v9536_v37  ;;  %8452 = vmatprep.mubr.msk.bf16.mxu0 %vm9590_vm0, %v9589_v0 }
 0x2eb   :  { %8468 = vmatprep.subr.bf16.mxu0 %v9589_v0 }
 0x2f2   :  { %v1255_v39 = vpop.f32.mrb[48].mxu1 }
 0x2f3   :  { %v8460_v41 = vpop.f32.mrb[49].mxu1  ;;  %v1261_v53 = vpack.c.bf16 %v1255_v39, %v1255_v39 }
 0x2f4   :  { %v1258_v42 = vpop.f32.mrb[50].mxu1 }
 0x2f5   :  { %8453 = vmatmul.mubr.msk.bf16.vlgmr.msra.gmra.mrb[8].mxu0 %vm96_vm1, %v1163_v40  ;;  %v8461_v43 = vpop.f32.mrb[51].mxu1 }
 0x2f6   :  { %8469 = vmatpush3.bf16.msra.mxu0 %v9533_v16  ;;  %8470 = vmatprep.mubr.msk.bf16.mxu0 %vm9590_vm0, %v9589_v0  ;;  %v7718_v43 = vld [vmem:[%s10961_s28] ss:$0 sm:$0xff]  ;;  %s10964_s28 = sld [smem:[#allocation10_spill]] }
 0x2f7   :  { %8474 = vmatprep.subr.bf16.mxu0 %v9589_v0 }
 0x2fa   :  { %v1296_v44 = vpop.f32.mrb[52].mxu1 }
 0x2fb   :  { %v1302_v45 = vpack.c.bf16 %v1296_v44, %v1296_v44  ;;  %v8466_v46 = vpop.f32.mrb[53].mxu1 }
 0x2fc   :  { %v1299_v47 = vpop.f32.mrb[54].mxu1  ;;  %v7719_v46 = vld [vmem:[%s10962_s4] ss:$0 sm:$0xff] }
 0x2fd   :  { %v8467_v48 = vpop.f32.mrb[55].mxu1  ;;  %8471 = vmatmul.mubr.msk.bf16.vlgmr.msra.gmra.mrb[12].mxu0 %vm96_vm1, %v1302_v45 }
 0x2fe   :  { %8475 = vmatpush3.bf16.msra.mxu0 %v9534_v22  ;;  %8476 = vmatprep.mubr.msk.bf16.mxu0 %vm9590_vm0, %v9589_v0 }
 0x2ff   :  { %8486 = vmatprep.subr.bf16.mxu0 %v9589_v0 }
 0x302   :  { %v1423_v49 = vpop.f32.mrb[56].mxu1 }
 0x303   :  { %v8484_v50 = vpop.f32.mrb[57].mxu1  ;;  %v1429_v58 = vpack.c.bf16 %v1423_v49, %v1423_v49 }
 0x304   :  { %v1426_v51 = vpop.f32.mrb[58].mxu1 }
 0x305   :  { %v8485_v52 = vpop.f32.mrb[59].mxu1 }
 0x309   :  { %8477 = vmatmul.mubr.msk.bf16.vlgmr.msra.gmra.mrb[12].mxu0 %vm96_vm1, %v1261_v53  ;;  %v1628_v53 = vld [vmem:[%s10963_s11] sm:$0x1] }
 0x30a   :  { %8487 = vmatpush3.bf16.msra.mxu0 %v9535_v31  ;;  %8488 = vmatprep.mubr.msk.bf16.mxu0 %vm9590_vm0, %v9589_v0  ;;  %v1508_v54 = vpop.f32.mrb[60].mxu1 }
 0x30b   :  { %8498 = vmatprep.subr.bf16.mxu0 %v9589_v0  ;;  %v8496_v55 = vpop.f32.mrb[61].mxu1  ;;  %v1514_v59 = vpack.c.bf16 %v1508_v54, %v1508_v54 }
 0x30c   :  { %v1511_v56 = vpop.f32.mrb[62].mxu1  ;;  %v7721_v55 = vld [vmem:[%s10963_s11 + $0x1] sm:$0x1] }
 0x30d   :  { %v8497_v57 = vpop.f32.mrb[63].mxu1 }
 0x30e   :  { %v7733_v57 = vld [vmem:[%s10963_s11 + $0x2] sm:$0x1] }
 0x315   :  { %8489 = vmatmul.mubr.msk.bf16.vlgmr.msra.gmra.mrb[12].mxu0 %vm96_vm1, %v1429_v58 }
 0x316   :  { %8499 = vmatpush3.bf16.msra.mxu0 %v9536_v37  ;;  %8500 = vmatprep.mubr.msk.bf16.mxu0 %vm9590_vm0, %v9589_v0 }
 0x317   :  { %8516 = vmatprep.subr.bf16.mxu0 %v9589_v0 }
 0x321   :  { %8501 = vmatmul.mubr.msk.bf16.vlgmr.msra.gmra.mrb[12].mxu0 %vm96_vm1, %v1514_v59 }
 0x322   :  { %8520 = vmatprep.mubr.msk.bf16.mxu0 %vm9590_vm0, %v9589_v0 }
 0x3c8   :  { %v1210_v60 = vpop.f32.mrb[8].mxu0 }
 0x3c9   :  { %v8454_v61 = vpop.f32.mrb[9].mxu0  ;;  %v1560_v1 = vsel %vm1559_vm8, %v1210_v60, 0.0 }
 0x3ca   :  { %v1213_v62 = vpop.f32.mrb[10].mxu0  ;;  %v1561_v2 = vrot.slane %v1560_v1, 4  ;;  %v7742_v61 = vld [vmem:[%s10963_s11 + $0x3] sm:$0x1] }
 0x3cb   :  { %v8455_v63 = vpop.f32.mrb[11].mxu0 }
 0x3cc   :  { %v1562_v3 = vadd.f32 %v1561_v2, %v1560_v1  ;;  %v89_v63 = vld [vmem:[%s10964_s28] sm:$0xff]  ;;  %v90_v1 = vld [vmem:[%s10964_s28 + $0x8] sm:$0xff] }
 0x3cd   :  { %v2398_v2 = vpack.c.bf16 %v90_v1, %v89_v63 }
 0x3ce   :  { %v1563_v4 = vrot.slane %v1562_v3, 2 }
 0x3d0   :  { %v1564_v11 = vadd.f32 %v1563_v4, %v1562_v3  ;;  %v2399_v3 = vld [vmem:[%s10965_s0] sm:$0xf]  ;;  %v7760_v4 = vld [vmem:[%s10965_s0 + $0x4] sm:$0xf] }
 0x3d2   :  { %v1565_v14 = vrot.slane %v1564_v11, 1 }
 0x3d4   :  { %v1566_v17 = vadd.f32 %v1565_v14, %v1564_v11  ;;  %v10034_v11 = vld [vmem:[%s10966_s29 + $0x18] sm:$0xff]  }
 0x3f4   :  { %v1552_v5 = vpop.f32.mrb[12].mxu0 }
 0x3f5   :  { %v1568_v6 = vsel %vm1559_vm8, %v1552_v5, 0.0  ;;  %v8502_v7 = vpop.f32.mrb[13].mxu0 }
 0x3f6   :  { %v1569_v8 = vrot.slane %v1568_v6, 4  ;;  %v1555_v9 = vpop.f32.mrb[14].mxu0  ;;  %v7666_v7 = vld [vmem:[%s10964_s28 + $0x18] sm:$0xff] }
 0x3f7   :  { %v8503_v10 = vpop.f32.mrb[15].mxu0 }
 0x3f8   :  { %v1570_v12 = vadd.f32 %v1569_v8, %v1568_v6  ;;  %v7665_v6 = vld [vmem:[%s10964_s28 + $0x10] sm:$0xff]  ;;  %v7769_v8 = vld [vmem:[%s10965_s0 + $0xc] sm:$0xf] }
 0x3f9   :  { %v2775_v9 = vpack.c.bf16 %v7666_v7, %v7665_v6  ;;  %v10023_v10 = vld [vmem:[%s10966_s29 + $0x10] sm:$0xff]   ;;  %v7762_v6 = vld [vmem:[%s10920_s10 + $0x2] sm:$0x3] }
 0x3fa   :  { %v1571_v13 = vrot.slane %v1570_v12, 2  ;;  %8517 = vmatpush3.bf16.msra.mxu0 %v10023_v10 }
 0x3fb   :  { %8518 = vmatprep.subr.bf16.mxu0 %v9589_v0 }
 0x3fc   :  { %v1572_v15 = vadd.f32 %v1571_v13, %v1570_v12 }
 0x3fe   :  { %v1573_v16 = vrot.slane %v1572_v15, 1  ;;  %8519 = vmatpush3.bf16.msra.mxu0 %v10034_v11 }
 0x3ff   :  { %8524 = vmatprep.subr.bf16.mxu0 %v9589_v0 }
 0x400   :  { %v1574_v18 = vadd.f32 %v1573_v16, %v1572_v15 }
 0x402   :  { %v1575_v19 = vadd.f32 %v1574_v18, %v1566_v17  ;;  %v9539_v17 = vld [vmem:[%s10966_s29] sm:$0xff]  }
 0x404   :  { %v1577_v20 = vmul.f32 0.125, %v1575_v19 }
 0x406   :  { %v1578_v21 = vsub.f32 %v1210_v60, %v1577_v20  ;;  %v1588_v22 = vsub.f32 %v1552_v5, %v1577_v20  ;;  %v7765_v5 = vld [vmem:[%s10965_s0 + $0x8] sm:$0xf] }
 0x408   :  { %v1579_v23 = vmul.f32 %v1578_v21, %v1578_v21  ;;  %v1589_v24 = vmul.f32 %v1588_v22, %v1588_v22 }
 0x40a   :  { %v1580_v25 = vsel %vm1559_vm8, %v1579_v23, 0.0  ;;  %v1590_v26 = vsel %vm1559_vm8, %v1589_v24, 0.0 }
 0x40b   :  { %v1581_v27 = vrot.slane %v1580_v25, 4  ;;  %v1591_v28 = vrot.slane %v1590_v26, 4 }
 0x40d   :  { %v1582_v29 = vadd.f32 %v1581_v27, %v1580_v25  ;;  %v1592_v30 = vadd.f32 %v1591_v28, %v1590_v26  ;;  %v9541_v27 = vld [vmem:[%s10966_s29 + $0x20] sm:$0xff]  }
 0x40f   :  { %v1583_v31 = vrot.slane %v1582_v29, 2  ;;  %v1593_v32 = vrot.slane %v1592_v30, 2 }
 0x411   :  { %v1584_v33 = vadd.f32 %v1583_v31, %v1582_v29  ;;  %v1594_v34 = vadd.f32 %v1593_v32, %v1592_v30  ;;  %v9542_v29 = vld [vmem:[%s10966_s29 + $0x28] sm:$0xff]  }
 0x413   :  { %v1585_v35 = vrot.slane %v1584_v33, 1  ;;  %v1595_v36 = vrot.slane %v1594_v34, 1 }
 0x415   :  { %v1586_v37 = vadd.f32 %v1585_v35, %v1584_v33  ;;  %v1596_v38 = vadd.f32 %v1595_v36, %v1594_v34  ;;  %v9543_v34 = vld [vmem:[%s10966_s29 + $0x30] sm:$0xff]  }
 0x417   :  { %v1597_v39 = vadd.f32 %v1596_v38, %v1586_v37 }
 0x419   :  { %v1598_v40 = vmul.f32 0.125, %v1597_v39 }
 0x41b   :  { %v1599_v41 = vadd.f32 1e-05, %v1598_v40  ;;  %v9544_v40 = vld [vmem:[%s10966_s29 + $0x38] sm:$0xff]  }
 0x41d   :  { %9569 = vrsqrt.f32 %v1599_v41 }
 0x427   :  { %v9570_v42 = vpop.eup %9569 }
 0x428   :  { %v1603_v44 = vmul.f32 %v9570_v42, %v1578_v21  ;;  %v1618_v45 = vmul.f32 %v9570_v42, %v1588_v22  ;;  %v9540_v22 = vld [vmem:[%s10966_s29 + $0x8] sm:$0xff]  }
 0x42a   :  { %v1610_v47 = vmul.f32 %v7718_v43, %v1603_v44  ;;  %v1619_v54 = vmul.f32 %v7718_v43, %v1618_v45 }
 0x42c   :  { %v1617_v48 = vadd.f32 %v7719_v46, %v1610_v47  ;;  %v1620_v56 = vadd.f32 %v7719_v46, %v1619_v54 }
 0x42e   :  { %vm1621_vm9 = vcmp.ge.f32.partialorder %v1617_v48, 0.0  ;;  %v1622_v49 = vmul.f32 0.2, %v1617_v48  ;;  %v1625_v58 = vmul.f32 0.2, %v1620_v56  ;;  %vm1624_vm10 = vcmp.ge.f32.partialorder %v1620_v56, 0.0 }
 0x430   :  { %v1623_v50 = vsel %vm1621_vm9, %v1617_v48, %v1622_v49  ;;  %v1626_v59 = vsel %vm1624_vm10, %v1620_v56, %v1625_v58 }
 0x431   :  { %v1627_v51 = vpack.c.bf16 %v1623_v50, %v1623_v50  ;;  %v2056_v60 = vpack.c.bf16 %v1626_v59, %v1626_v59 }
 0x433   :  { %v1633_v52 = vsel %vm194_vm2, %v1627_v51, 0  ;;  %v2058_v62 = vsel %vm194_vm2, %v2056_v60, 0 }
 0x434   :  { %8505 = vmatpush3.bf16.msra.mxu1 %v1633_v52 }
 0x435   :  { %8510 = vmatprep.subr.bf16.mxu1 %v9589_v0 }
 0x437   :  { %8507 = vmatmul.mubr.msk.bf16.vlgmr.msra.gmra.mrb[64].mxu1 %vm190_vm3, %v1628_v53 }
 0x438   :  { %8511 = vmatpush3.bf16.msra.mxu1 %v1633_v52  ;;  %8512 = vmatprep.mubr.msk.bf16.mxu1 %vm9590_vm0, %v9589_v0 }
 0x439   :  { %8532 = vmatprep.subr.bf16.mxu1 %v9589_v0 }
 0x43f   :  { %8513 = vmatmul.mubr.msk.bf16.vlgmr.msra.gmra.mrb[68].mxu1 %vm190_vm3, %v7721_v55 }
 0x440   :  { %8533 = vmatpush3.bf16.msra.mxu1 %v1633_v52  ;;  %8534 = vmatprep.mubr.msk.bf16.mxu1 %vm9590_vm0, %v9589_v0 }
 0x441   :  { %8546 = vmatprep.subr.bf16.mxu1 %v9589_v0 }
 0x447   :  { %8535 = vmatmul.mubr.msk.bf16.vlgmr.msra.gmra.mrb[72].mxu1 %vm190_vm3, %v7733_v57 }
 0x448   :  { %8547 = vmatpush3.bf16.msra.mxu1 %v1633_v52  ;;  %8548 = vmatprep.mubr.msk.bf16.mxu1 %vm9590_vm0, %v9589_v0 }
 0x449   :  { %8560 = vmatprep.subr.bf16.mxu1 %v9589_v0 }
 0x44f   :  { %8549 = vmatmul.mubr.msk.bf16.vlgmr.msra.gmra.mrb[76].mxu1 %vm190_vm3, %v7742_v61 }
 0x450   :  { %8561 = vmatpush3.bf16.msra.mxu1 %v2058_v62  ;;  %8562 = vmatprep.mubr.msk.bf16.mxu1 %vm9590_vm0, %v9589_v0 }
 0x451   :  { %8566 = vmatprep.subr.bf16.mxu1 %v9589_v0 }
 0x457   :  { %8563 = vmatmul.mubr.msk.bf16.vlgmr.msra.gmra.mrb[80].mxu1 %vm190_vm3, %v1628_v53 }
 0x458   :  { %8567 = vmatpush3.bf16.msra.mxu1 %v2058_v62  ;;  %8568 = vmatprep.mubr.msk.bf16.mxu1 %vm9590_vm0, %v9589_v0 }
 0x459   :  { %8588 = vmatprep.subr.bf16.mxu1 %v9589_v0 }
 0x45f   :  { %8569 = vmatmul.mubr.msk.bf16.vlgmr.msra.gmra.mrb[84].mxu1 %vm190_vm3, %v7721_v55 }
 0x460   :  { %8589 = vmatpush3.bf16.msra.mxu1 %v2058_v62  ;;  %8590 = vmatprep.mubr.msk.bf16.mxu1 %vm9590_vm0, %v9589_v0 }
 0x461   :  { %8602 = vmatprep.subr.bf16.mxu1 %v9589_v0 }
 0x467   :  { %8591 = vmatmul.mubr.msk.bf16.vlgmr.msra.gmra.mrb[88].mxu1 %vm190_vm3, %v7733_v57 }
 0x468   :  { %8603 = vmatpush3.bf16.msra.mxu1 %v2058_v62  ;;  %8604 = vmatprep.mubr.msk.bf16.mxu1 %vm9590_vm0, %v9589_v0 }
 0x469   :  { %8616 = vmatprep.subr.bf16.mxu1 %v9589_v0 }
 0x46f   :  { %8605 = vmatmul.mubr.msk.bf16.vlgmr.msra.gmra.mrb[92].mxu1 %vm190_vm3, %v7742_v61 }
 0x470   :  { %8617 = vmatpush3.bf16.msra.mxu1 %v2398_v2  ;;  %8618 = vmatprep.mubr.msk.bf16.mxu1 %vm9590_vm0, %v9589_v0 }
 0x471   :  { %8622 = vmatprep.subr.bf16.mxu1 %v9589_v0 }
 0x477   :  { %8619 = vmatmul.mubr.msk.bf16.vlgmr.msra.gmra.mrb[96].mxu1 %vm96_vm1, %v2399_v3 }
 0x478   :  { %8623 = vmatpush3.bf16.msra.mxu1 %v2398_v2  ;;  %8624 = vmatprep.mubr.msk.bf16.mxu1 %vm9590_vm0, %v9589_v0 }
 0x479   :  { %8640 = vmatprep.subr.bf16.mxu1 %v9589_v0 }
 0x47f   :  { %8625 = vmatmul.mubr.msk.bf16.vlgmr.msra.gmra.mrb[100].mxu1 %vm96_vm1, %v7760_v4 }
 0x480   :  { %8641 = vmatpush3.bf16.msra.mxu1 %v2398_v2  ;;  %8642 = vmatprep.mubr.msk.bf16.mxu1 %vm9590_vm0, %v9589_v0 }
 0x481   :  { %8652 = vmatprep.subr.bf16.mxu1 %v9589_v0 }
 0x487   :  { %8643 = vmatmul.mubr.msk.bf16.vlgmr.msra.gmra.mrb[104].mxu1 %vm96_vm1, %v7765_v5 }
 0x488   :  { %8653 = vmatpush3.bf16.msra.mxu1 %v2398_v2  ;;  %8654 = vmatprep.mubr.msk.bf16.mxu1 %vm9590_vm0, %v9589_v0 }
 0x489   :  { %8664 = vmatprep.subr.bf16.mxu1 %v9589_v0 }
 0x48f   :  { %8655 = vmatmul.mubr.msk.bf16.vlgmr.msra.gmra.mrb[108].mxu1 %vm96_vm1, %v7769_v8 }
 0x490   :  { %8665 = vmatpush3.bf16.msra.mxu1 %v2775_v9  ;;  %8666 = vmatprep.mubr.msk.bf16.mxu1 %vm9590_vm0, %v9589_v0 }
 0x491   :  { %8670 = vmatprep.subr.bf16.mxu1 %v9589_v0 }
 0x497   :  { %8667 = vmatmul.mubr.msk.bf16.vlgmr.msra.gmra.mrb[112].mxu1 %vm96_vm1, %v2399_v3 }
 0x498   :  { %8671 = vmatpush3.bf16.msra.mxu1 %v2775_v9  ;;  %8672 = vmatprep.mubr.msk.bf16.mxu1 %vm9590_vm0, %v9589_v0 }
 0x499   :  { %8688 = vmatprep.subr.bf16.mxu1 %v9589_v0 }
 0x49f   :  { %8673 = vmatmul.mubr.msk.bf16.vlgmr.msra.gmra.mrb[116].mxu1 %vm96_vm1, %v7760_v4 }
 0x4a0   :  { %8689 = vmatpush3.bf16.msra.mxu1 %v2775_v9  ;;  %8690 = vmatprep.mubr.msk.bf16.mxu1 %vm9590_vm0, %v9589_v0 }
 0x4a1   :  { %8700 = vmatprep.subr.bf16.mxu1 %v9589_v0 }
 0x4a7   :  { %8691 = vmatmul.mubr.msk.bf16.vlgmr.msra.gmra.mrb[120].mxu1 %vm96_vm1, %v7765_v5 }
 0x4a8   :  { %8701 = vmatpush3.bf16.msra.mxu1 %v2775_v9  ;;  %8702 = vmatprep.mubr.msk.bf16.mxu1 %vm9590_vm0, %v9589_v0  ;;  %v2497_v9 = vsel %vm194_vm2, %v7762_v6, 0 }
 0x4a9   :  { %8712 = vmatprep.subr.bf16.mxu1 %v9589_v0 }
 0x4af   :  { %8703 = vmatmul.mubr.msk.bf16.vlgmr.msra.gmra.mrb[124].mxu1 %vm96_vm1, %v7769_v8 }
 0x4b0   :  { %8714 = vmatprep.mubr.msk.bf16.mxu1 %vm9590_vm0, %v9589_v0 }
 0x50a   :  { %v1669_v12 = vpop.f32.mrb[64].mxu1 }
 0x50b   :  { %v8508_v13 = vpop.f32.mrb[65].mxu1  ;;  %v1675_v28 = vpack.c.bf16 %v1669_v12, %v1669_v12 }
 0x50c   :  { %v1672_v14 = vpop.f32.mrb[66].mxu1  ;;  %v2444_v13 = vld [vmem:[%s10920_s10] sm:$0x3] }
 0x50d   :  { %v8509_v15 = vpop.f32.mrb[67].mxu1 }
 0x512   :  { %v1719_v16 = vpop.f32.mrb[68].mxu1 }
 0x513   :  { %v1725_v18 = vpack.c.bf16 %v1719_v16, %v1719_v16  ;;  %v8514_v19 = vpop.f32.mrb[69].mxu1  ;;  %v2543_v16 = vsel %vm194_vm2, %v2444_v13, 0 }
 0x514   :  { %v1722_v20 = vpop.f32.mrb[70].mxu1 }
 0x515   :  { %v8515_v21 = vpop.f32.mrb[71].mxu1  ;;  %8521 = vmatmul.mubr.msk.bf16.vlgmr.msra.gmra.mrb[16].mxu0 %vm1743_vm11, %v1725_v18 }
 0x516   :  { %8525 = vmatpush3.bf16.msra.mxu0 %v9539_v17  ;;  %8528 = vmatprep.mubr.msk.bf16.mxu0 %vm9590_vm0, %v9589_v0 }
 0x517   :  { %8526 = vmatprep.subr.bf16.mxu0 %v9589_v0 }
 0x51a   :  { %8527 = vmatpush3.bf16.msra.mxu0 %v9540_v22  ;;  %v1881_v23 = vpop.f32.mrb[72].mxu1 }
 0x51b   :  { %v8536_v24 = vpop.f32.mrb[73].mxu1  ;;  %8538 = vmatprep.subr.bf16.mxu0 %v9589_v0  ;;  %v1887_v36 = vpack.c.bf16 %v1881_v23, %v1881_v23 }
 0x51c   :  { %v1884_v25 = vpop.f32.mrb[74].mxu1 }
 0x51d   :  { %v8537_v26 = vpop.f32.mrb[75].mxu1 }
 0x521   :  { %8529 = vmatmul.mubr.msk.bf16.vlgmr.msra.gmra.mrb[16].mxu0 %vm1743_vm11, %v1675_v28 }
 0x522   :  { %8539 = vmatpush3.bf16.msra.mxu0 %v9541_v27  ;;  %v1988_v30 = vpop.f32.mrb[76].mxu1  ;;  %8542 = vmatprep.mubr.msk.bf16.mxu0 %vm9590_vm0, %v9589_v0 }
 0x523   :  { %8540 = vmatprep.subr.bf16.mxu0 %v9589_v0  ;;  %v8550_v31 = vpop.f32.mrb[77].mxu1  ;;  %v1994_v45 = vpack.c.bf16 %v1988_v30, %v1988_v30 }
 0x524   :  { %v1991_v32 = vpop.f32.mrb[78].mxu1  ;;  %v7771_v31 = vld [vmem:[%s10920_s10 + $0x6] sm:$0x3] }
 0x525   :  { %v8551_v33 = vpop.f32.mrb[79].mxu1 }
 0x526   :  { %8541 = vmatpush3.bf16.msra.mxu0 %v9542_v29 }
 0x527   :  { %8552 = vmatprep.subr.bf16.mxu0 %v9589_v0 }
 0x52a   :  { %v2094_v35 = vpop.f32.mrb[80].mxu1 }
 0x52b   :  { %v8564_v37 = vpop.f32.mrb[81].mxu1  ;;  %v2100_v56 = vpack.c.bf16 %v2094_v35, %v2094_v35 }
 0x52c   :  { %v2097_v38 = vpop.f32.mrb[82].mxu1 }
 0x52d   :  { %8543 = vmatmul.mubr.msk.bf16.vlgmr.msra.gmra.mrb[16].mxu0 %vm1743_vm11, %v1887_v36  ;;  %v8565_v39 = vpop.f32.mrb[83].mxu1 }
 0x52e   :  { %8553 = vmatpush3.bf16.msra.mxu0 %v9543_v34  ;;  %8556 = vmatprep.mubr.msk.bf16.mxu0 %vm9590_vm0, %v9589_v0 }
 0x52f   :  { %8554 = vmatprep.subr.bf16.mxu0 %v9589_v0 }
 0x532   :  { %8555 = vmatpush3.bf16.msra.mxu0 %v9544_v40  ;;  %v2135_v41 = vpop.f32.mrb[84].mxu1 }
 0x533   :  { %8572 = vmatprep.subr.bf16.mxu0 %v9589_v0  ;;  %v8570_v42 = vpop.f32.mrb[85].mxu1  ;;  %v2141_v49 = vpack.c.bf16 %v2135_v41, %v2135_v41 }
 0x534   :  { %v2138_v43 = vpop.f32.mrb[86].mxu1 }
 0x535   :  { %v8571_v44 = vpop.f32.mrb[87].mxu1 }
 0x539   :  { %8557 = vmatmul.mubr.msk.bf16.vlgmr.msra.gmra.mrb[16].mxu0 %vm1743_vm11, %v1994_v45 }
 0x53a   :  { %8573 = vmatpush3.bf16.msra.mxu0 %v10023_v10  ;;  %8576 = vmatprep.mubr.msk.bf16.mxu0 %vm9590_vm0, %v9589_v0  ;;  %v2262_v46 = vpop.f32.mrb[88].mxu1 }
 0x53b   :  { %8574 = vmatprep.subr.bf16.mxu0 %v9589_v0  ;;  %v8592_v47 = vpop.f32.mrb[89].mxu1  ;;  %v2268_v1 = vpack.c.bf16 %v2262_v46, %v2262_v46 }
 0x53c   :  { %v2265_v48 = vpop.f32.mrb[90].mxu1 }
 0x53d   :  { %v8593_v50 = vpop.f32.mrb[91].mxu1 }
 0x53e   :  { %8575 = vmatpush3.bf16.msra.mxu0 %v10034_v11 }
 0x53f   :  { %8580 = vmatprep.subr.bf16.mxu0 %v9589_v0 }
 0x541   :  { %8577 = vmatmul.mubr.msk.bf16.vlgmr.msra.gmra.mrb[20].mxu0 %vm1743_vm11, %v2141_v49 }
 0x542   :  { %8581 = vmatpush3.bf16.msra.mxu0 %v9539_v17  ;;  %8584 = vmatprep.mubr.msk.bf16.mxu0 %vm9590_vm0, %v9589_v0  ;;  %v2347_v51 = vpop.f32.mrb[92].mxu1 }
 0x543   :  { %8582 = vmatprep.subr.bf16.mxu0 %v9589_v0  ;;  %v8606_v52 = vpop.f32.mrb[93].mxu1  ;;  %v2353_v8 = vpack.c.bf16 %v2347_v51, %v2347_v51 }
 0x544   :  { %v2350_v53 = vpop.f32.mrb[94].mxu1 }
 0x545   :  { %v8607_v54 = vpop.f32.mrb[95].mxu1 }
 0x546   :  { %8583 = vmatpush3.bf16.msra.mxu0 %v9540_v22  ;;  %v7767_v22 = vld [vmem:[%s10920_s10 + $0x4] sm:$0x3] }
 0x547   :  { %8594 = vmatprep.subr.bf16.mxu0 %v9589_v0  ;;  %v2637_v26 = vsel %vm194_vm2, %v7767_v22, 0 }
 0x54a   :  { %v2437_v55 = vpop.f32.mrb[96].mxu1 }
 0x54b   :  { %v8620_v57 = vpop.f32.mrb[97].mxu1  ;;  %v2443_v25 = vpack.c.bf16 %v2437_v55, %v2437_v55 }
 0x54c   :  { %v2440_v58 = vpop.f32.mrb[98].mxu1 }
 0x54d   :  { %8585 = vmatmul.mubr.msk.bf16.vlgmr.msra.gmra.mrb[20].mxu0 %vm1743_vm11, %v2100_v56  ;;  %v8621_v59 = vpop.f32.mrb[99].mxu1 }
 0x54e   :  { %8595 = vmatpush3.bf16.msra.mxu0 %v9541_v27  ;;  %8598 = vmatprep.mubr.msk.bf16.mxu0 %vm9590_vm0, %v9589_v0  ;;  %v3121_v59 = vld [vmem:[%s10921_s13] sm:$0x3] }
 0x54f   :  { %8596 = vmatprep.subr.bf16.mxu0 %v9589_v0 }
 0x552   :  { %8597 = vmatpush3.bf16.msra.mxu0 %v9542_v29  ;;  %v2484_v60 = vpop.f32.mrb[100].mxu1 }
 0x553   :  { %8608 = vmatprep.subr.bf16.mxu0 %v9589_v0  ;;  %v8626_v61 = vpop.f32.mrb[101].mxu1  ;;  %v2490_v14 = vpack.c.bf16 %v2484_v60, %v2484_v60  ;;  %v7782_v60 = vld [vmem:[%s10921_s13 + $0x2] sm:$0x3] }
 0x554   :  { %v2487_v62 = vpop.f32.mrb[102].mxu1  ;;  %v7790_v61 = vld [vmem:[%s10921_s13 + $0x4] sm:$0x3] }
 0x555   :  { %v8627_v63 = vpop.f32.mrb[103].mxu1  ;;  %v7796_v62 = vld [vmem:[%s10921_s13 + $0x6] sm:$0x3] }
 0x559   :  { %8599 = vmatmul.mubr.msk.bf16.vlgmr.msra.gmra.mrb[20].mxu0 %vm1743_vm11, %v2268_v1 }
 0x55a   :  { %8609 = vmatpush3.bf16.msra.mxu0 %v9543_v34  ;;  %8612 = vmatprep.mubr.msk.bf16.mxu0 %vm9590_vm0, %v9589_v0  ;;  %v2624_v2 = vpop.f32.mrb[104].mxu1  ;;  %v2732_v34 = vsel %vm194_vm2, %v7771_v31, 0 }
 0x55b   :  { %8610 = vmatprep.subr.bf16.mxu0 %v9589_v0  ;;  %v8644_v3 = vpop.f32.mrb[105].mxu1  ;;  %v2630_v33 = vpack.c.bf16 %v2624_v2, %v2624_v2 }
 0x55c   :  { %v2627_v4 = vpop.f32.mrb[106].mxu1 }
 0x55d   :  { %v8645_v5 = vpop.f32.mrb[107].mxu1 }
 0x55e   :  { %8611 = vmatpush3.bf16.msra.mxu0 %v9544_v40 }
 0x55f   :  { %8628 = vmatprep.subr.bf16.mxu0 %v9589_v0 }
 0x562   :  { %v2719_v7 = vpop.f32.mrb[108].mxu1 }
 0x563   :  { %v8656_v10 = vpop.f32.mrb[109].mxu1  ;;  %v2725_v38 = vpack.c.bf16 %v2719_v7, %v2719_v7 }
 0x564   :  { %v2722_v11 = vpop.f32.mrb[110].mxu1 }
 0x565   :  { %8613 = vmatmul.mubr.msk.bf16.vlgmr.msra.gmra.mrb[20].mxu0 %vm1743_vm11, %v2353_v8  ;;  %v8657_v12 = vpop.f32.mrb[111].mxu1  ;;  %v9545_v8 = vld [vmem:[%s10922_s12 + $0x8] sm:$0xff]  }
 0x566   :  { %8629 = vmatpush3.bf16.msra.mxu0 %v2497_v9  ;;  %8630 = vmatprep.mubr.msk.bf16.mxu0 %vm9590_vm0, %v9589_v0 }
 0x567   :  { %8634 = vmatprep.subr.bf16.mxu0 %v9589_v0 }
 0x56a   :  { %v2810_v15 = vpop.f32.mrb[112].mxu1 }
 0x56b   :  { %v8668_v17 = vpop.f32.mrb[113].mxu1  ;;  %v2816_v40 = vpack.c.bf16 %v2810_v15, %v2810_v15 }
 0x56c   :  { %v2813_v18 = vpop.f32.mrb[114].mxu1 }
 0x56d   :  { %8631 = vmatmul.mubr.msk.bf16.vlgmr.msra.gmra.mrb[24].mxu0 %vm190_vm3, %v2490_v14  ;;  %v8669_v19 = vpop.f32.mrb[115].mxu1  ;;  %v9546_v14 = vld [vmem:[%s10922_s12] sm:$0xff]  }
 0x56e   :  { %8635 = vmatpush3.bf16.msra.mxu0 %v2543_v16  ;;  %8636 = vmatprep.mubr.msk.bf16.mxu0 %vm9590_vm0, %v9589_v0 }
 0x56f   :  { %8646 = vmatprep.subr.bf16.mxu0 %v9589_v0 }
 0x572   :  { %v2851_v20 = vpop.f32.mrb[116].mxu1 }
 0x573   :  { %v8674_v21 = vpop.f32.mrb[117].mxu1  ;;  %v2857_v39 = vpack.c.bf16 %v2851_v20, %v2851_v20 }
 0x574   :  { %v2854_v23 = vpop.f32.mrb[118].mxu1 }
 0x575   :  { %v8675_v24 = vpop.f32.mrb[119].mxu1  ;;  %v9547_v23 = vld [vmem:[%s10922_s12 + $0x10] sm:$0xff]  }
 0x579   :  { %8637 = vmatmul.mubr.msk.bf16.vlgmr.msra.gmra.mrb[24].mxu0 %vm190_vm3, %v2443_v25 }
 0x57a   :  { %8647 = vmatpush3.bf16.msra.mxu0 %v2637_v26  ;;  %8648 = vmatprep.mubr.msk.bf16.mxu0 %vm9590_vm0, %v9589_v0  ;;  %v2978_v27 = vpop.f32.mrb[120].mxu1 }
 0x57b   :  { %8658 = vmatprep.subr.bf16.mxu0 %v9589_v0  ;;  %v8692_v28 = vpop.f32.mrb[121].mxu1  ;;  %v2984_v41 = vpack.c.bf16 %v2978_v27, %v2978_v27 }
 0x57c   :  { %v2981_v29 = vpop.f32.mrb[122].mxu1 }
 0x57d   :  { %v8693_v30 = vpop.f32.mrb[123].mxu1  ;;  %v9548_v29 = vld [vmem:[%s10922_s12 + $0x18] sm:$0xff]  }
 0x582   :  { %v3063_v32 = vpop.f32.mrb[124].mxu1 }
 0x583   :  { %v8704_v35 = vpop.f32.mrb[125].mxu1  ;;  %v3069_v42 = vpack.c.bf16 %v3063_v32, %v3063_v32 }
 0x584   :  { %v3066_v36 = vpop.f32.mrb[126].mxu1 }
 0x585   :  { %8649 = vmatmul.mubr.msk.bf16.vlgmr.msra.gmra.mrb[24].mxu0 %vm190_vm3, %v2630_v33  ;;  %v8705_v37 = vpop.f32.mrb[127].mxu1 }
 0x586   :  { %8659 = vmatpush3.bf16.msra.mxu0 %v2732_v34  ;;  %8660 = vmatprep.mubr.msk.bf16.mxu0 %vm9590_vm0, %v9589_v0 }
 0x587   :  { %8676 = vmatprep.subr.bf16.mxu0 %v9589_v0 }
 0x591   :  { %8661 = vmatmul.mubr.msk.bf16.vlgmr.msra.gmra.mrb[24].mxu0 %vm190_vm3, %v2725_v38 }
 0x592   :  { %8677 = vmatpush3.bf16.msra.mxu0 %v2497_v9  ;;  %8678 = vmatprep.mubr.msk.bf16.mxu0 %vm9590_vm0, %v9589_v0 }
 0x593   :  { %8682 = vmatprep.subr.bf16.mxu0 %v9589_v0 }
 0x599   :  { %8679 = vmatmul.mubr.msk.bf16.vlgmr.msra.gmra.mrb[28].mxu0 %vm190_vm3, %v2857_v39 }
 0x59a   :  { %8683 = vmatpush3.bf16.msra.mxu0 %v2543_v16  ;;  %8684 = vmatprep.mubr.msk.bf16.mxu0 %vm9590_vm0, %v9589_v0 }
 0x59b   :  { %8694 = vmatprep.subr.bf16.mxu0 %v9589_v0 }
 0x5a5   :  { %8685 = vmatmul.mubr.msk.bf16.vlgmr.msra.gmra.mrb[28].mxu0 %vm190_vm3, %v2816_v40 }
 0x5a6   :  { %8695 = vmatpush3.bf16.msra.mxu0 %v2637_v26  ;;  %8696 = vmatprep.mubr.msk.bf16.mxu0 %vm9590_vm0, %v9589_v0 }
 0x5a7   :  { %8706 = vmatprep.subr.bf16.mxu0 %v9589_v0 }
 0x5b1   :  { %8697 = vmatmul.mubr.msk.bf16.vlgmr.msra.gmra.mrb[28].mxu0 %vm190_vm3, %v2984_v41 }
 0x5b2   :  { %8707 = vmatpush3.bf16.msra.mxu0 %v2732_v34  ;;  %8708 = vmatprep.mubr.msk.bf16.mxu0 %vm9590_vm0, %v9589_v0 }
 0x5b3   :  { %8724 = vmatprep.subr.bf16.mxu0 %v9589_v0 }
 0x5bd   :  { %8709 = vmatmul.mubr.msk.bf16.vlgmr.msra.gmra.mrb[28].mxu0 %vm190_vm3, %v3069_v42 }
 0x5be   :  { %8726 = vmatprep.mubr.msk.bf16.mxu0 %vm9590_vm0, %v9589_v0  ;;  %8725 = vmatpush3.bf16.msra.mxu0 %v9545_v8 }
 0x5bf   :  { %8730 = vmatprep.subr.bf16.mxu0 %v9589_v0 }
 0x60c   :  { %v10159_v43 = vpop.f32.mrb[16].mxu0 }
 0x60d   :  { %v8558_v44 = vpop.f32.mrb[17].mxu0 }
 0x60e   :  { %v2052_v45 = vpop.f32.mrb[18].mxu0 }
 0x60f   :  { %v8559_v46 = vpop.f32.mrb[19].mxu0 }
 0x638   :  { %v10161_v47 = vpop.f32.mrb[20].mxu0 }
 0x639   :  { %v8614_v48 = vpop.f32.mrb[21].mxu0 }
 0x63a   :  { %v2394_v49 = vpop.f32.mrb[22].mxu0 }
 0x63b   :  { %v8615_v50 = vpop.f32.mrb[23].mxu0 }
 0x664   :  { %v2768_v51 = vpop.f32.mrb[24].mxu0 }
 0x665   :  { %vm3114_vm12 = vcmp.ge.f32.partialorder %v2768_v51, 0.0  ;;  %v3115_v52 = vmul.f32 0.2, %v2768_v51  ;;  %v8662_v53 = vpop.f32.mrb[25].mxu0 }
 0x666   :  { %v2771_v54 = vpop.f32.mrb[26].mxu0 }
 0x667   :  { %v3116_v55 = vsel %vm3114_vm12, %v2768_v51, %v3115_v52  ;;  %v8663_v56 = vpop.f32.mrb[27].mxu0 }
 0x668   :  { %v3120_v57 = vpack.c.bf16 %v3116_v55, %v3116_v55 }
 0x66a   :  { %v3126_v58 = vsel %vm825_vm5, %v3120_v57, 0 }
 0x66b   :  { %8713 = vmatpush3.bf16.msra.mxu1 %v3126_v58 }
 0x66c   :  { %8718 = vmatprep.subr.bf16.mxu1 %v9589_v0 }
 0x66e   :  { %8715 = vmatmul.mubr.msk.bf16.vlgmr.msra.gmra.mrb[128].mxu1 %vm821_vm6, %v3121_v59 }
 0x66f   :  { %8719 = vmatpush3.bf16.msra.mxu1 %v3126_v58  ;;  %8720 = vmatprep.mubr.msk.bf16.mxu1 %vm9590_vm0, %v9589_v0 }
 0x670   :  { %8736 = vmatprep.subr.bf16.mxu1 %v9589_v0 }
 0x676   :  { %8721 = vmatmul.mubr.msk.bf16.vlgmr.msra.gmra.mrb[132].mxu1 %vm821_vm6, %v7782_v60 }
 0x677   :  { %8737 = vmatpush3.bf16.msra.mxu1 %v3126_v58  ;;  %8738 = vmatprep.mubr.msk.bf16.mxu1 %vm9590_vm0, %v9589_v0 }
 0x678   :  { %8748 = vmatprep.subr.bf16.mxu1 %v9589_v0 }
 0x67e   :  { %8739 = vmatmul.mubr.msk.bf16.vlgmr.msra.gmra.mrb[136].mxu1 %vm821_vm6, %v7790_v61 }
 0x67f   :  { %8749 = vmatpush3.bf16.msra.mxu1 %v3126_v58  ;;  %8750 = vmatprep.mubr.msk.bf16.mxu1 %vm9590_vm0, %v9589_v0 }
 0x680   :  { %8760 = vmatprep.subr.bf16.mxu1 %v9589_v0 }
 0x686   :  { %8751 = vmatmul.mubr.msk.bf16.vlgmr.msra.gmra.mrb[140].mxu1 %vm821_vm6, %v7796_v62 }
 0x687   :  { %8762 = vmatprep.mubr.msk.bf16.mxu1 %vm9590_vm0, %v9589_v0 }
 0x690   :  { %v3107_v63 = vpop.f32.mrb[28].mxu0 }
 0x691   :  { %vm3117_vm13 = vcmp.ge.f32.partialorder %v3107_v63, 0.0  ;;  %v3118_v1 = vmul.f32 0.2, %v3107_v63  ;;  %v8710_v2 = vpop.f32.mrb[29].mxu0 }
 0x692   :  { %v3110_v3 = vpop.f32.mrb[30].mxu0 }
 0x693   :  { %v3119_v4 = vsel %vm3117_vm13, %v3107_v63, %v3118_v1  ;;  %v8711_v5 = vpop.f32.mrb[31].mxu0 }
 0x694   :  { %v3516_v6 = vpack.c.bf16 %v3119_v4, %v3119_v4 }
 0x696   :  { %v3518_v7 = vsel %vm825_vm5, %v3516_v6, 0 }
 0x697   :  { %8761 = vmatpush3.bf16.msra.mxu1 %v3518_v7 }
 0x698   :  { %8766 = vmatprep.subr.bf16.mxu1 %v9589_v0 }
 0x69a   :  { %8763 = vmatmul.mubr.msk.bf16.vlgmr.msra.gmra.mrb[144].mxu1 %vm821_vm6, %v3121_v59 }
 0x69b   :  { %8767 = vmatpush3.bf16.msra.mxu1 %v3518_v7  ;;  %8768 = vmatprep.mubr.msk.bf16.mxu1 %vm9590_vm0, %v9589_v0 }
 0x69c   :  { %8784 = vmatprep.subr.bf16.mxu1 %v9589_v0 }
 0x6a2   :  { %8769 = vmatmul.mubr.msk.bf16.vlgmr.msra.gmra.mrb[148].mxu1 %vm821_vm6, %v7782_v60 }
 0x6a3   :  { %8785 = vmatpush3.bf16.msra.mxu1 %v3518_v7  ;;  %8786 = vmatprep.mubr.msk.bf16.mxu1 %vm9590_vm0, %v9589_v0 }
 0x6a4   :  { %8796 = vmatprep.subr.bf16.mxu1 %v9589_v0 }
 0x6aa   :  { %8787 = vmatmul.mubr.msk.bf16.vlgmr.msra.gmra.mrb[152].mxu1 %vm821_vm6, %v7790_v61 }
 0x6ab   :  { %8797 = vmatpush3.bf16.msra.mxu1 %v3518_v7  ;;  %8798 = vmatprep.mubr.msk.bf16.mxu1 %vm9590_vm0, %v9589_v0 }
 0x6ac   :  { %8808 = vmatprep.subr.bf16.mxu1 %v9589_v0 }
 0x6b2   :  { %8799 = vmatmul.mubr.msk.bf16.vlgmr.msra.gmra.mrb[156].mxu1 %vm821_vm6, %v7796_v62 }
 0x6b3   :  { %8810 = vmatprep.mubr.msk.bf16.mxu1 %vm9590_vm0, %v9589_v0 }
 0x741   :  { %v3162_v9 = vpop.f32.mrb[128].mxu1 }
 0x742   :  { %v8716_v10 = vpop.f32.mrb[129].mxu1  ;;  %v3168_v24 = vpack.c.bf16 %v3162_v9, %v3162_v9 }
 0x743   :  { %v3165_v11 = vpop.f32.mrb[130].mxu1 }
 0x744   :  { %v8717_v12 = vpop.f32.mrb[131].mxu1 }
 0x749   :  { %v3210_v13 = vpop.f32.mrb[132].mxu1 }
 0x74a   :  { %v3216_v15 = vpack.c.bf16 %v3210_v13, %v3210_v13  ;;  %v8722_v16 = vpop.f32.mrb[133].mxu1 }
 0x74b   :  { %v3213_v17 = vpop.f32.mrb[134].mxu1 }
 0x74c   :  { %v8723_v18 = vpop.f32.mrb[135].mxu1  ;;  %8727 = vmatmul.mubr.msk.bf16.vlgmr.msra.gmra.mrb[32].mxu0 %vm96_vm1, %v3216_v15 }
 0x74d   :  { %8731 = vmatpush3.bf16.msra.mxu0 %v9546_v14  ;;  %8732 = vmatprep.mubr.msk.bf16.mxu0 %vm9590_vm0, %v9589_v0 }
 0x74e   :  { %8742 = vmatprep.subr.bf16.mxu0 %v9589_v0 }
 0x751   :  { %v3357_v19 = vpop.f32.mrb[136].mxu1 }
 0x752   :  { %v8740_v20 = vpop.f32.mrb[137].mxu1  ;;  %v3363_v30 = vpack.c.bf16 %v3357_v19, %v3357_v19 }
 0x753   :  { %v3360_v21 = vpop.f32.mrb[138].mxu1 }
 0x754   :  { %v8741_v22 = vpop.f32.mrb[139].mxu1 }
 0x758   :  { %8733 = vmatmul.mubr.msk.bf16.vlgmr.msra.gmra.mrb[32].mxu0 %vm96_vm1, %v3168_v24 }
 0x759   :  { %8743 = vmatpush3.bf16.msra.mxu0 %v9547_v23  ;;  %v3456_v25 = vpop.f32.mrb[140].mxu1  ;;  %8744 = vmatprep.mubr.msk.bf16.mxu0 %vm9590_vm0, %v9589_v0 }
 0x75a   :  { %v8752_v26 = vpop.f32.mrb[141].mxu1  ;;  %8754 = vmatprep.subr.bf16.mxu0 %v9589_v0  ;;  %v3462_v32 = vpack.c.bf16 %v3456_v25, %v3456_v25 }
 0x75b   :  { %v3459_v27 = vpop.f32.mrb[142].mxu1 }
 0x75c   :  { %v8753_v28 = vpop.f32.mrb[143].mxu1 }
 0x764   :  { %8745 = vmatmul.mubr.msk.bf16.vlgmr.msra.gmra.mrb[32].mxu0 %vm96_vm1, %v3363_v30 }
 0x765   :  { %8755 = vmatpush3.bf16.msra.mxu0 %v9548_v29  ;;  %8756 = vmatprep.mubr.msk.bf16.mxu0 %vm9590_vm0, %v9589_v0 }
 0x766   :  { %8772 = vmatprep.subr.bf16.mxu0 %v9589_v0 }
 0x76d   :  { %v3554_v31 = vpop.f32.mrb[144].mxu1 }
 0x76e   :  { %v8764_v33 = vpop.f32.mrb[145].mxu1  ;;  %v3560_v46 = vpack.c.bf16 %v3554_v31, %v3554_v31 }
 0x76f   :  { %v3557_v34 = vpop.f32.mrb[146].mxu1 }
 0x770   :  { %8757 = vmatmul.mubr.msk.bf16.vlgmr.msra.gmra.mrb[32].mxu0 %vm96_vm1, %v3462_v32  ;;  %v8765_v35 = vpop.f32.mrb[147].mxu1 }
 0x771   :  { %8773 = vmatpush3.bf16.msra.mxu0 %v9545_v8  ;;  %8774 = vmatprep.mubr.msk.bf16.mxu0 %vm9590_vm0, %v9589_v0 }
 0x772   :  { %8778 = vmatprep.subr.bf16.mxu0 %v9589_v0 }
 0x775   :  { %v3595_v36 = vpop.f32.mrb[148].mxu1 }
 0x776   :  { %v3601_v37 = vpack.c.bf16 %v3595_v36, %v3595_v36  ;;  %v8770_v38 = vpop.f32.mrb[149].mxu1 }
 0x777   :  { %v3598_v39 = vpop.f32.mrb[150].mxu1 }
 0x778   :  { %v8771_v40 = vpop.f32.mrb[151].mxu1  ;;  %8775 = vmatmul.mubr.msk.bf16.vlgmr.msra.gmra.mrb[36].mxu0 %vm96_vm1, %v3601_v37  ;;  %v7810_v37 = vld [vmem:[%s10923_s14] ss:$0 sm:$0xff] }
 0x779   :  { %8779 = vmatpush3.bf16.msra.mxu0 %v9546_v14  ;;  %8780 = vmatprep.mubr.msk.bf16.mxu0 %vm9590_vm0, %v9589_v0  ;;  %v7811_v40 = vld [vmem:[%s10924_s15] ss:$0 sm:$0xff] }
 0x77a   :  { %8790 = vmatprep.subr.bf16.mxu0 %v9589_v0 }
 0x77d   :  { %v3722_v41 = vpop.f32.mrb[152].mxu1 }
 0x77e   :  { %v8788_v42 = vpop.f32.mrb[153].mxu1  ;;  %v3728_v52 = vpack.c.bf16 %v3722_v41, %v3722_v41 }
 0x77f   :  { %v3725_v44 = vpop.f32.mrb[154].mxu1 }
 0x780   :  { %v8789_v45 = vpop.f32.mrb[155].mxu1 }
 0x784   :  { %8781 = vmatmul.mubr.msk.bf16.vlgmr.msra.gmra.mrb[36].mxu0 %vm96_vm1, %v3560_v46 }
 0x785   :  { %8791 = vmatpush3.bf16.msra.mxu0 %v9547_v23  ;;  %8792 = vmatprep.mubr.msk.bf16.mxu0 %vm9590_vm0, %v9589_v0  ;;  %v3807_v48 = vpop.f32.mrb[156].mxu1 }
 0x786   :  { %8802 = vmatprep.subr.bf16.mxu0 %v9589_v0  ;;  %v8800_v49 = vpop.f32.mrb[157].mxu1  ;;  %v3813_v53 = vpack.c.bf16 %v3807_v48, %v3807_v48 }
 0x787   :  { %v3810_v50 = vpop.f32.mrb[158].mxu1  ;;  %v3925_v49 = vld [vmem:[%s10925_s17] sm:$0x1] }
 0x788   :  { %v8801_v51 = vpop.f32.mrb[159].mxu1 }
 0x789   :  { %v7813_v51 = vld [vmem:[%s10925_s17 + $0x1] sm:$0x1] }
 0x790   :  { %8793 = vmatmul.mubr.msk.bf16.vlgmr.msra.gmra.mrb[36].mxu0 %vm96_vm1, %v3728_v52 }
 0x791   :  { %8803 = vmatpush3.bf16.msra.mxu0 %v9548_v29  ;;  %8804 = vmatprep.mubr.msk.bf16.mxu0 %vm9590_vm0, %v9589_v0 }
 0x792   :  { %8820 = vmatprep.subr.bf16.mxu0 %v9589_v0 }
 0x79c   :  { %8805 = vmatmul.mubr.msk.bf16.vlgmr.msra.gmra.mrb[36].mxu0 %vm96_vm1, %v3813_v53  ;;  %v7825_v53 = vld [vmem:[%s10925_s17 + $0x2] sm:$0x1] }
 0x79d   :  { %8824 = vmatprep.mubr.msk.bf16.mxu0 %vm9590_vm0, %v9589_v0 }
 0x843   :  { %v3509_v54 = vpop.f32.mrb[32].mxu0 }
 0x844   :  { %v8758_v55 = vpop.f32.mrb[33].mxu0  ;;  %v3858_v58 = vsel %vm1559_vm8, %v3509_v54, 0.0 }
 0x845   :  { %v3512_v56 = vpop.f32.mrb[34].mxu0  ;;  %v3859_v59 = vrot.slane %v3858_v58, 4 }
 0x846   :  { %v8759_v57 = vpop.f32.mrb[35].mxu0 }
 0x847   :  { %v3860_v60 = vadd.f32 %v3859_v59, %v3858_v58  ;;  %v7834_v57 = vld [vmem:[%s10925_s17 + $0x3] sm:$0x1]  ;;  %v9549_v59 = vld [vmem:[%s10926_s16 + $0x10] sm:$0xff]  }
 0x848   :  { %8821 = vmatpush3.bf16.msra.mxu0 %v9549_v59 }
 0x849   :  { %v3861_v61 = vrot.slane %v3860_v60, 2  ;;  %8822 = vmatprep.subr.bf16.mxu0 %v9589_v0 }
 0x84b   :  { %v3862_v5 = vadd.f32 %v3861_v61, %v3860_v60  ;;  %v10316_v60 = vld [vmem:[%s10926_s16 + $0x18] sm:$0xff]  }
 0x84c   :  { %8823 = vmatpush3.bf16.msra.mxu0 %v10316_v60 }
 0x84d   :  { %v3863_v8 = vrot.slane %v3862_v5, 1  ;;  %8828 = vmatprep.subr.bf16.mxu0 %v9589_v0 }
 0x84f   :  { %v3864_v11 = vadd.f32 %v3863_v8, %v3862_v5  ;;  %v9552_v8 = vld [vmem:[%s10926_s16 + $0x8] sm:$0xff]  }
 0x86f   :  { %v3851_v62 = vpop.f32.mrb[36].mxu0 }
 0x870   :  { %v3866_v63 = vsel %vm1559_vm8, %v3851_v62, 0.0  ;;  %v8806_v1 = vpop.f32.mrb[37].mxu0 }
 0x871   :  { %v3867_v2 = vrot.slane %v3866_v63, 4  ;;  %v3854_v3 = vpop.f32.mrb[38].mxu0 }
 0x872   :  { %v8807_v4 = vpop.f32.mrb[39].mxu0  ;;  %v9551_v3 = vld [vmem:[%s10926_s16] sm:$0xff]  }
 0x873   :  { %v3868_v6 = vadd.f32 %v3867_v2, %v3866_v63 }
 0x875   :  { %v3869_v7 = vrot.slane %v3868_v6, 2 }
 0x877   :  { %v3870_v9 = vadd.f32 %v3869_v7, %v3868_v6 }
 0x879   :  { %v3871_v10 = vrot.slane %v3870_v9, 1 }
 0x87b   :  { %v3872_v12 = vadd.f32 %v3871_v10, %v3870_v9 }
 0x87d   :  { %v3873_v13 = vadd.f32 %v3872_v12, %v3864_v11 }
 0x87f   :  { %v3874_v14 = vmul.f32 0.125, %v3873_v13  ;;  %v9553_v13 = vld [vmem:[%s10926_s16 + $0x20] sm:$0xff]  }
 0x881   :  { %v3875_v15 = vsub.f32 %v3509_v54, %v3874_v14  ;;  %v3885_v16 = vsub.f32 %v3851_v62, %v3874_v14 }
 0x883   :  { %v3876_v17 = vmul.f32 %v3875_v15, %v3875_v15  ;;  %v3886_v18 = vmul.f32 %v3885_v16, %v3885_v16 }
 0x885   :  { %v3877_v19 = vsel %vm1559_vm8, %v3876_v17, 0.0  ;;  %v3887_v20 = vsel %vm1559_vm8, %v3886_v18, 0.0 }
 0x886   :  { %v3878_v21 = vrot.slane %v3877_v19, 4  ;;  %v3888_v22 = vrot.slane %v3887_v20, 4 }
 0x888   :  { %v3879_v23 = vadd.f32 %v3878_v21, %v3877_v19  ;;  %v3889_v24 = vadd.f32 %v3888_v22, %v3887_v20  ;;  %v9555_v21 = vld [vmem:[%s10926_s16 + $0x30] sm:$0xff]  }
 0x88a   :  { %v3880_v25 = vrot.slane %v3879_v23, 2  ;;  %v3890_v26 = vrot.slane %v3889_v24, 2 }
 0x88c   :  { %v3881_v27 = vadd.f32 %v3880_v25, %v3879_v23  ;;  %v3891_v28 = vadd.f32 %v3890_v26, %v3889_v24  ;;  %v9556_v26 = vld [vmem:[%s10926_s16 + $0x38] sm:$0xff]  }
 0x88e   :  { %v3882_v29 = vrot.slane %v3881_v27, 1  ;;  %v3892_v30 = vrot.slane %v3891_v28, 1 }
 0x890   :  { %v3883_v31 = vadd.f32 %v3882_v29, %v3881_v27  ;;  %v3893_v32 = vadd.f32 %v3892_v30, %v3891_v28 }
 0x892   :  { %v3894_v33 = vadd.f32 %v3893_v32, %v3883_v31 }
 0x894   :  { %v3895_v34 = vmul.f32 0.125, %v3894_v33 }
 0x896   :  { %v3896_v35 = vadd.f32 1e-05, %v3895_v34 }
 0x898   :  { %9571 = vrsqrt.f32 %v3896_v35 }
 0x8a2   :  { %v9572_v36 = vpop.eup %9571 }
 0x8a3   :  { %v3900_v38 = vmul.f32 %v9572_v36, %v3875_v15  ;;  %v3915_v39 = vmul.f32 %v9572_v36, %v3885_v16  ;;  %v9554_v15 = vld [vmem:[%s10926_s16 + $0x28] sm:$0xff]  }
 0x8a5   :  { %v3907_v41 = vmul.f32 %v7810_v37, %v3900_v38  ;;  %v3916_v50 = vmul.f32 %v7810_v37, %v3915_v39 }
 0x8a7   :  { %v3914_v42 = vadd.f32 %v7811_v40, %v3907_v41  ;;  %v3917_v52 = vadd.f32 %v7811_v40, %v3916_v50  ;;  %v7853_v50 = vld [vmem:[%s10927_s19 + $0x8] sm:$0xf] }
 0x8a9   :  { %vm3918_vm14 = vcmp.ge.f32.partialorder %v3914_v42, 0.0  ;;  %v3919_v44 = vmul.f32 0.2, %v3914_v42  ;;  %v3922_v54 = vmul.f32 0.2, %v3917_v52  ;;  %vm3921_vm15 = vcmp.ge.f32.partialorder %v3917_v52, 0.0 }
 0x8ab   :  { %v3920_v45 = vsel %vm3918_vm14, %v3914_v42, %v3919_v44  ;;  %v3923_v55 = vsel %vm3921_vm15, %v3917_v52, %v3922_v54 }
 0x8ac   :  { %v3924_v46 = vpack.c.bf16 %v3920_v45, %v3920_v45  ;;  %v4352_v56 = vpack.c.bf16 %v3923_v55, %v3923_v55  ;;  %v4695_v45 = vld [vmem:[%s10927_s19 + $0x4] sm:$0xf]  ;;  %v4840_v55 = vsel %vm825_vm5, %v7853_v50, 0 }
 0x8ae   :  { %v3930_v48 = vsel %vm194_vm2, %v3924_v46, 0  ;;  %v4354_v58 = vsel %vm194_vm2, %v4352_v56, 0  ;;  %v7854_v46 = vld [vmem:[%s10927_s19 + $0xc] sm:$0xf] }
 0x8af   :  { %8809 = vmatpush3.bf16.msra.mxu1 %v3930_v48 }
 0x8b0   :  { %8814 = vmatprep.subr.bf16.mxu1 %v9589_v0 }
 0x8b2   :  { %8811 = vmatmul.mubr.msk.bf16.vlgmr.msra.gmra.mrb[160].mxu1 %vm190_vm3, %v3925_v49 }
 0x8b3   :  { %8815 = vmatpush3.bf16.msra.mxu1 %v3930_v48  ;;  %8816 = vmatprep.mubr.msk.bf16.mxu1 %vm9590_vm0, %v9589_v0 }
 0x8b4   :  { %8836 = vmatprep.subr.bf16.mxu1 %v9589_v0 }
 0x8ba   :  { %8817 = vmatmul.mubr.msk.bf16.vlgmr.msra.gmra.mrb[164].mxu1 %vm190_vm3, %v7813_v51 }
 0x8bb   :  { %8837 = vmatpush3.bf16.msra.mxu1 %v3930_v48  ;;  %8838 = vmatprep.mubr.msk.bf16.mxu1 %vm9590_vm0, %v9589_v0 }
 0x8bc   :  { %8850 = vmatprep.subr.bf16.mxu1 %v9589_v0 }
 0x8c2   :  { %8839 = vmatmul.mubr.msk.bf16.vlgmr.msra.gmra.mrb[168].mxu1 %vm190_vm3, %v7825_v53 }
 0x8c3   :  { %8851 = vmatpush3.bf16.msra.mxu1 %v3930_v48  ;;  %8852 = vmatprep.mubr.msk.bf16.mxu1 %vm9590_vm0, %v9589_v0  ;;  %v4702_v48 = vsel %vm825_vm5, %v4695_v45, 0 }
 0x8c4   :  { %8864 = vmatprep.subr.bf16.mxu1 %v9589_v0 }
 0x8ca   :  { %8853 = vmatmul.mubr.msk.bf16.vlgmr.msra.gmra.mrb[172].mxu1 %vm190_vm3, %v7834_v57 }
 0x8cb   :  { %8865 = vmatpush3.bf16.msra.mxu1 %v4354_v58  ;;  %8866 = vmatprep.mubr.msk.bf16.mxu1 %vm9590_vm0, %v9589_v0 }
 0x8cc   :  { %8870 = vmatprep.subr.bf16.mxu1 %v9589_v0 }
 0x8d2   :  { %8867 = vmatmul.mubr.msk.bf16.vlgmr.msra.gmra.mrb[176].mxu1 %vm190_vm3, %v3925_v49  ;;  %v4797_v49 = vsel %vm825_vm5, %v7854_v46, 0 }
 0x8d3   :  { %8871 = vmatpush3.bf16.msra.mxu1 %v4354_v58  ;;  %8872 = vmatprep.mubr.msk.bf16.mxu1 %vm9590_vm0, %v9589_v0 }
 0x8d4   :  { %8892 = vmatprep.subr.bf16.mxu1 %v9589_v0 }
 0x8da   :  { %8873 = vmatmul.mubr.msk.bf16.vlgmr.msra.gmra.mrb[180].mxu1 %vm190_vm3, %v7813_v51  ;;  %v4694_v51 = vld [vmem:[%s10927_s19] sm:$0xf] }
 0x8db   :  { %8893 = vmatpush3.bf16.msra.mxu1 %v4354_v58  ;;  %8894 = vmatprep.mubr.msk.bf16.mxu1 %vm9590_vm0, %v9589_v0  ;;  %v4748_v56 = vsel %vm825_vm5, %v4694_v51, 0 }
 0x8dc   :  { %8906 = vmatprep.subr.bf16.mxu1 %v9589_v0 }
 0x8e2   :  { %8895 = vmatmul.mubr.msk.bf16.vlgmr.msra.gmra.mrb[184].mxu1 %vm190_vm3, %v7825_v53 }
 0x8e3   :  { %8907 = vmatpush3.bf16.msra.mxu1 %v4354_v58  ;;  %8908 = vmatprep.mubr.msk.bf16.mxu1 %vm9590_vm0, %v9589_v0 }
 0x8e4   :  { %8920 = vmatprep.subr.bf16.mxu1 %v9589_v0 }
 0x8ea   :  { %8909 = vmatmul.mubr.msk.bf16.vlgmr.msra.gmra.mrb[188].mxu1 %vm190_vm3, %v7834_v57 }
 0x8eb   :  { %8922 = vmatprep.mubr.msk.bf16.mxu1 %vm9590_vm0, %v9589_v0  ;;  %8921 = vmatpush3.bf16.msra.mxu1 %v4702_v48 }
 0x8ec   :  { %8926 = vmatprep.subr.bf16.mxu1 %v9589_v0 }
 0x985   :  { %v3966_v61 = vpop.f32.mrb[160].mxu1 }
 0x986   :  { %v8812_v62 = vpop.f32.mrb[161].mxu1  ;;  %v3972_v14 = vpack.c.bf16 %v3966_v61, %v3966_v61 }
 0x987   :  { %v3969_v63 = vpop.f32.mrb[162].mxu1 }
 0x988   :  { %v8813_v1 = vpop.f32.mrb[163].mxu1 }
 0x98d   :  { %v4016_v2 = vpop.f32.mrb[164].mxu1 }
 0x98e   :  { %v4022_v4 = vpack.c.bf16 %v4016_v2, %v4016_v2  ;;  %v8818_v5 = vpop.f32.mrb[165].mxu1 }
 0x98f   :  { %v4019_v6 = vpop.f32.mrb[166].mxu1  ;;  %v10447_v5 = vpack.c.bf16 %v10161_v47, %v10161_v47  ;;  %v9591_v47 = vmov 0  }
 0x990   :  { %v8819_v7 = vpop.f32.mrb[167].mxu1  ;;  %8825 = vmatmul.mubr.msk.bf16.vlgmr.msra.gmra.mrb[40].mxu0 %vm1743_vm11, %v4022_v4  ;;  %9532 = vset.pattern.permute.xlu1 %v9591_v47 }
 0x991   :  { %8829 = vmatpush3.bf16.msra.mxu0 %v9551_v3  ;;  %8832 = vmatprep.mubr.msk.bf16.mxu0 %vm9590_vm0, %v9589_v0  ;;  %v10473_v7 = vsel %vm4895_vm4, 65535, %v9591_v47 }
 0x992   :  { %8830 = vmatprep.subr.bf16.mxu0 %v9589_v0  ;;  %9531 = vset.pattern.permute.xlu0 %v9591_v47 }
 0x995   :  { %8831 = vmatpush3.bf16.msra.mxu0 %v9552_v8  ;;  %v4177_v9 = vpop.f32.mrb[168].mxu1 }
 0x996   :  { %8842 = vmatprep.subr.bf16.mxu0 %v9589_v0  ;;  %v8840_v10 = vpop.f32.mrb[169].mxu1  ;;  %v4183_v20 = vpack.c.bf16 %v4177_v9, %v4177_v9 }
 0x997   :  { %v4180_v11 = vpop.f32.mrb[170].mxu1 }
 0x998   :  { %v8841_v12 = vpop.f32.mrb[171].mxu1 }
 0x99c   :  { %8833 = vmatmul.mubr.msk.bf16.vlgmr.msra.gmra.mrb[40].mxu0 %vm1743_vm11, %v3972_v14 }
 0x99d   :  { %8843 = vmatpush3.bf16.msra.mxu0 %v9553_v13  ;;  %8846 = vmatprep.mubr.msk.bf16.mxu0 %vm9590_vm0, %v9589_v0  ;;  %v4284_v16 = vpop.f32.mrb[172].mxu1 }
 0x99e   :  { %8844 = vmatprep.subr.bf16.mxu0 %v9589_v0  ;;  %v8854_v17 = vpop.f32.mrb[173].mxu1  ;;  %v4290_v30 = vpack.c.bf16 %v4284_v16, %v4284_v16 }
 0x99f   :  { %v4287_v18 = vpop.f32.mrb[174].mxu1 }
 0x9a0   :  { %v8855_v19 = vpop.f32.mrb[175].mxu1  ;;  %v10479_v18 = vld [vmem:[%s10928_s18 + $0x8] sm:$0xff]  }
 0x9a1   :  { %8845 = vmatpush3.bf16.msra.mxu0 %v9554_v15 }
 0x9a2   :  { %8856 = vmatprep.subr.bf16.mxu0 %v9589_v0 }
 0x9a5   :  { %v4390_v22 = vpop.f32.mrb[176].mxu1 }
 0x9a6   :  { %v8868_v23 = vpop.f32.mrb[177].mxu1  ;;  %v4396_v41 = vpack.c.bf16 %v4390_v22, %v4390_v22 }
 0x9a7   :  { %v4393_v24 = vpop.f32.mrb[178].mxu1 }
 0x9a8   :  { %8847 = vmatmul.mubr.msk.bf16.vlgmr.msra.gmra.mrb[40].mxu0 %vm1743_vm11, %v4183_v20  ;;  %v8869_v25 = vpop.f32.mrb[179].mxu1  ;;  %v9558_v20 = vld [vmem:[%s10928_s18] sm:$0xff]  }
 0x9a9   :  { %8857 = vmatpush3.bf16.msra.mxu0 %v9555_v21  ;;  %8860 = vmatprep.mubr.msk.bf16.mxu0 %vm9590_vm0, %v9589_v0 }
 0x9aa   :  { %8858 = vmatprep.subr.bf16.mxu0 %v9589_v0 }
 0x9ad   :  { %8859 = vmatpush3.bf16.msra.mxu0 %v9556_v26  ;;  %v4431_v27 = vpop.f32.mrb[180].mxu1 }
 0x9ae   :  { %8876 = vmatprep.subr.bf16.mxu0 %v9589_v0  ;;  %v8874_v28 = vpop.f32.mrb[181].mxu1  ;;  %v4437_v35 = vpack.c.bf16 %v4431_v27, %v4431_v27  ;;  %v7872_v27 = vld [vmem:[%s10927_s19 + $0x1c] sm:$0xf] }
 0x9af   :  { %v4434_v29 = vpop.f32.mrb[182].mxu1  ;;  %v9559_v28 = vld [vmem:[%s10928_s18 + $0x10] sm:$0xff]  }
 0x9b0   :  { %v8875_v31 = vpop.f32.mrb[183].mxu1  ;;  %v5145_v29 = vsel %vm825_vm5, %v7872_v27, 0 }
 0x9b4   :  { %8861 = vmatmul.mubr.msk.bf16.vlgmr.msra.gmra.mrb[40].mxu0 %vm1743_vm11, %v4290_v30  ;;  %v7871_v30 = vld [vmem:[%s10927_s19 + $0x18] sm:$0xf] }
 0x9b5   :  { %8877 = vmatpush3.bf16.msra.mxu0 %v9549_v59  ;;  %8880 = vmatprep.mubr.msk.bf16.mxu0 %vm9590_vm0, %v9589_v0  ;;  %v4558_v32 = vpop.f32.mrb[184].mxu1  ;;  %v7864_v59 = vld [vmem:[%s10927_s19 + $0x14] sm:$0xf]  ;;  %v5188_v31 = vsel %vm825_vm5, %v7871_v30, 0  ;;  %v10622_v30 = vld [vmem:[%s10930_s20 + $0x8] sm:$0xff]  }
 0x9b6   :  { %8878 = vmatprep.subr.bf16.mxu0 %v9589_v0  ;;  %v8896_v33 = vpop.f32.mrb[185].mxu1  ;;  %v4564_v42 = vpack.c.bf16 %v4558_v32, %v4558_v32  ;;  %v4998_v61 = vsel %vm825_vm5, %v7864_v59, 0  ;;  %v5812_v59 = vld [vmem:[%s10929_s21] sm:$0xf] }
 0x9b7   :  { %v4561_v34 = vpop.f32.mrb[186].mxu1 }
 0x9b8   :  { %v8897_v36 = vpop.f32.mrb[187].mxu1 }
 0x9b9   :  { %8879 = vmatpush3.bf16.msra.mxu0 %v10316_v60  ;;  %v10412_v60 = vpack.c.bf16 %v10159_v43, %v10159_v43  ;;  %v7863_v43 = vld [vmem:[%s10927_s19 + $0x10] sm:$0xf] }
 0x9ba   :  { %8884 = vmatprep.subr.bf16.mxu0 %v9589_v0  ;;  %v5041_v62 = vsel %vm825_vm5, %v7863_v43, 0 }
 0x9bc   :  { %8881 = vmatmul.mubr.msk.bf16.vlgmr.msra.gmra.mrb[44].mxu0 %vm1743_vm11, %v4437_v35 }
 0x9bd   :  { %8885 = vmatpush3.bf16.msra.mxu0 %v9551_v3  ;;  %8888 = vmatprep.mubr.msk.bf16.mxu0 %vm9590_vm0, %v9589_v0  ;;  %v4643_v37 = vpop.f32.mrb[188].mxu1 }
 0x9be   :  { %8886 = vmatprep.subr.bf16.mxu0 %v9589_v0  ;;  %v8910_v38 = vpop.f32.mrb[189].mxu1  ;;  %v4649_v44 = vpack.c.bf16 %v4643_v37, %v4643_v37 }
 0x9bf   :  { %v4646_v39 = vpop.f32.mrb[190].mxu1 }
 0x9c0   :  { %v8911_v40 = vpop.f32.mrb[191].mxu1 }
 0x9c1   :  { %8887 = vmatpush3.bf16.msra.mxu0 %v9552_v8 }
 0x9c2   :  { %8898 = vmatprep.subr.bf16.mxu0 %v9589_v0 }
 0x9c8   :  { %8889 = vmatmul.mubr.msk.bf16.vlgmr.msra.gmra.mrb[44].mxu0 %vm1743_vm11, %v4396_v41 }
 0x9c9   :  { %8899 = vmatpush3.bf16.msra.mxu0 %v9553_v13  ;;  %8902 = vmatprep.mubr.msk.bf16.mxu0 %vm9590_vm0, %v9589_v0 }
 0x9ca   :  { %8900 = vmatprep.subr.bf16.mxu0 %v9589_v0 }
 0x9cd   :  { %8901 = vmatpush3.bf16.msra.mxu0 %v9554_v15 }
 0x9ce   :  { %8912 = vmatprep.subr.bf16.mxu0 %v9589_v0 }
 0x9d4   :  { %8903 = vmatmul.mubr.msk.bf16.vlgmr.msra.gmra.mrb[44].mxu0 %vm1743_vm11, %v4564_v42 }
 0x9d5   :  { %8913 = vmatpush3.bf16.msra.mxu0 %v9555_v21  ;;  %8916 = vmatprep.mubr.msk.bf16.mxu0 %vm9590_vm0, %v9589_v0 }
 0x9d6   :  { %8914 = vmatprep.subr.bf16.mxu0 %v9589_v0 }
 0x9d9   :  { %8915 = vmatpush3.bf16.msra.mxu0 %v9556_v26 }
 0x9da   :  { %8932 = vmatprep.subr.bf16.mxu0 %v9589_v0 }
 0x9e0   :  { %8917 = vmatmul.mubr.msk.bf16.vlgmr.msra.gmra.mrb[44].mxu0 %vm1743_vm11, %v4649_v44 }
 0x9e1   :  { %8934 = vmatprep.mubr.msk.bf16.mxu0 %vm9590_vm0, %v9589_v0  ;;  %8933 = vmatpush3.bf16.msra.mxu0 %v4797_v49 }
 0x9e2   :  { %8938 = vmatprep.subr.bf16.mxu0 %v9589_v0 }
 0xa87   :  { %v4345_v52 = vpop.f32.mrb[40].mxu0 }
 0xa88   :  { %v10393_v53 = vpack.c.bf16 %v4345_v52, %v4345_v52  ;;  %v8862_v54 = vpop.f32.mrb[41].mxu0 }
 0xa89   :  { %v4348_v57 = vpop.f32.mrb[42].mxu0 }
 0xa8a   :  { %v8863_v58 = vpop.f32.mrb[43].mxu0  ;;  %8923 = vmatmul.mubr.msk.bf16.vlgmr.msra.gmra.mrb[192].mxu1 %vm821_vm6, %v10393_v53  ;;  %8935 = vmatmul.mubr.msk.bf16.vlgmr.msra.gmra.mrb[48].mxu0 %vm821_vm6, %v10393_v53 }
 0xa8b   :  { %8939 = vmatpush3.bf16.msra.mxu0 %v4840_v55  ;;  %8927 = vmatpush3.bf16.msra.mxu1 %v4748_v56 }
 0xa8c   :  { %8928 = vmatprep.mubr.msk.bf16.mxu1 %vm9590_vm0, %v9589_v0  ;;  %8940 = vmatprep.mubr.msk.bf16.mxu0 %vm9590_vm0, %v9589_v0 }
 0xa8d   :  { %8956 = vmatprep.subr.bf16.mxu0 %v9589_v0  ;;  %8944 = vmatprep.subr.bf16.mxu1 %v9589_v0 }
 0xa96   :  { %8929 = vmatmul.mubr.msk.bf16.vlgmr.msra.gmra.mrb[192].mxu1 %vm821_vm6, %v10412_v60  ;;  %8941 = vmatmul.mubr.msk.bf16.vlgmr.msra.gmra.mrb[48].mxu0 %vm821_vm6, %v10412_v60 }
 0xa97   :  { %8957 = vmatpush3.bf16.msra.mxu0 %v4998_v61  ;;  %8958 = vmatprep.mubr.msk.bf16.mxu0 %vm9590_vm0, %v9589_v0 }
 0xa98   :  { %8962 = vmatprep.subr.bf16.mxu0 %v9589_v0  ;;  %8946 = vmatprep.mubr.msk.bf16.mxu1 %vm9590_vm0, %v9589_v0 }
 0xa9e   :  { %8959 = vmatmul.mubr.msk.bf16.vlgmr.msra.gmra.mrb[52].mxu0 %vm821_vm6, %v10393_v53 }
 0xa9f   :  { %8963 = vmatpush3.bf16.msra.mxu0 %v5041_v62  ;;  %8964 = vmatprep.mubr.msk.bf16.mxu0 %vm9590_vm0, %v9589_v0 }
 0xaa0   :  { %8992 = vmatprep.subr.bf16.mxu0 %v9589_v0 }
 0xaaa   :  { %8965 = vmatmul.mubr.msk.bf16.vlgmr.msra.gmra.mrb[52].mxu0 %vm821_vm6, %v10412_v60 }
 0xaab   :  { %8993 = vmatpush3.bf16.msra.mxu0 %v4702_v48  ;;  %8994 = vmatprep.mubr.msk.bf16.mxu0 %vm9590_vm0, %v9589_v0 }
 0xaac   :  { %8998 = vmatprep.subr.bf16.mxu0 %v9589_v0 }
 0xab3   :  { %v4687_v63 = vpop.f32.mrb[44].mxu0 }
 0xab4   :  { %v10438_v1 = vpack.c.bf16 %v4687_v63, %v4687_v63  ;;  %v8918_v2 = vpop.f32.mrb[45].mxu0 }
 0xab5   :  { %v4690_v3 = vpop.f32.mrb[46].mxu0 }
 0xab6   :  { %8995 = vmatmul.mubr.msk.bf16.vlgmr.msra.gmra.mrb[56].mxu0 %vm821_vm6, %v10438_v1  ;;  %v8919_v4 = vpop.f32.mrb[47].mxu0  ;;  %v7892_v3 = vld [vmem:[%s10929_s21 + $0x4] sm:$0xf] }
 0xab7   :  { %8999 = vmatpush3.bf16.msra.mxu0 %v4748_v56  ;;  %9000 = vmatprep.mubr.msk.bf16.mxu0 %vm9590_vm0, %v9589_v0 }
 0xab8   :  { %9004 = vmatprep.subr.bf16.mxu0 %v9589_v0 }
 0xac2   :  { %9001 = vmatmul.mubr.msk.bf16.vlgmr.msra.gmra.mrb[56].mxu0 %vm821_vm6, %v10447_v5 }
 0xac3   :  { %9005 = vmatpush3.bf16.msra.mxu0 %v4797_v49  ;;  %9006 = vmatprep.mubr.msk.bf16.mxu0 %vm9590_vm0, %v9589_v0 }
 0xac4   :  { %9010 = vmatprep.subr.bf16.mxu0 %v9589_v0 }
 0xaca   :  { %9007 = vmatmul.mubr.msk.bf16.vlgmr.msra.gmra.mrb[60].mxu0 %vm821_vm6, %v10438_v1 }
 0xacb   :  { %9011 = vmatpush3.bf16.msra.mxu0 %v4840_v55  ;;  %9012 = vmatprep.mubr.msk.bf16.mxu0 %vm9590_vm0, %v9589_v0 }
 0xacc   :  { %9028 = vmatprep.subr.bf16.mxu0 %v9589_v0 }
 0xad6   :  { %9013 = vmatmul.mubr.msk.bf16.vlgmr.msra.gmra.mrb[60].mxu0 %vm821_vm6, %v10447_v5 }
 0xad7   :  { %9029 = vmatpush3.bf16.msra.mxu0 %v4998_v61  ;;  %9030 = vmatprep.mubr.msk.bf16.mxu0 %vm9590_vm0, %v9589_v0 }
 0xad8   :  { %9034 = vmatprep.subr.bf16.mxu0 %v9589_v0 }
 0xade   :  { %9031 = vmatmul.mubr.msk.bf16.vlgmr.msra.gmra.mrb[64].mxu0 %vm821_vm6, %v10438_v1 }
 0xadf   :  { %9035 = vmatpush3.bf16.msra.mxu0 %v5041_v62  ;;  %9036 = vmatprep.mubr.msk.bf16.mxu0 %vm9590_vm0, %v9589_v0 }
 0xae0   :  { %9064 = vmatprep.subr.bf16.mxu0 %v9589_v0 }
 0xaea   :  { %9037 = vmatmul.mubr.msk.bf16.vlgmr.msra.gmra.mrb[64].mxu0 %vm821_vm6, %v10447_v5 }
 0xaeb   :  { %9066 = vmatprep.mubr.msk.bf16.mxu0 %vm9590_vm0, %v9589_v0 }
 0xb69   :  { %v4784_v6 = vpop.f32.mrb[192].mxu1  ;;  %v4876_v8 = vpop.f32.mrb[48].mxu0 }
 0xb6a   :  { %v4885_v9 = vpack.c.bf16 %v4876_v8, %v4876_v8  ;;  %v8930_v10 = vpop.f32.mrb[193].mxu1  ;;  %v8942_v11 = vpop.f32.mrb[49].mxu0  ;;  %v4792_v14 = vpack.c.bf16 %v4784_v6, %v4784_v6  ;;  %v10563_v6 = vsel %vm825_vm5, %v7892_v3, 0 }
 0xb6b   :  { %v4787_v12 = vpop.f32.mrb[194].mxu1  ;;  %v4879_v13 = vpop.f32.mrb[50].mxu0 }
 0xb6c   :  { %v4899_v15 = vand.u32 %v10473_v7, %v4885_v9  ;;  %v8931_v16 = vpop.f32.mrb[195].mxu1  ;;  %v8943_v17 = vpop.f32.mrb[51].mxu0  ;;  %v4951_v19 = vand.u32 %v10473_v7, %v4792_v14  ;;  %v7906_v14 = vld [vmem:[%s10929_s21 + $0x8] sm:$0xf] }
 0xb6d   :  { %v10601_v17 = vld [vmem:[%s10930_s20 + $0x10] sm:$0xff]  }
 0xb6e   :  { %8945 = vmatpush3.bf16.msra.mxu1 %v4899_v15  ;;  %v10576_v15 = vsel %vm825_vm5, %v7906_v14, 0 }
 0xb6f   :  { %8950 = vmatprep.subr.bf16.mxu1 %v9589_v0 }
 0xb71   :  { %8947 = vmatmul.mubr.msk.bf16.vlgmr.msra.gmra.mrb[196].mxu1 %vm4891_vm7, %v10479_v18 }
 0xb72   :  { %8951 = vmatpush3.bf16.msra.mxu1 %v4951_v19  ;;  %8952 = vmatprep.mubr.msk.bf16.mxu1 %vm9590_vm0, %v9589_v0 }
 0xb73   :  { %8968 = vmatprep.subr.bf16.mxu1 %v9589_v0 }
 0xb7d   :  { %8953 = vmatmul.mubr.msk.bf16.vlgmr.msra.gmra.mrb[196].mxu1 %vm4891_vm7, %v9558_v20  ;;  %v5077_v21 = vpop.f32.mrb[52].mxu0 }
 0xb7e   :  { %v5086_v22 = vpack.c.bf16 %v5077_v21, %v5077_v21  ;;  %v8966_v23 = vpop.f32.mrb[53].mxu0  ;;  %8970 = vmatprep.mubr.msk.bf16.mxu1 %vm9590_vm0, %v9589_v0 }
 0xb7f   :  { %v5080_v24 = vpop.f32.mrb[54].mxu0 }
 0xb80   :  { %v5096_v25 = vand.u32 %v5086_v22, %v10473_v7  ;;  %v8967_v26 = vpop.f32.mrb[55].mxu0 }
 0xb82   :  { %8969 = vmatpush3.bf16.msra.mxu1 %v5096_v25 }
 0xb83   :  { %8974 = vmatprep.subr.bf16.mxu1 %v9589_v0 }
 0xb89   :  { %8971 = vmatmul.mubr.msk.bf16.vlgmr.msra.gmra.mrb[196].mxu1 %vm4891_vm7, %v9559_v28 }
 0xb8a   :  { %8975 = vmatpush3.bf16.msra.mxu1 %v5145_v29  ;;  %8976 = vmatprep.mubr.msk.bf16.mxu1 %vm9590_vm0, %v9589_v0 }
 0xb8b   :  { %8980 = vmatprep.subr.bf16.mxu1 %v9589_v0 }
 0xb91   :  { %8977 = vmatmul.mubr.msk.bf16.vlgmr.msra.gmra.mrb[200].mxu1 %vm821_vm6, %v10393_v53  ;;  %v9560_v53 = vld [vmem:[%s10928_s18 + $0x18] sm:$0xff]  }
 0xb92   :  { %8981 = vmatpush3.bf16.msra.mxu1 %v5188_v31  ;;  %8982 = vmatprep.mubr.msk.bf16.mxu1 %vm9590_vm0, %v9589_v0 }
 0xb93   :  { %8986 = vmatprep.subr.bf16.mxu1 %v9589_v0 }
 0xb95   :  { %v5370_v32 = vpop.f32.mrb[56].mxu0 }
 0xb96   :  { %v9002_v33 = vpop.f32.mrb[57].mxu0  ;;  %v5376_v55 = vpack.c.bf16 %v5370_v32, %v5370_v32 }
 0xb97   :  { %v5373_v34 = vpop.f32.mrb[58].mxu0 }
 0xb98   :  { %v9003_v35 = vpop.f32.mrb[59].mxu0  ;;  %v5503_v56 = vand.u32 %v5376_v55, %v10473_v7  ;;  %v9568_v55 = vld [vmem:[%s10930_s20 + $0x38] sm:$0xff]  }
 0xb9d   :  { %8983 = vmatmul.mubr.msk.bf16.vlgmr.msra.gmra.mrb[200].mxu1 %vm821_vm6, %v10412_v60  ;;  %v5818_v60 = vsel %vm825_vm5, %v5812_v59, 0 }
 0xb9e   :  { %8988 = vmatprep.mubr.msk.bf16.mxu1 %vm9590_vm0, %v9589_v0  ;;  %9065 = vmatpush3.bf16.msra.mxu0 %v5818_v60 }
 0xb9f   :  { %9070 = vmatprep.subr.bf16.mxu0 %v9589_v0 }
 0xba9   :  { %v5451_v36 = vpop.f32.mrb[60].mxu0 }
 0xbaa   :  { %v9014_v37 = vpop.f32.mrb[61].mxu0  ;;  %v5457_v50 = vpack.c.bf16 %v5451_v36, %v5451_v36 }
 0xbab   :  { %v5454_v38 = vpop.f32.mrb[62].mxu0 }
 0xbac   :  { %v9015_v39 = vpop.f32.mrb[63].mxu0  ;;  %v5459_v54 = vand.u32 %v5457_v50, %v10473_v7 }
 0xbbd   :  { %v5620_v40 = vpop.f32.mrb[64].mxu0 }
 0xbbe   :  { %v9038_v41 = vpop.f32.mrb[65].mxu0  ;;  %v5626_v57 = vpack.c.bf16 %v5620_v40, %v5620_v40 }
 0xbbf   :  { %v5623_v42 = vpop.f32.mrb[66].mxu0 }
 0xbc0   :  { %v9039_v44 = vpop.f32.mrb[67].mxu0  ;;  %v5628_v58 = vand.u32 %v5626_v57, %v10473_v7 }
 0xc70   :  { %v5224_v45 = vpop.f32.mrb[200].mxu1 }
 0xc71   :  { %v5233_v46 = vpack.c.bf16 %v5224_v45, %v5224_v45  ;;  %v8984_v48 = vpop.f32.mrb[201].mxu1 }
 0xc72   :  { %v5227_v49 = vpop.f32.mrb[202].mxu1  ;;  %v10641_v48 = vld [vmem:[%s10930_s20 + $0x28] sm:$0xff]  }
 0xc73   :  { %v5243_v51 = vand.u32 %v5233_v46, %v10473_v7  ;;  %v8985_v52 = vpop.f32.mrb[203].mxu1  ;;  %v10646_v49 = vld [vmem:[%s10930_s20 + $0x30] sm:$0xff]  }
 0xc75   :  { %8987 = vmatpush3.bf16.msra.mxu1 %v5243_v51 }
 0xc76   :  { %9016 = vmatprep.subr.bf16.mxu1 %v9589_v0 }
 0xc78   :  { %8989 = vmatmul.mubr.msk.bf16.vlgmr.msra.gmra.mrb[196].mxu1 %vm4891_vm7, %v9560_v53 }
 0xc79   :  { %9017 = vmatpush3.bf16.msra.mxu1 %v5459_v54  ;;  %9018 = vmatprep.mubr.msk.bf16.mxu1 %vm9590_vm0, %v9589_v0 }
 0xc7a   :  { %9022 = vmatprep.subr.bf16.mxu1 %v9589_v0 }
 0xc80   :  { %9019 = vmatmul.mubr.msk.bf16.vlgmr.msra.gmra.mrb[204].mxu1 %vm4891_vm7, %v10479_v18 }
 0xc81   :  { %9023 = vmatpush3.bf16.msra.mxu1 %v5503_v56  ;;  %9024 = vmatprep.mubr.msk.bf16.mxu1 %vm9590_vm0, %v9589_v0 }
 0xc82   :  { %9040 = vmatprep.subr.bf16.mxu1 %v9589_v0 }
 0xc8c   :  { %9025 = vmatmul.mubr.msk.bf16.vlgmr.msra.gmra.mrb[204].mxu1 %vm4891_vm7, %v9558_v20 }
 0xc8d   :  { %9041 = vmatpush3.bf16.msra.mxu1 %v5628_v58  ;;  %9042 = vmatprep.mubr.msk.bf16.mxu1 %vm9590_vm0, %v9589_v0 }
 0xc8e   :  { %9046 = vmatprep.subr.bf16.mxu1 %v9589_v0 }
 0xc98   :  { %9043 = vmatmul.mubr.msk.bf16.vlgmr.msra.gmra.mrb[204].mxu1 %vm4891_vm7, %v9559_v28  ;;  %v10608_v28 = vld [vmem:[%s10930_s20 + $0x18] sm:$0xff]  }
 0xc99   :  { %9047 = vmatpush3.bf16.msra.mxu1 %v5145_v29  ;;  %9048 = vmatprep.mubr.msk.bf16.mxu1 %vm9590_vm0, %v9589_v0  ;;  %v10613_v29 = vld [vmem:[%s10930_s20] sm:$0xff]  }
 0xc9a   :  { %9052 = vmatprep.subr.bf16.mxu1 %v9589_v0 }
 0xca0   :  { %9049 = vmatmul.mubr.msk.bf16.vlgmr.msra.gmra.mrb[208].mxu1 %vm821_vm6, %v10438_v1 }
 0xca1   :  { %9053 = vmatpush3.bf16.msra.mxu1 %v5188_v31  ;;  %9054 = vmatprep.mubr.msk.bf16.mxu1 %vm9590_vm0, %v9589_v0  ;;  %v10627_v31 = vld [vmem:[%s10930_s20 + $0x20] sm:$0xff]  }
 0xca2   :  { %9058 = vmatprep.subr.bf16.mxu1 %v9589_v0 }
 0xcac   :  { %9055 = vmatmul.mubr.msk.bf16.vlgmr.msra.gmra.mrb[208].mxu1 %vm821_vm6, %v10447_v5 }
 0xcad   :  { %9060 = vmatprep.mubr.msk.bf16.mxu1 %vm9590_vm0, %v9589_v0 }
 0xd4b   :  { %v5279_v61 = vpop.f32.mrb[196].mxu1 }
 0xd4c   :  { %v5802_v43 = vmul.f32 0.2, %v5279_v61  ;;  %v8990_v62 = vpop.f32.mrb[197].mxu1  ;;  %vm5800_vm8 = vcmp.ge.f32.partialorder %v5279_v61, 0.0 }
 0xd4d   :  { %v5282_v63 = vpop.f32.mrb[198].mxu1 }
 0xd4e   :  { %vm5801_vm9 = vcmp.ge.f32.partialorder %v5282_v63, 0.0  ;;  %v5803_v1 = vmul.f32 0.2, %v5282_v63  ;;  %v8991_v2 = vpop.f32.mrb[199].mxu1  ;;  %v5804_v4 = vsel %vm5800_vm8, %v5279_v61, %v5802_v43 }
 0xd50   :  { %v5805_v5 = vsel %vm5801_vm9, %v5282_v63, %v5803_v1 }
 0xd51   :  { %v5813_v47 = vpack.c.bf16 %v5805_v5, %v5804_v4 }
 0xd53   :  { %9067 = vmatmul.mubr.msk.bf16.vlgmr.msra.gmra.mrb[68].mxu0 %vm821_vm6, %v5813_v47 }
 0xd54   :  { %9071 = vmatpush3.bf16.msra.mxu0 %v10563_v6  ;;  %9072 = vmatprep.mubr.msk.bf16.mxu0 %vm9590_vm0, %v9589_v0 }
 0xd5b   :  { %9073 = vmatmul.mubr.msk.bf16.vlgmr.msra.gmra.mrb[72].mxu0 %vm821_vm6, %v5813_v47 }
 0xd5c   :  { %9078 = vmatprep.mubr.msk.bf16.mxu0 %vm96_vm1, %v10601_v17 }
 0xd7f   :  { %v5747_v8 = vpop.f32.mrb[208].mxu1 }
 0xd80   :  { %v5753_v9 = vpack.c.bf16 %v5747_v8, %v5747_v8  ;;  %v9056_v10 = vpop.f32.mrb[209].mxu1 }
 0xd81   :  { %v5750_v11 = vpop.f32.mrb[210].mxu1 }
 0xd82   :  { %v5755_v12 = vand.u32 %v5753_v9, %v10473_v7  ;;  %v9057_v13 = vpop.f32.mrb[211].mxu1  ;;  %v7916_v7 = vld [vmem:[%s10929_s21 + $0xc] sm:$0xf] }
 0xd83   :  { %v10587_v16 = vsel %vm825_vm5, %v7916_v7, 0 }
 0xd84   :  { %9059 = vmatpush3.bf16.msra.mxu1 %v5755_v12 }
 0xd85   :  { %9088 = vmatprep.subr.bf16.mxu1 %v9589_v0 }
 0xd87   :  { %9061 = vmatmul.mubr.msk.bf16.vlgmr.msra.gmra.mrb[204].mxu1 %vm4891_vm7, %v9560_v53 }
 0xd88   :  { %9089 = vmatpush3.bf16.msra.mxu1 %v10576_v15  ;;  %9090 = vmatprep.mubr.msk.bf16.mxu1 %vm9590_vm0, %v9589_v0 }
 0xd89   :  { %9100 = vmatprep.subr.bf16.mxu1 %v9589_v0 }
 0xd8f   :  { %9091 = vmatmul.mubr.msk.bf16.vlgmr.msra.gmra.mrb[212].mxu1 %vm821_vm6, %v5813_v47 }
 0xd90   :  { %9101 = vmatpush3.bf16.msra.mxu1 %v10587_v16  ;;  %9102 = vmatprep.mubr.msk.bf16.mxu1 %vm9590_vm0, %v9589_v0 }
 0xd91   :  { %9112 = vmatprep.subr.bf16.mxu1 %v9589_v0 }
 0xd97   :  { %9103 = vmatmul.mubr.msk.bf16.vlgmr.msra.gmra.mrb[216].mxu1 %vm821_vm6, %v5813_v47 }
 0xd98   :  { %9113 = vmatpush3.bf16.msra.mxu1 %v5818_v60  ;;  %9114 = vmatprep.mubr.msk.bf16.mxu1 %vm9590_vm0, %v9589_v0 }
 0xd99   :  { %9118 = vmatprep.subr.bf16.mxu1 %v9589_v0 }
 0xe26   :  { %v5854_v18 = vpop.f32.mrb[68].mxu0 }
 0xe27   :  { %v9068_v19 = vpop.f32.mrb[69].mxu0 }
 0xe28   :  { %v5857_v20 = vpop.f32.mrb[70].mxu0 }
 0xe29   :  { %v5865_v21 = vpack.c.bf16 %v5857_v20, %v5854_v18  ;;  %v9069_v22 = vpop.f32.mrb[71].mxu0 }
 0xe2e   :  { %v5905_v23 = vpop.f32.mrb[72].mxu0 }
 0xe2f   :  { %v9074_v24 = vpop.f32.mrb[73].mxu0 }
 0xe30   :  { %v5908_v25 = vpop.f32.mrb[74].mxu0 }
 0xe31   :  { %v5917_v26 = vpack.c.bf16 %v5908_v25, %v5905_v23  ;;  %v9075_v27 = vpop.f32.mrb[75].mxu0 }
 0xe32   :  { %v6763_v27 = vld [vmem:[%s10931_s22 + $0x8] sm:$0xff] }
 0xe33   :  { %9076 = vmatprep.subr.bf16.mxu0 %v5917_v26 }
 0xe34   :  { %9077 = vmatpush3.bf16.msra.mxu0 %v5917_v26 }
 0xe35   :  { %9082 = vmatprep.subr.bf16.mxu0 %v5865_v21 }
 0xe37   :  { %9079 = vmatmul.mubr.msk.bf16.vlgmr.msra.gmra.mrb[76].mxu0 %vm96_vm1, %v10608_v28 }
 0xe38   :  { %9083 = vmatpush3.bf16.msra.mxu0 %v5865_v21  ;;  %9084 = vmatprep.mubr.msk.bf16.mxu0 %vm96_vm1, %v10613_v29 }
 0xe43   :  { %9085 = vmatmul.mubr.msk.bf16.vlgmr.msra.gmra.mrb[76].mxu0 %vm96_vm1, %v10622_v30 }
 0xe44   :  { %9096 = vmatprep.mubr.msk.bf16.mxu0 %vm96_vm1, %v10627_v31 }
 0xe5a   :  { %v5791_v32 = vpop.f32.mrb[204].mxu1 }
 0xe5b   :  { %v5808_v33 = vmul.f32 0.2, %v5791_v32  ;;  %v9062_v34 = vpop.f32.mrb[205].mxu1  ;;  %vm5806_vm5 = vcmp.ge.f32.partialorder %v5791_v32, 0.0 }
 0xe5c   :  { %v5794_v35 = vpop.f32.mrb[206].mxu1 }
 0xe5d   :  { %vm5807_vm10 = vcmp.ge.f32.partialorder %v5794_v35, 0.0  ;;  %v5809_v36 = vmul.f32 0.2, %v5794_v35  ;;  %v9063_v37 = vpop.f32.mrb[207].mxu1  ;;  %v5810_v38 = vsel %vm5806_vm5, %v5791_v32, %v5808_v33  ;;  %v6768_v32 = vld [vmem:[%s10932_s23 + $0x10] sm:$0xff] }
 0xe5f   :  { %v5811_v39 = vsel %vm5807_vm10, %v5794_v35, %v5809_v36 }
 0xe60   :  { %v6290_v40 = vpack.c.bf16 %v5811_v39, %v5810_v38 }
 0xe62   :  { %v6087_v41 = vpop.f32.mrb[212].mxu1  ;;  %9115 = vmatmul.mubr.msk.bf16.vlgmr.msra.gmra.mrb[220].mxu1 %vm821_vm6, %v6290_v40 }
 0xe63   :  { %v9092_v42 = vpop.f32.mrb[213].mxu1  ;;  %9119 = vmatpush3.bf16.msra.mxu1 %v10563_v6  ;;  %9120 = vmatprep.mubr.msk.bf16.mxu1 %vm9590_vm0, %v9589_v0 }
 0xe64   :  { %v6090_v44 = vpop.f32.mrb[214].mxu1  ;;  %9136 = vmatprep.subr.bf16.mxu1 %v9589_v0 }
 0xe65   :  { %v6099_v45 = vpack.c.bf16 %v6090_v44, %v6087_v41  ;;  %v9093_v46 = vpop.f32.mrb[215].mxu1 }
 0xe67   :  { %9094 = vmatprep.subr.bf16.mxu0 %v6099_v45 }
 0xe68   :  { %9095 = vmatpush3.bf16.msra.mxu0 %v6099_v45 }
 0xe6a   :  { %v6208_v50 = vpop.f32.mrb[216].mxu1  ;;  %9121 = vmatmul.mubr.msk.bf16.vlgmr.msra.gmra.mrb[224].mxu1 %vm821_vm6, %v6290_v40 }
 0xe6b   :  { %v9104_v51 = vpop.f32.mrb[217].mxu1  ;;  %9137 = vmatpush3.bf16.msra.mxu1 %v10576_v15  ;;  %9097 = vmatmul.mubr.msk.bf16.vlgmr.msra.gmra.mrb[76].mxu0 %vm96_vm1, %v10641_v48 }
 0xe6c   :  { %v6211_v52 = vpop.f32.mrb[218].mxu1  ;;  %9138 = vmatprep.mubr.msk.bf16.mxu1 %vm9590_vm0, %v9589_v0  ;;  %9148 = vmatprep.subr.bf16.mxu1 %v9589_v0 }
 0xe6d   :  { %v6220_v53 = vpack.c.bf16 %v6211_v52, %v6208_v50  ;;  %v9105_v54 = vpop.f32.mrb[219].mxu1  ;;  %9108 = vmatprep.mubr.msk.bf16.mxu0 %vm96_vm1, %v10646_v49 }
 0xe6f   :  { %9106 = vmatprep.subr.bf16.mxu0 %v6220_v53 }
 0xe70   :  { %9107 = vmatpush3.bf16.msra.mxu0 %v6220_v53 }
 0xe72   :  { %9139 = vmatmul.mubr.msk.bf16.vlgmr.msra.gmra.mrb[228].mxu1 %vm821_vm6, %v6290_v40 }
 0xe73   :  { %9149 = vmatpush3.bf16.msra.mxu1 %v10587_v16  ;;  %9150 = vmatprep.mubr.msk.bf16.mxu1 %vm9590_vm0, %v9589_v0 }
 0xe77   :  { %9109 = vmatmul.mubr.msk.bf16.vlgmr.msra.gmra.mrb[76].mxu0 %vm96_vm1, %v9568_v55 }
 0xe78   :  { %9126 = vmatprep.mubr.msk.bf16.mxu0 %vm96_vm1, %v10601_v17 }
 0xe7a   :  { %9151 = vmatmul.mubr.msk.bf16.vlgmr.msra.gmra.mrb[232].mxu1 %vm821_vm6, %v6290_v40 }
 0xf35   :  { %v6328_v56 = vpop.f32.mrb[220].mxu1 }
 0xf36   :  { %v9116_v57 = vpop.f32.mrb[221].mxu1 }
 0xf37   :  { %v6331_v58 = vpop.f32.mrb[222].mxu1 }
 0xf38   :  { %v6335_v59 = vpack.c.bf16 %v6331_v58, %v6328_v56  ;;  %v9117_v60 = vpop.f32.mrb[223].mxu1 }
 0xf3d   :  { %v6370_v61 = vpop.f32.mrb[224].mxu1 }
 0xf3e   :  { %v9122_v43 = vpop.f32.mrb[225].mxu1 }
 0xf3f   :  { %v6373_v62 = vpop.f32.mrb[226].mxu1 }
 0xf40   :  { %v6377_v63 = vpack.c.bf16 %v6373_v62, %v6370_v61  ;;  %v9123_v1 = vpop.f32.mrb[227].mxu1 }
 0xf42   :  { %9124 = vmatprep.subr.bf16.mxu0 %v6377_v63 }
 0xf43   :  { %9125 = vmatpush3.bf16.msra.mxu0 %v6377_v63 }
 0xf44   :  { %9130 = vmatprep.subr.bf16.mxu0 %v6335_v59 }
 0xf45   :  { %v6510_v2 = vpop.f32.mrb[228].mxu1 }
 0xf46   :  { %9127 = vmatmul.mubr.msk.bf16.vlgmr.msra.gmra.mrb[80].mxu0 %vm96_vm1, %v10608_v28  ;;  %v9140_v3 = vpop.f32.mrb[229].mxu1  ;;  %v6764_v28 = vld [vmem:[%s10931_s22 + $0x10] sm:$0xff] }
 0xf47   :  { %9131 = vmatpush3.bf16.msra.mxu0 %v6335_v59  ;;  %v6513_v4 = vpop.f32.mrb[230].mxu1  ;;  %9132 = vmatprep.mubr.msk.bf16.mxu0 %vm96_vm1, %v10613_v29  ;;  %v6765_v29 = vld [vmem:[%s10931_s22 + $0x18] sm:$0xff] }
 0xf48   :  { %v6517_v5 = vpack.c.bf16 %v6513_v4, %v6510_v2  ;;  %v9141_v47 = vpop.f32.mrb[231].mxu1 }
 0xf4a   :  { %9142 = vmatprep.subr.bf16.mxu0 %v6517_v5  ;;  %v9110_v6 = vpop.f32.mrb[76].mxu0 }
 0xf4b   :  { %v6672_v8 = vsel %vm190_vm3, %v9110_v6, 0.0  ;;  %v10673_v9 = vpop.f32.mrb[77].mxu0 }
 0xf4c   :  { %6673 = vadd.xlane.f32.xlu0 %v6672_v8  ;;  %v10675_v10 = vpop.f32.mrb[78].mxu0  ;;  %v6666_v12 = vsel %vm190_vm3, %v10673_v9, 0.0 }
 0xf4d   :  { %v6605_v11 = vpop.f32.mrb[232].mxu1  ;;  %v10679_v13 = vpop.f32.mrb[79].mxu0  ;;  %v6675_v14 = vsel %vm190_vm3, %v10675_v10, 0.0 }
 0xf4e   :  { %v9152_v15 = vpop.f32.mrb[233].mxu1  ;;  %6676 = vadd.xlane.f32.xlu1 %v6675_v14  ;;  %v6669_v18 = vsel %vm190_vm3, %v10679_v13, 0.0 }
 0xf4f   :  { %v6608_v7 = vpop.f32.mrb[234].mxu1  ;;  %v10783_v15 = vld [vmem:[%s10933_s25 + $0x2] sm:$0x3] }
 0xf50   :  { %v6612_v16 = vpack.c.bf16 %v6608_v7, %v6605_v11  ;;  %v9153_v17 = vpop.f32.mrb[235].mxu1  ;;  %6667 = vadd.xlane.f32.xlu0 %v6666_v12  ;;  %v6769_v11 = vld [vmem:[%s10932_s23 + $0x18] sm:$0xff]  ;;  %v6762_v12 = vld [vmem:[%s10931_s22] sm:$0xff] }
 0xf52   :  { %9133 = vmatmul.mubr.msk.bf16.vlgmr.msra.gmra.mrb[80].mxu0 %vm96_vm1, %v10622_v30  ;;  %v6766_v30 = vld [vmem:[%s10932_s23] sm:$0xff] }
 0xf53   :  { %9143 = vmatpush3.bf16.msra.mxu0 %v6517_v5  ;;  %9144 = vmatprep.mubr.msk.bf16.mxu0 %vm96_vm1, %v10627_v31  ;;  %v6767_v31 = vld [vmem:[%s10932_s23 + $0x8] sm:$0xff] }
 0xf54   :  { %9154 = vmatprep.subr.bf16.mxu0 %v6612_v16  ;;  %6670 = vadd.xlane.f32.xlu0 %v6669_v18 }
 0xf5e   :  { %9145 = vmatmul.mubr.msk.bf16.vlgmr.msra.gmra.mrb[80].mxu0 %vm96_vm1, %v10641_v48 }
 0xf5f   :  { %9155 = vmatpush3.bf16.msra.mxu0 %v6612_v16  ;;  %9156 = vmatprep.mubr.msk.bf16.mxu0 %vm96_vm1, %v10646_v49 }
 0xf60   :  { %9172 = vmatprep.subr.bf16.mxu0 %v9589_v0 }
 0xf6a   :  { %9157 = vmatmul.mubr.msk.bf16.vlgmr.msra.gmra.mrb[80].mxu0 %vm96_vm1, %v9568_v55 }
 0xf6b   :  { %9176 = vmatprep.mubr.msk.bf16.mxu0 %vm9590_vm0, %v9589_v0 }
 0xfd9   :  { %v6674_v33 = vpop.xlane.xlu0 %6673 }
 0xfdb   :  { %v6677_v36 = vpop.xlane.xlu1 %6676 }
 0xfdd   :  { %v6668_v34 = vpop.xlane.xlu0 %6667 }
 0xfe1   :  { %v6671_v35 = vpop.xlane.xlu0 %6670 }
0x103d   :  { %v9158_v19 = vpop.f32.mrb[80].mxu0 }
0x103e   :  { %v6647_v20 = vpop.f32.mrb[81].mxu0  ;;  %v6688_v21 = vsel %vm190_vm3, %v9158_v19, 0.0 }
0x103f   :  { %6689 = vadd.xlane.f32.xlu0 %v6688_v21  ;;  %v9159_v22 = vpop.f32.mrb[82].mxu0  ;;  %v6682_v23 = vsel %vm190_vm3, %v6647_v20, 0.0 }
0x1040   :  { %6683 = vadd.xlane.f32.xlu1 %v6682_v23  ;;  %v6650_v24 = vpop.f32.mrb[83].mxu0  ;;  %v6691_v25 = vsel %vm190_vm3, %v9159_v22, 0.0 }
0x1041   :  { %v6685_v26 = vsel %vm190_vm3, %v6650_v24, 0.0 }
0x1044   :  { %6692 = vadd.xlane.f32.xlu1 %v6691_v25 }
0x1048   :  { %6686 = vadd.xlane.f32.xlu1 %v6685_v26 }
0x1059   :  { %6781 = vperm.xlu1 %9532, %v6763_v27  }
0x105d   :  { %6786 = vperm.xlu1 %9532, %v6764_v28  }
0x1061   :  { %6791 = vperm.xlu1 %9532, %v6765_v29  }
0x1065   :  { %6800 = vperm.xlu1 %9532, %v6766_v30  }
0x1069   :  { %6805 = vperm.xlu1 %9532, %v6767_v31  }
0x106d   :  { %6810 = vperm.xlu1 %9532, %v6768_v32  }
0x10cc   :  { %v6690_v37 = vpop.xlane.xlu0 %6689 }
0x10cd   :  { %v6696_v38 = vadd.f32 %v6690_v37, %v6674_v33  ;;  %v6684_v39 = vpop.xlane.xlu1 %6683 }
0x10ce   :  { %v6694_v40 = vadd.f32 %v6684_v39, %v6668_v34 }
0x10cf   :  { %v6700_v41 = vmul.f32 0.125, %v6696_v38 }
0x10d0   :  { %v6698_v45 = vmul.f32 0.125, %v6694_v40 }
0x10d1   :  { %v10719_v42 = vsub.f32 %v9110_v6, %v6700_v41  ;;  %v10721_v44 = vsub.f32 %v9158_v19, %v6700_v41  ;;  %v6693_v46 = vpop.xlane.xlu1 %6692 }
0x10d2   :  { %v6697_v48 = vadd.f32 %v6693_v46, %v6677_v36  ;;  %v10726_v51 = vsub.f32 %v10673_v9, %v6698_v45  ;;  %v10738_v60 = vsub.f32 %v6647_v20, %v6698_v45 }
0x10d3   :  { %v6708_v49 = vmul.f32 %v10719_v42, %v10719_v42  ;;  %v6732_v54 = vmul.f32 %v10721_v44, %v10721_v44 }
0x10d4   :  { %v6701_v50 = vmul.f32 0.125, %v6697_v48  ;;  %v6706_v43 = vmul.f32 %v10726_v51, %v10726_v51  ;;  %v6730_v3 = vmul.f32 %v10738_v60, %v10738_v60 }
0x10d5   :  { %v6687_v52 = vpop.xlane.xlu1 %6686  ;;  %v6716_v53 = vsel %vm190_vm3, %v6708_v49, 0.0  ;;  %v6740_v61 = vsel %vm190_vm3, %v6732_v54, 0.0 }
0x10d6   :  { %v10732_v55 = vsub.f32 %v10675_v10, %v6701_v50  ;;  %v10734_v56 = vsub.f32 %v9159_v22, %v6701_v50  ;;  %v6695_v57 = vadd.f32 %v6687_v52, %v6671_v35  ;;  %6717 = vadd.xlane.f32.xlu0 %v6716_v53  ;;  %v6710_v2 = vsel %vm190_vm3, %v6706_v43, 0.0 }
0x10d7   :  { %v6734_v6 = vsel %vm190_vm3, %v6730_v3, 0.0 }
0x10d8   :  { %v6699_v58 = vmul.f32 0.125, %v6695_v57  ;;  %v6709_v59 = vmul.f32 %v10732_v55, %v10732_v55  ;;  %v6733_v1 = vmul.f32 %v10734_v56, %v10734_v56 }
0x10d9   :  { %v10787_v7 = vpop.permute.xlu1 %6781 }
0x10da   :  { %v10744_v62 = vsub.f32 %v10679_v13, %v6699_v58  ;;  %6741 = vadd.xlane.f32.xlu0 %v6740_v61  ;;  %v6719_v63 = vsel %vm190_vm3, %v6709_v59, 0.0  ;;  %v10752_v4 = vsub.f32 %v6650_v24, %v6699_v58  ;;  %v6743_v5 = vsel %vm190_vm3, %v6733_v1, 0.0  ;;  %v10771_v13 = vld [vmem:[%s10933_s25] sm:$0x3] }
0x10db   :  { %6720 = vadd.xlane.f32.xlu1 %v6719_v63  ;;  %9520 = vmatprep.subr.msk.bf16.mxu1 %vm194_vm2, %v10771_v13  ;;  %v10777_v14 = vsel %vm194_vm2, %v10771_v13, 0 }
0x10dc   :  { %v6707_v47 = vmul.f32 %v10744_v62, %v10744_v62  ;;  %v6731_v9 = vmul.f32 %v10752_v4, %v10752_v4  ;;  %9161 = vmatpush3.bf16.msra.mxu1 %v10777_v14 }
0x10dd   :  { %9521 = vmatprep.subr.msk.bf16.mxu1 %vm194_vm2, %v10783_v15  ;;  %v10789_v16 = vpop.permute.xlu1 %6786 }
0x10de   :  { %6711 = vadd.xlane.f32.xlu0 %v6710_v2  ;;  %v6713_v8 = vsel %vm190_vm3, %v6707_v47, 0.0  ;;  %v6737_v10 = vsel %vm190_vm3, %v6731_v9, 0.0 }
0x10df   :  { %6744 = vadd.xlane.f32.xlu1 %v6743_v5 }
0x10e1   :  { %v10791_v17 = vpop.permute.xlu1 %6791 }
0x10e2   :  { %6735 = vadd.xlane.f32.xlu0 %v6734_v6 }
0x10e3   :  { %6714 = vadd.xlane.f32.xlu1 %v6713_v8 }
0x10e5   :  { %v10793_v18 = vpop.permute.xlu1 %6800 }
0x10e7   :  { %6738 = vadd.xlane.f32.xlu1 %v6737_v10 }
0x10e9   :  { %v10795_v19 = vpop.permute.xlu1 %6805 }
0x10ed   :  { %v10797_v21 = vpop.permute.xlu1 %6810 }
0x10f8   :  { %6815 = vperm.xlu1 %9532, %v6769_v11   ;;  %6776 = vperm.xlu0 %9531, %v6762_v12   ;;  %v6925_v11 = vsel %vm194_vm2, %v10783_v15, 0  ;;  %v7946_v12 = vld [vmem:[%s10933_s25 + $0x4] sm:$0x3] }
0x1163   :  { %v6718_v20 = vpop.xlane.xlu0 %6717 }
0x1167   :  { %v6742_v22 = vpop.xlane.xlu0 %6741 }
0x1168   :  { %v6748_v23 = vadd.f32 %v6742_v22, %v6718_v20  ;;  %v6721_v24 = vpop.xlane.xlu1 %6720 }
0x116a   :  { %v6752_v25 = vmul.f32 0.125, %v6748_v23  ;;  %v7069_v23 = vsel %vm194_vm2, %v7946_v12, 0 }
0x116b   :  { %v6712_v26 = vpop.xlane.xlu0 %6711 }
0x116c   :  { %v6745_v27 = vpop.xlane.xlu1 %6744  ;;  %v6756_v29 = vadd.f32 1e-05, %v6752_v25 }
0x116d   :  { %v6749_v28 = vadd.f32 %v6745_v27, %v6721_v24  ;;  %v7951_v24 = vld [vmem:[%s10933_s25 + $0x6] sm:$0x3] }
0x116e   :  { %9573 = vrsqrt.f32 %v6756_v29  ;;  %v7171_v29 = vsel %vm194_vm2, %v7951_v24, 0 }
0x116f   :  { %v6753_v30 = vmul.f32 0.125, %v6749_v28  ;;  %v6736_v31 = vpop.xlane.xlu0 %6735 }
0x1170   :  { %v6746_v32 = vadd.f32 %v6736_v31, %v6712_v26  ;;  %v6715_v33 = vpop.xlane.xlu1 %6714 }
0x1171   :  { %v6757_v34 = vadd.f32 1e-05, %v6753_v30 }
0x1172   :  { %v6750_v35 = vmul.f32 0.125, %v6746_v32 }
0x1173   :  { %9575 = vrsqrt.f32 %v6757_v34 }
0x1174   :  { %v6754_v36 = vadd.f32 1e-05, %v6750_v35  ;;  %v6739_v37 = vpop.xlane.xlu1 %6738 }
0x1175   :  { %v6747_v38 = vadd.f32 %v6739_v37, %v6715_v33 }
0x1176   :  { %9577 = vrsqrt.f32 %v6754_v36 }
0x1177   :  { %v6751_v39 = vmul.f32 0.125, %v6747_v38  ;;  %v6777_v50 = vpop.permute.xlu0 %6776 }
0x1178   :  { %v9574_v41 = vpop.eup %9573  ;;  %v6816_v58 = vpop.permute.xlu1 %6815 }
0x1179   :  { %v6755_v40 = vadd.f32 1e-05, %v6751_v39  ;;  %v6772_v48 = vmul.f32 %v9574_v41, %v10719_v42  ;;  %v6824_v27 = vmul.f32 %v9574_v41, %v10721_v44 }
0x117b   :  { %9579 = vrsqrt.f32 %v6755_v40  ;;  %v6796_v54 = vmul.f32 %v10789_v16, %v6772_v48  ;;  %v6828_v31 = vmul.f32 %v6824_v27, %v10789_v16 }
0x117d   :  { %v9576_v45 = vpop.eup %9575 }
0x117e   :  { %v6773_v46 = vmul.f32 %v9576_v45, %v10732_v55  ;;  %v6820_v55 = vadd.f32 %v10797_v21, %v6796_v54 }
0x1180   :  { %v9578_v49 = vpop.eup %9577  ;;  %v6797_v52 = vmul.f32 %v10791_v17, %v6773_v46  ;;  %vm6836_vm12 = vcmp.ge.f32.partialorder %v6820_v55, 0.0 }
0x1181   :  { %v6770_v53 = vmul.f32 %v9578_v49, %v10726_v51  ;;  %v6840_v51 = vmul.f32 0.2, %v6820_v55  ;;  %v6822_v22 = vmul.f32 %v9578_v49, %v10738_v60 }
0x1182   :  { %v6821_v61 = vadd.f32 %v6816_v58, %v6797_v52 }
0x1183   :  { %v6794_v57 = vmul.f32 %v6777_v50, %v6770_v53  ;;  %v6826_v26 = vmul.f32 %v6822_v22, %v6777_v50  ;;  %v7943_v53 = vld [vmem:[%s10934_s24 + $0x1] sm:$0x1] }
0x1184   :  { %v6841_v1 = vmul.f32 0.2, %v6821_v61  ;;  %vm6837_vm1 = vcmp.ge.f32.partialorder %v6821_v61, 0.0 }
0x1185   :  { %v9580_v59 = vpop.eup %9579  ;;  %v6818_v63 = vadd.f32 %v10793_v18, %v6794_v57  ;;  %v6830_v28 = vadd.f32 %v6826_v26, %v10793_v18 }
0x1186   :  { %v6771_v43 = vmul.f32 %v9580_v59, %v10744_v62  ;;  %v6845_v47 = vsel %vm6837_vm1, %v6821_v61, %v6841_v1  ;;  %v6844_v62 = vsel %vm6836_vm12, %v6820_v55, %v6840_v51  ;;  %v6823_v20 = vmul.f32 %v9580_v59, %v10752_v4  ;;  %v6919_v1 = vld [vmem:[%s10934_s24] sm:$0x1] }
0x1187   :  { %v6838_v2 = vmul.f32 0.2, %v6818_v63  ;;  %vm6834_vm6 = vcmp.ge.f32.partialorder %v6818_v63, 0.0  ;;  %v6860_v10 = vpack.c.bf16 %v6845_v47, %v6844_v62  ;;  %v6825_v4 = vmul.f32 %v9576_v45, %v10734_v56 }
0x1188   :  { %v6795_v42 = vmul.f32 %v10787_v7, %v6771_v43  ;;  %v6827_v25 = vmul.f32 %v6823_v20, %v10787_v7  ;;  %v6850_v56 = vmul.f32 0.2, %v6830_v28  ;;  %vm6846_vm15 = vcmp.ge.f32.partialorder %v6830_v28, 0.0 }
0x1189   :  { %v6842_v6 = vsel %vm6834_vm6, %v6818_v63, %v6838_v2  ;;  %v6829_v30 = vmul.f32 %v6825_v4, %v10791_v17 }
0x118a   :  { %v6819_v3 = vadd.f32 %v10795_v19, %v6795_v42  ;;  %v6831_v60 = vadd.f32 %v6827_v25, %v10795_v19  ;;  %v6832_v19 = vadd.f32 %v6828_v31, %v10797_v21  ;;  %v6854_v32 = vsel %vm6846_vm15, %v6830_v28, %v6850_v56 }
0x118b   :  { %v6833_v44 = vadd.f32 %v6829_v30, %v6816_v58 }
0x118c   :  { %vm6835_vm13 = vcmp.ge.f32.partialorder %v6819_v3, 0.0  ;;  %v6839_v5 = vmul.f32 0.2, %v6819_v3  ;;  %v6851_v7 = vmul.f32 0.2, %v6831_v60  ;;  %vm6847_vm14 = vcmp.ge.f32.partialorder %v6831_v60, 0.0 }
0x118d   :  { %v6853_v17 = vmul.f32 0.2, %v6833_v44  ;;  %vm6849_vm4 = vcmp.ge.f32.partialorder %v6833_v44, 0.0  ;;  %v6852_v16 = vmul.f32 0.2, %v6832_v19  ;;  %vm6848_vm7 = vcmp.ge.f32.partialorder %v6832_v19, 0.0 }
0x118e   :  { %v6843_v8 = vsel %vm6835_vm13, %v6819_v3, %v6839_v5  ;;  %v6855_v18 = vsel %vm6847_vm14, %v6831_v60, %v6851_v7  ;;  %v7954_v60 = vld [vmem:[%s10934_s24 + $0x3] sm:$0x1] }
0x118f   :  { %v6859_v9 = vpack.c.bf16 %v6843_v8, %v6842_v6  ;;  %v7270_v33 = vpack.c.bf16 %v6855_v18, %v6854_v32  ;;  %v6856_v34 = vsel %vm6848_vm7, %v6832_v19, %v6852_v16 }
0x1191   :  { %9162 = vmatprep.mubr.msk.bf16.mxu1 %vm190_vm3, %v6859_v9 }
0x1192   :  { %9163 = vmatmul.mubr.msk.bf16.vlgmr.msra.gmra.mrb[236].mxu1 %vm190_vm3, %v6860_v10 }
0x1193   :  { %9168 = vmatprep.mubr.msk.bf16.mxu1 %vm190_vm3, %v6859_v9  ;;  %9167 = vmatpush3.bf16.msra.mxu1 %v6925_v11 }
0x1194   :  { %9522 = vmatprep.subr.msk.bf16.mxu1 %vm194_vm2, %v7946_v12 }
0x119a   :  { %9169 = vmatmul.mubr.msk.bf16.vlgmr.msra.gmra.mrb[240].mxu1 %vm190_vm3, %v6860_v10 }
0x119b   :  { %9190 = vmatprep.mubr.msk.bf16.mxu1 %vm190_vm3, %v6859_v9  ;;  %9189 = vmatpush3.bf16.msra.mxu1 %v7069_v23 }
0x119c   :  { %9523 = vmatprep.subr.msk.bf16.mxu1 %vm194_vm2, %v7951_v24 }
0x11a2   :  { %9191 = vmatmul.mubr.msk.bf16.vlgmr.msra.gmra.mrb[244].mxu1 %vm190_vm3, %v6860_v10 }
0x11a3   :  { %9204 = vmatprep.mubr.msk.bf16.mxu1 %vm190_vm3, %v6859_v9  ;;  %9203 = vmatpush3.bf16.msra.mxu1 %v7171_v29 }
0x11a4   :  { %9524 = vmatprep.subr.msk.bf16.mxu1 %vm194_vm2, %v10771_v13  ;;  %v6857_v13 = vsel %vm6849_vm4, %v6833_v44, %v6853_v17 }
0x11a5   :  { %v7271_v35 = vpack.c.bf16 %v6857_v13, %v6856_v34 }
0x11aa   :  { %9205 = vmatmul.mubr.msk.bf16.vlgmr.msra.gmra.mrb[248].mxu1 %vm190_vm3, %v6860_v10  ;;  %v7949_v10 = vld [vmem:[%s10934_s24 + $0x2] sm:$0x1] }
0x11ab   :  { %9218 = vmatprep.mubr.msk.bf16.mxu1 %vm190_vm3, %v7270_v33  ;;  %9217 = vmatpush3.bf16.msra.mxu1 %v10777_v14 }
0x11ac   :  { %9525 = vmatprep.subr.msk.bf16.mxu1 %vm194_vm2, %v10783_v15 }
0x11b2   :  { %9219 = vmatmul.mubr.msk.bf16.vlgmr.msra.gmra.mrb[252].mxu1 %vm190_vm3, %v7271_v35 }
0x11b3   :  { %9224 = vmatprep.mubr.msk.bf16.mxu1 %vm190_vm3, %v7270_v33  ;;  %9223 = vmatpush3.bf16.msra.mxu1 %v6925_v11 }
0x11b4   :  { %9526 = vmatprep.subr.msk.bf16.mxu1 %vm194_vm2, %v7946_v12 }
0x11ba   :  { %9225 = vmatmul.mubr.msk.bf16.vlgmr.msra.gmra.mrb[0].mxu1 %vm190_vm3, %v7271_v35 }
0x11bb   :  { %9246 = vmatprep.mubr.msk.bf16.mxu1 %vm190_vm3, %v7270_v33  ;;  %9245 = vmatpush3.bf16.msra.mxu1 %v7069_v23 }
0x11bc   :  { %9527 = vmatprep.subr.msk.bf16.mxu1 %vm194_vm2, %v7951_v24  ;;  %vm7656_vm2 = vcmask 0  }
0x11c2   :  { %9247 = vmatmul.mubr.msk.bf16.vlgmr.msra.gmra.mrb[4].mxu1 %vm190_vm3, %v7271_v35 }
0x11c3   :  { %9260 = vmatprep.mubr.msk.bf16.mxu1 %vm190_vm3, %v7270_v33  ;;  %9259 = vmatpush3.bf16.msra.mxu1 %v7171_v29 }
0x11ca   :  { %9261 = vmatmul.mubr.msk.bf16.vlgmr.msra.gmra.mrb[8].mxu1 %vm190_vm3, %v7271_v35 }
0x1265   :  { %v9164_v14 = vpop.f32.mrb[236].mxu1 }
0x1266   :  { %v6904_v15 = vpop.f32.mrb[237].mxu1 }
0x1267   :  { %v9165_v21 = vpop.f32.mrb[238].mxu1 }
0x1268   :  { %v6921_v36 = vpack.c.bf16 %v9165_v21, %v9164_v14  ;;  %v6907_v37 = vpop.f32.mrb[239].mxu1 }
0x1269   :  { %v6920_v38 = vpack.c.bf16 %v6907_v37, %v6904_v15 }
0x126d   :  { %v9170_v39 = vpop.f32.mrb[240].mxu1 }
0x126e   :  { %v6961_v40 = vpop.f32.mrb[241].mxu1 }
0x126f   :  { %v9171_v41 = vpop.f32.mrb[242].mxu1 }
0x1270   :  { %v6979_v45 = vpack.c.bf16 %v9171_v41, %v9170_v39  ;;  %v6964_v46 = vpop.f32.mrb[243].mxu1 }
0x1271   :  { %v6978_v48 = vpack.c.bf16 %v6964_v46, %v6961_v40 }
0x1273   :  { %9173 = vmatpush3.bf16.msra.mxu0 %v6978_v48 }
0x1274   :  { %9174 = vmatprep.subr.bf16.mxu0 %v9589_v0 }
0x1275   :  { %v9192_v49 = vpop.f32.mrb[244].mxu1 }
0x1276   :  { %v7105_v50 = vpop.f32.mrb[245].mxu1 }
0x1277   :  { %9175 = vmatpush3.bf16.msra.mxu0 %v6979_v45  ;;  %v9193_v52 = vpop.f32.mrb[246].mxu1 }
0x1278   :  { %v7123_v54 = vpack.c.bf16 %v9193_v52, %v9192_v49  ;;  %v7108_v57 = vpop.f32.mrb[247].mxu1  ;;  %9180 = vmatprep.subr.bf16.mxu0 %v9589_v0 }
0x1279   :  { %v7122_v58 = vpack.c.bf16 %v7108_v57, %v7105_v50 }
0x127a   :  { %9177 = vmatmul.mubr.msk.bf16.vlgmr.msra.gmra.mrb[84].mxu0 %vm1743_vm11, %v7943_v53 }
0x127b   :  { %9181 = vmatpush3.bf16.msra.mxu0 %v6920_v38  ;;  %9184 = vmatprep.mubr.msk.bf16.mxu0 %vm9590_vm0, %v9589_v0 }
0x127c   :  { %9182 = vmatprep.subr.bf16.mxu0 %v9589_v0 }
0x127d   :  { %v9206_v59 = vpop.f32.mrb[248].mxu1 }
0x127e   :  { %v7207_v61 = vpop.f32.mrb[249].mxu1 }
0x127f   :  { %9183 = vmatpush3.bf16.msra.mxu0 %v6921_v36  ;;  %v9207_v43 = vpop.f32.mrb[250].mxu1 }
0x1280   :  { %v7225_v63 = vpack.c.bf16 %v9207_v43, %v9206_v59  ;;  %v7210_v55 = vpop.f32.mrb[251].mxu1  ;;  %9194 = vmatprep.subr.bf16.mxu0 %v9589_v0 }
0x1281   :  { %v7224_v42 = vpack.c.bf16 %v7210_v55, %v7207_v61 }
0x1285   :  { %v9220_v2 = vpop.f32.mrb[252].mxu1 }
0x1286   :  { %9185 = vmatmul.mubr.msk.bf16.vlgmr.msra.gmra.mrb[84].mxu0 %vm1743_vm11, %v6919_v1  ;;  %v7312_v3 = vpop.f32.mrb[253].mxu1 }
0x1287   :  { %9195 = vmatpush3.bf16.msra.mxu0 %v7122_v58  ;;  %v9221_v51 = vpop.f32.mrb[254].mxu1  ;;  %9198 = vmatprep.mubr.msk.bf16.mxu0 %vm9590_vm0, %v9589_v0 }
0x1288   :  { %v7328_v5 = vpack.c.bf16 %v9221_v51, %v9220_v2  ;;  %v7315_v47 = vpop.f32.mrb[255].mxu1  ;;  %9196 = vmatprep.subr.bf16.mxu0 %v9589_v0 }
0x1289   :  { %v7327_v6 = vpack.c.bf16 %v7315_v47, %v7312_v3 }
0x128b   :  { %9197 = vmatpush3.bf16.msra.mxu0 %v7123_v54 }
0x128c   :  { %9208 = vmatprep.subr.bf16.mxu0 %v9589_v0 }
0x128d   :  { %v9226_v8 = vpop.f32.mrb[0].mxu1 }
0x128e   :  { %v7363_v62 = vpop.f32.mrb[1].mxu1 }
0x128f   :  { %v9227_v9 = vpop.f32.mrb[2].mxu1 }
0x1290   :  { %v7379_v11 = vpack.c.bf16 %v9227_v9, %v9226_v8  ;;  %v7366_v12 = vpop.f32.mrb[3].mxu1 }
0x1291   :  { %v7378_v20 = vpack.c.bf16 %v7366_v12, %v7363_v62 }
0x1292   :  { %9199 = vmatmul.mubr.msk.bf16.vlgmr.msra.gmra.mrb[84].mxu0 %vm1743_vm11, %v7949_v10 }
0x1293   :  { %9209 = vmatpush3.bf16.msra.mxu0 %v7224_v42  ;;  %9212 = vmatprep.mubr.msk.bf16.mxu0 %vm9590_vm0, %v9589_v0 }
0x1294   :  { %9210 = vmatprep.subr.bf16.mxu0 %v9589_v0 }
0x1295   :  { %v9248_v22 = vpop.f32.mrb[4].mxu1 }
0x1296   :  { %v7494_v23 = vpop.f32.mrb[5].mxu1 }
0x1297   :  { %9211 = vmatpush3.bf16.msra.mxu0 %v7225_v63  ;;  %v9249_v24 = vpop.f32.mrb[6].mxu1 }
0x1298   :  { %v7510_v25 = vpack.c.bf16 %v9249_v24, %v9248_v22  ;;  %v7497_v26 = vpop.f32.mrb[7].mxu1  ;;  %9228 = vmatprep.subr.bf16.mxu0 %v9589_v0 }
0x1299   :  { %v7509_v4 = vpack.c.bf16 %v7497_v26, %v7494_v23 }
0x129d   :  { %v9262_v27 = vpop.f32.mrb[8].mxu1 }
0x129e   :  { %9213 = vmatmul.mubr.msk.bf16.vlgmr.msra.gmra.mrb[84].mxu0 %vm1743_vm11, %v7954_v60  ;;  %v7586_v28 = vpop.f32.mrb[9].mxu1 }
0x129f   :  { %9229 = vmatpush3.bf16.msra.mxu0 %v7378_v20  ;;  %v9263_v29 = vpop.f32.mrb[10].mxu1  ;;  %9232 = vmatprep.mubr.msk.bf16.mxu0 %vm9590_vm0, %v9589_v0 }
0x12a0   :  { %v7602_v30 = vpack.c.bf16 %v9263_v29, %v9262_v27  ;;  %v7589_v7 = vpop.f32.mrb[11].mxu1  ;;  %9230 = vmatprep.subr.bf16.mxu0 %v9589_v0 }
0x12a1   :  { %v7601_v31 = vpack.c.bf16 %v7589_v7, %v7586_v28 }
0x12a3   :  { %9231 = vmatpush3.bf16.msra.mxu0 %v7379_v11 }
0x12a4   :  { %9236 = vmatprep.subr.bf16.mxu0 %v9589_v0 }
0x12a6   :  { %9233 = vmatmul.mubr.msk.bf16.vlgmr.msra.gmra.mrb[88].mxu0 %vm1743_vm11, %v7943_v53 }
0x12a7   :  { %9237 = vmatpush3.bf16.msra.mxu0 %v7327_v6  ;;  %9240 = vmatprep.mubr.msk.bf16.mxu0 %vm9590_vm0, %v9589_v0 }
0x12a8   :  { %9238 = vmatprep.subr.bf16.mxu0 %v9589_v0 }
0x12ab   :  { %9239 = vmatpush3.bf16.msra.mxu0 %v7328_v5 }
0x12ac   :  { %9250 = vmatprep.subr.bf16.mxu0 %v9589_v0 }
0x12b2   :  { %9241 = vmatmul.mubr.msk.bf16.vlgmr.msra.gmra.mrb[88].mxu0 %vm1743_vm11, %v6919_v1 }
0x12b3   :  { %9251 = vmatpush3.bf16.msra.mxu0 %v7509_v4  ;;  %9254 = vmatprep.mubr.msk.bf16.mxu0 %vm9590_vm0, %v9589_v0 }
0x12b4   :  { %9252 = vmatprep.subr.bf16.mxu0 %v9589_v0 }
0x12b7   :  { %9253 = vmatpush3.bf16.msra.mxu0 %v7510_v25 }
0x12b8   :  { %9264 = vmatprep.subr.bf16.mxu0 %v9589_v0 }
0x12be   :  { %9255 = vmatmul.mubr.msk.bf16.vlgmr.msra.gmra.mrb[88].mxu0 %vm1743_vm11, %v7949_v10 }
0x12bf   :  { %9265 = vmatpush3.bf16.msra.mxu0 %v7601_v31  ;;  %9268 = vmatprep.mubr.msk.bf16.mxu0 %vm9590_vm0, %v9589_v0 }
0x12c0   :  { %9266 = vmatprep.subr.bf16.mxu0 %v9589_v0 }
0x12c3   :  { %9267 = vmatpush3.bf16.msra.mxu0 %v7602_v30 }
0x12ca   :  { %9269 = vmatmul.mubr.msk.bf16.vlgmr.msra.gmra.mrb[88].mxu0 %vm1743_vm11, %v7954_v60 }
0x1371   :  { %v7263_v56 = vpop.f32.mrb[84].mxu0 }
0x1372   :  { %v7644_v44 = vsub.f32 0.0, %v7263_v56  ;;  %v9214_v18 = vpop.f32.mrb[85].mxu0 }
0x1373   :  { %v7266_v19 = vpop.f32.mrb[86].mxu0 }
0x1374   :  { %v7645_v32 = vmul.f32 1.442695, %v7644_v44  ;;  %v9215_v17 = vpop.f32.mrb[87].mxu0 }
0x1376   :  { %9581 = vpow2.f32 %v7645_v32 }
0x1380   :  { %v9582_v33 = vpop.eup %9581 }
0x1381   :  { %v7647_v16 = vadd.f32 1.0, %v9582_v33 }
0x1383   :  { %9583 = vrcp.f32 %v7647_v16 }
0x138d   :  { %v9584_v13 = vpop.eup %9583 }
0x138e   :  { %7657 = vst.msk [vmem:[%s10935_s26] sm:$0x1] %vm7656_vm2, %v9584_v13 }
0x139d   :  { %v7637_v0 = vpop.f32.mrb[88].mxu0 }
0x139e   :  { %v7650_v34 = vsub.f32 0.0, %v7637_v0  ;;  %v9270_v35 = vpop.f32.mrb[89].mxu0 }
0x139f   :  { %v7640_v14 = vpop.f32.mrb[90].mxu0 }
0x13a0   :  { %v7651_v15 = vmul.f32 1.442695, %v7650_v34  ;;  %v9271_v21 = vpop.f32.mrb[91].mxu0 }
0x13a2   :  { %9585 = vpow2.f32 %v7651_v15 }
0x13ac   :  { %v9586_v36 = vpop.eup %9585 }
0x13ad   :  { %v7653_v37 = vadd.f32 1.0, %v9586_v36 }
0x13af   :  { %9587 = vrcp.f32 %v7653_v37 }
0x13b9   :  { %v9588_v38 = vpop.eup %9587 }
0x13ba   :  { %7658 = vst.msk [vmem:[%s10935_s26 + $0x1] sm:$0x1] %vm7656_vm2, %v9588_v38 }

</bundles_post_ra>
